<compile_context>
chip_gen: v7x
topology: tpu7x:2x2x1
jax: 0.10.0
libtpu: 0.0.40
codegen_flags: <defaults>
</compile_context>

<pallas_src>
import math
from functools import partial

import jax
import jax.numpy as jnp
from jax.experimental import pallas as pl
from jax.experimental.pallas import tpu as pltpu


# -----------------------------------------------------------------------------
# Tile-size helper: largest multiple of `base` that divides `dim` and is <= target;
# falls back to the full dim (always legal as a block size).
# Targets are budgeted for v7x's 64 MiB physical / 32 MiB default-scoped VMEM with
# double-buffered inputs; on v5e/v6e they are comfortably within budget as well.
# -----------------------------------------------------------------------------
def _tile(dim, target, base):
    if dim <= target:
        return dim
    t = (target // base) * base
    while t >= base:
        if dim % t == 0:
            return t
        t -= base
    return dim


# -----------------------------------------------------------------------------
# Kernel 1: fused MHA (QKV proj -> per-head attention -> out proj) + residual + LN
# One grid step per batch element; all heads are processed inside the kernel so
# HBM loads/stores stay lane-dense (last dim = E) and launch overhead is amortized.
# -----------------------------------------------------------------------------
def _fused_mha_ln_kernel(H, scale, eps,
                         q_ref, k_ref, v_ref, res_ref, mask_ref,
                         w_in_ref, b_in_ref, w_out_ref, b_out_ref,
                         g_ref, bb_ref, o_ref):
    Lq = q_ref.shape[1]
    E = q_ref.shape[2]
    Dh = E // H

    x_q = q_ref[0]                     # (Lq, E)
    x_k = k_ref[0]                     # (Lkv, E)
    x_v = v_ref[0]                     # (Lkv, E)

    # Fused QKV projections (single kernel, no HBM round trip for q/k/v).
    q = jnp.dot(x_q, w_in_ref[0], preferred_element_type=jnp.float32) + b_in_ref[0]
    k = jnp.dot(x_k, w_in_ref[1], preferred_element_type=jnp.float32) + b_in_ref[1]
    v = jnp.dot(x_v, w_in_ref[2], preferred_element_type=jnp.float32) + b_in_ref[2]

    mask = mask_ref[...]               # (Lq, Lkv) additive mask
    w_out = w_out_ref[...]             # (E, E), already transposed on host

    # All heads inside one kernel invocation (static unrolled loop, 2-D ops only).
    # The per-head out-projection contribution is accumulated directly so the
    # head outputs never need to be concatenated.
    acc = jnp.zeros((Lq, E), jnp.float32)
    for h in range(H):
        lo, hi = h * Dh, (h + 1) * Dh
        qh = q[:, lo:hi]
        kh = k[:, lo:hi]
        vh = v[:, lo:hi]
        # q @ k^T via dot_general contracting on the last dims (no explicit k.T).
        s = jax.lax.dot_general(qh, kh, (((1,), (1,)), ((), ())),
                                preferred_element_type=jnp.float32) * scale + mask
        m = jnp.max(s, axis=-1, keepdims=True)
        p = jnp.exp(s - m)
        d = jnp.sum(p, axis=-1, keepdims=True)
        # EUP approximate reciprocal + one Newton step (keeps full f32 accuracy
        # so the 2e-4 check against the reference still passes).
        r = pl.reciprocal(d, approx=True)
        r = r * (2.0 - d * r)
        p = p * r
        oh = jnp.dot(p, vh, preferred_element_type=jnp.float32)            # (Lq, Dh)
        acc = acc + jnp.dot(oh, w_out[lo:hi, :],
                            preferred_element_type=jnp.float32)            # (Lq, E)

    attn = acc + b_out_ref[...]
    y = attn + res_ref[0]
    mu = jnp.mean(y, axis=-1, keepdims=True)
    var = jnp.mean(jnp.square(y - mu), axis=-1, keepdims=True)
    yn = (y - mu) * jax.lax.rsqrt(var + eps)
    o_ref[0] = (yn * g_ref[...] + bb_ref[...]).astype(o_ref.dtype)


def fused_mha_layernorm(q_in, k_in, v_in, residual, mask, mha_p, ln_p,
                        num_heads, eps=1e-5):
    # q_in/residual: (Nb, Lq, E); k_in/v_in: (Nb, Lkv, E); mask: (Lq, Lkv) additive.
    Nb, Lq, E = q_in.shape
    Lkv = k_in.shape[1]
    Dh = E // num_heads
    in_w, in_b = mha_p["in_proj_weight"], mha_p["in_proj_bias"]

    # Host-side (one-time, tiny) weight prep so the kernel needs no transposes.
    w_in_t = jnp.stack([in_w[:E].T, in_w[E:2 * E].T, in_w[2 * E:].T])   # (3, E, E)
    b_in = in_b.reshape(3, 1, E)
    w_out_t = mha_p["out_proj_weight"].T                                 # (E, E)
    b_out = mha_p["out_proj_bias"].reshape(1, E)
    gamma = ln_p["weight"].reshape(1, E)
    beta = ln_p["bias"].reshape(1, E)
    scale = 1.0 / math.sqrt(Dh)

    return pl.pallas_call(
        partial(_fused_mha_ln_kernel, num_heads, scale, eps),
        out_shape=jax.ShapeDtypeStruct((Nb, Lq, E), q_in.dtype),
        grid=(Nb,),
        in_specs=[
            pl.BlockSpec((1, Lq, E), lambda n: (n, 0, 0)),     # q input
            pl.BlockSpec((1, Lkv, E), lambda n: (n, 0, 0)),    # k input
            pl.BlockSpec((1, Lkv, E), lambda n: (n, 0, 0)),    # v input
            pl.BlockSpec((1, Lq, E), lambda n: (n, 0, 0)),     # residual
            pl.BlockSpec((Lq, Lkv), lambda n: (0, 0)),         # additive mask
            pl.BlockSpec((3, E, E), lambda n: (0, 0, 0)),      # qkv weights (T)
            pl.BlockSpec((3, 1, E), lambda n: (0, 0, 0)),      # qkv biases
            pl.BlockSpec((E, E), lambda n: (0, 0)),            # out weight (T)
            pl.BlockSpec((1, E), lambda n: (0, 0)),            # out bias
            pl.BlockSpec((1, E), lambda n: (0, 0)),            # LN gamma
            pl.BlockSpec((1, E), lambda n: (0, 0)),            # LN beta
        ],
        out_specs=pl.BlockSpec((1, Lq, E), lambda n: (n, 0, 0)),
        compiler_params=pltpu.CompilerParams(
            dimension_semantics=("parallel",),
            vmem_limit_bytes=32 * 1024 * 1024),
    )(q_in, k_in, v_in, residual, mask, w_in_t, b_in, w_out_t, b_out, gamma, beta)


# -----------------------------------------------------------------------------
# Kernel 2: tiled matmul + bias (+ReLU), f32 VMEM accumulator over the K axis.
# -----------------------------------------------------------------------------
def _matmul_bias_kernel(relu, x_ref, w_ref, b_ref, o_ref, acc_ref):
    k = pl.program_id(2)

    @pl.when(k == 0)
    def _():
        acc_ref[...] = jnp.zeros_like(acc_ref)

    acc_ref[...] += jnp.dot(x_ref[...], w_ref[...],
                            preferred_element_type=jnp.float32)

    @pl.when(k == pl.num_programs(2) - 1)
    def _():
        y = acc_ref[...] + b_ref[...]
        if relu:
            y = jnp.maximum(y, 0.0)
        o_ref[...] = y.astype(o_ref.dtype)


def linear_pallas(x, w, b, relu=False, tm=256, tn=256, tk=512):
    # x: (M, K), w: (K, N), b: (N,) -> (M, N)
    M, K = x.shape
    N = w.shape[1]
    tm = _tile(M, tm, 8)
    tn = _tile(N, tn, 128)
    tk = _tile(K, tk, 128)
    return pl.pallas_call(
        partial(_matmul_bias_kernel, relu),
        out_shape=jax.ShapeDtypeStruct((M, N), x.dtype),
        grid=(M // tm, N // tn, K // tk),
        in_specs=[
            pl.BlockSpec((tm, tk), lambda i, j, k: (i, k)),
            pl.BlockSpec((tk, tn), lambda i, j, k: (k, j)),
            pl.BlockSpec((1, tn), lambda i, j, k: (0, j)),
        ],
        out_specs=pl.BlockSpec((tm, tn), lambda i, j, k: (i, j)),
        scratch_shapes=[pltpu.VMEM((tm, tn), jnp.float32)],
        compiler_params=pltpu.CompilerParams(
            dimension_semantics=("parallel", "parallel", "arbitrary"),
            vmem_limit_bytes=32 * 1024 * 1024),
    )(x, w, b.reshape(1, N))


# -----------------------------------------------------------------------------
# Kernel 3: tiled matmul + bias + residual + LayerNorm fused (FF2 + norm2 path).
# LN reduces over the full feature row, so the N (=E) axis is kept whole.
# -----------------------------------------------------------------------------
def _matmul_res_ln_kernel(eps, x_ref, w_ref, b_ref, res_ref, g_ref, bb_ref,
                          o_ref, acc_ref):
    k = pl.program_id(1)

    @pl.when(k == 0)
    def _():
        acc_ref[...] = jnp.zeros_like(acc_ref)

    acc_ref[...] += jnp.dot(x_ref[...], w_ref[...],
                            preferred_element_type=jnp.float32)

    @pl.when(k == pl.num_programs(1) - 1)
    def _():
        y = acc_ref[...] + b_ref[...] + res_ref[...].astype(jnp.float32)
        mu = jnp.mean(y, axis=-1, keepdims=True)
        var = jnp.mean(jnp.square(y - mu), axis=-1, keepdims=True)
        yn = (y - mu) * jax.lax.rsqrt(var + eps)
        o_ref[...] = (yn * g_ref[...] + bb_ref[...]).astype(o_ref.dtype)


def matmul_residual_layernorm(x, w, b, res, gamma, beta, eps=1e-5, tm=256, tk=256):
    # out = LayerNorm(x @ w + b + res); x: (M, K), w: (K, E), res: (M, E)
    M, K = x.shape
    E = w.shape[1]
    tm = _tile(M, tm, 8)
    tk = _tile(K, tk, 128)
    return pl.pallas_call(
        partial(_matmul_res_ln_kernel, eps),
        out_shape=jax.ShapeDtypeStruct((M, E), x.dtype),
        grid=(M // tm, K // tk),
        in_specs=[
            pl.BlockSpec((tm, tk), lambda i, k: (i, k)),
            pl.BlockSpec((tk, E), lambda i, k: (k, 0)),
            pl.BlockSpec((1, E), lambda i, k: (0, 0)),
            pl.BlockSpec((tm, E), lambda i, k: (i, 0)),
            pl.BlockSpec((1, E), lambda i, k: (0, 0)),
            pl.BlockSpec((1, E), lambda i, k: (0, 0)),
        ],
        out_specs=pl.BlockSpec((tm, E), lambda i, k: (i, 0)),
        scratch_shapes=[pltpu.VMEM((tm, E), jnp.float32)],
        compiler_params=pltpu.CompilerParams(
            dimension_semantics=("parallel", "arbitrary"),
            vmem_limit_bytes=32 * 1024 * 1024),
    )(x, w, b.reshape(1, E), res, gamma.reshape(1, E), beta.reshape(1, E))


# -----------------------------------------------------------------------------
# DecoderBlock forward: 4 pallas_calls total.
# -----------------------------------------------------------------------------
def decoder_block_forward(params, x, value, key, src_mask, trg_mask, heads):
    # x/value/key: (L, N, E) seq-first. Go batch-major once (and back once at the end)
    # instead of transposing activations around every attention call.
    L, Nb, E = x.shape
    xb = jnp.transpose(x, (1, 0, 2))          # (Nb, L, E)
    vb = jnp.transpose(value, (1, 0, 2))
    kb = jnp.transpose(key, (1, 0, 2))

    # attention = self.attention(x, x, x, attn_mask=trg_mask)[0]
    # query = dropout(norm(attention + x))    (dropout = identity in eval mode)
    query = fused_mha_layernorm(xb, xb, xb, xb, trg_mask,
                                params["attn"], params["norm"], heads)

    tb = params["tblock"]
    # TransformerBlock: self.attention(value, key, query) -> MHA(q=value, k=key, v=query)
    # x2 = dropout(norm1(attention + query))
    x2 = fused_mha_layernorm(vb, kb, query, query, src_mask,
                             tb["attn"], tb["norm1"], heads)

    # feed_forward; out = dropout(norm2(forward + x2))
    x2_2d = x2.reshape(Nb * L, E)
    h = linear_pallas(x2_2d, tb["ff"]["w1"].T, tb["ff"]["b1"], relu=True)
    out2d = matmul_residual_layernorm(h, tb["ff"]["w2"].T, tb["ff"]["b2"], x2_2d,
                                      tb["norm2"]["weight"], tb["norm2"]["bias"])
    out = out2d.reshape(Nb, L, E)
    return jnp.transpose(out, (1, 0, 2))      # back to (L, N, E)


# -----------------------------------------------------------------------------
# Pure-JAX reference (numerical check of the Pallas path)
# -----------------------------------------------------------------------------
def _mha_ref(query, key, value, p, mask, H):
    Lq, Nb, E = query.shape
    Lk = key.shape[0]
    Dh = E // H
    w, b = p["in_proj_weight"], p["in_proj_bias"]
    q = query @ w[:E].T + b[:E]
    k = key @ w[E:2 * E].T + b[E:2 * E]
    v = value @ w[2 * E:].T + b[2 * E:]
    q = q.reshape(Lq, Nb * H, Dh).transpose(1, 0, 2) / math.sqrt(Dh)
    k = k.reshape(Lk, Nb * H, Dh).transpose(1, 0, 2)
    v = v.reshape(Lk, Nb * H, Dh).transpose(1, 0, 2)
    s = jnp.einsum('bqd,bkd->bqk', q, k) + mask
    pr = jax.nn.softmax(s, axis=-1)
    o = jnp.einsum('bqk,bkd->bqd', pr, v)
    o = o.transpose(1, 0, 2).reshape(Lq * Nb, E) @ p["out_proj_weight"].T + p["out_proj_bias"]
    return o.reshape(Lq, Nb, E)


def _ln_ref(x, g, b, eps=1e-5):
    mu = jnp.mean(x, axis=-1, keepdims=True)
    var = jnp.mean(jnp.square(x - mu), axis=-1, keepdims=True)
    return (x - mu) * jax.lax.rsqrt(var + eps) * g + b


def decoder_block_ref(params, x, value, key, src_mask, trg_mask, heads):
    attn = _mha_ref(x, x, x, params["attn"], trg_mask, heads)
    query = _ln_ref(attn + x, params["norm"]["weight"], params["norm"]["bias"])
    tb = params["tblock"]
    attn2 = _mha_ref(value, key, query, tb["attn"], src_mask, heads)
    x2 = _ln_ref(attn2 + query, tb["norm1"]["weight"], tb["norm1"]["bias"])
    h = jnp.maximum(x2 @ tb["ff"]["w1"].T + tb["ff"]["b1"], 0.0)
    fwd = h @ tb["ff"]["w2"].T + tb["ff"]["b2"]
    return _ln_ref(fwd + x2, tb["norm2"]["weight"], tb["norm2"]["bias"])


# -----------------------------------------------------------------------------
# Deterministic parameter init (shapes per torch module __init__)
# -----------------------------------------------------------------------------
def init_mha_params(key, E):
    k1, k2, k3, k4 = jax.random.split(key, 4)
    return {
        "in_proj_weight": 0.08 * jax.random.normal(k1, (3 * E, E), jnp.float32),
        "in_proj_bias": 0.02 * jax.random.normal(k2, (3 * E,), jnp.float32),
        "out_proj_weight": 0.08 * jax.random.normal(k3, (E, E), jnp.float32),
        "out_proj_bias": 0.02 * jax.random.normal(k4, (E,), jnp.float32),
    }


def init_ln_params(key, E):
    k1, k2 = jax.random.split(key)
    return {"weight": 1.0 + 0.1 * jax.random.normal(k1, (E,), jnp.float32),
            "bias": 0.1 * jax.random.normal(k2, (E,), jnp.float32)}


def init_params(key, E, FE):
    ks = jax.random.split(key, 9)
    return {
        "attn": init_mha_params(ks[0], E),
        "norm": init_ln_params(ks[1], E),
        "tblock": {
            "attn": init_mha_params(ks[2], E),
            "norm1": init_ln_params(ks[3], E),
            "norm2": init_ln_params(ks[4], E),
            "ff": {
                "w1": 0.08 * jax.random.normal(ks[5], (FE * E, E), jnp.float32),
                "b1": 0.02 * jax.random.normal(ks[6], (FE * E,), jnp.float32),
                "w2": 0.08 * jax.random.normal(ks[7], (E, FE * E), jnp.float32),
                "b2": 0.02 * jax.random.normal(ks[8], (E,), jnp.float32),
            },
        },
    }


# TODO(synk): dropout is modeled as identity (eval mode); training-mode RNG dropout
# is intentionally not implemented.

if __name__ == "__main__":
    E, H, FE = 128, 4, 4           # feature_num, heads, forward_expansion
    L, Nb = 64, 2                  # seq_len, batch

    root = jax.random.PRNGKey(0)
    kp, kx, kv, kk = jax.random.split(root, 4)
    params = init_params(kp, E, FE)

    x = jax.random.normal(kx, (L, Nb, E), jnp.float32)
    value = jax.random.normal(kv, (L, Nb, E), jnp.float32)
    key_t = jax.random.normal(kk, (L, Nb, E), jnp.float32)

    # trg_mask: causal additive mask; src_mask: no masking
    idx = jnp.arange(L)
    trg_mask = jnp.where(idx[:, None] >= idx[None, :], 0.0, -1e9).astype(jnp.float32)
    src_mask = jnp.zeros((L, L), jnp.float32)

    fwd = jax.jit(decoder_block_forward, static_argnums=(6,))
    out = fwd(params, x, value, key_t, src_mask, trg_mask, H)
    out = jax.block_until_ready(out)

    ref = decoder_block_ref(params, x, value, key_t, src_mask, trg_mask, H)
    assert out.shape == (L, Nb, E)
    assert jnp.allclose(out, ref, atol=2e-4, rtol=2e-4), \
        f"mismatch: max abs err {jnp.max(jnp.abs(out - ref))}"

    print("KERNEL_OK")
</pallas_src>

<mosaic_0001>
module attributes {stable_mosaic.version = 11 : i64} {
  func.func @_matmul_bias_kernel(%arg0: i32, %arg1: i32, %arg2: i32, %arg3: memref<128x128xf32, #tpu.memory_space<vmem>>, %arg4: memref<128x256xf32, #tpu.memory_space<vmem>>, %arg5: memref<1x256xf32, #tpu.memory_space<vmem>>, %arg6: memref<128x256xf32, #tpu.memory_space<vmem>>, %arg7: memref<128x256xf32, #tpu.memory_space<vmem>>) attributes {dimension_semantics = [#tpu.dimension_semantics<parallel>, #tpu.dimension_semantics<parallel>, #tpu.dimension_semantics<arbitrary>], iteration_bounds = array<i64: 1, 2, 1>, scalar_prefetch = 0 : i64, scratch_operands = 1 : i64, tpu.core_type = #tpu.core_type<tc>, window_params = [{transform_indices = @transform_0, window_bounds = array<i64: 128, 128>}, {transform_indices = @transform_1, window_bounds = array<i64: 128, 256>}, {transform_indices = @transform_2, window_bounds = array<i64: 1, 256>}, {transform_indices = @transform_3, window_bounds = array<i64: 128, 256>}]} {
    %c0_i32 = arith.constant 0 : i32
    %0 = arith.cmpi eq, %arg2, %c0_i32 : i32
    %1 = arith.extui %0 : i1 to i32
    %c0_i32_0 = arith.constant 0 : i32
    %2 = arith.cmpi ne, %1, %c0_i32_0 : i32
    scf.if %2 {
      %cst_10 = arith.constant 0.000000e+00 : f32
      %12 = vector.broadcast %cst_10 : f32 to vector<128x256xf32>
      %c0_11 = arith.constant 0 : index
      %c0_12 = arith.constant 0 : index
      %13 = vector.load %arg7[%c0_11, %c0_12] : memref<128x256xf32, #tpu.memory_space<vmem>>, vector<128x256xf32>
      tpu.vector_store %arg7[%c0_11, %c0_12], %12 {strides = array<i32>} : memref<128x256xf32, #tpu.memory_space<vmem>>, vector<128x256xf32>,
    } else {
    }
    %c0 = arith.constant 0 : index
    %c0_1 = arith.constant 0 : index
    %3 = vector.load %arg7[%c0, %c0_1] : memref<128x256xf32, #tpu.memory_space<vmem>>, vector<128x256xf32>
    %c0_2 = arith.constant 0 : index
    %c0_3 = arith.constant 0 : index
    %4 = vector.load %arg3[%c0_2, %c0_3] : memref<128x128xf32, #tpu.memory_space<vmem>>, vector<128x128xf32>
    %c0_4 = arith.constant 0 : index
    %c0_5 = arith.constant 0 : index
    %5 = vector.load %arg4[%c0_4, %c0_5] : memref<128x256xf32, #tpu.memory_space<vmem>>, vector<128x256xf32>
    %cst = arith.constant dense<0.000000e+00> : vector<128x256xf32>
    %6 = tpu.matmul %4, %5, %cst {dimension_numbers = #tpu.dot_dimension_numbers<[1], [0], [0], [1], [0, 0, 1, 1], [], []>} : vector<128x128xf32>, vector<128x256xf32>, vector<128x256xf32> -> vector<128x256xf32>
    %7 = arith.addf %3, %6 : vector<128x256xf32>
    %c0_6 = arith.constant 0 : index
    %c0_7 = arith.constant 0 : index
    %8 = vector.load %arg7[%c0_6, %c0_7] : memref<128x256xf32, #tpu.memory_space<vmem>>, vector<128x256xf32>
    tpu.vector_store %arg7[%c0_6, %c0_7], %7 {strides = array<i32>} : memref<128x256xf32, #tpu.memory_space<vmem>>, vector<128x256xf32>,
    %c0_i32_8 = arith.constant 0 : i32
    %9 = arith.cmpi eq, %arg2, %c0_i32_8 : i32
    %10 = arith.extui %9 : i1 to i32
    %c0_i32_9 = arith.constant 0 : i32
    %11 = arith.cmpi ne, %10, %c0_i32_9 : i32
    scf.if %11 {
      %c0_10 = arith.constant 0 : index
      %c0_11 = arith.constant 0 : index
      %12 = vector.load %arg7[%c0_10, %c0_11] : memref<128x256xf32, #tpu.memory_space<vmem>>, vector<128x256xf32>
      %c0_12 = arith.constant 0 : index
      %c0_13 = arith.constant 0 : index
      %13 = vector.load %arg5[%c0_12, %c0_13] : memref<1x256xf32, #tpu.memory_space<vmem>>, vector<1x256xf32>
      %14 = vector.broadcast %13 : vector<1x256xf32> to vector<128x256xf32>
      %15 = arith.addf %12, %14 : vector<128x256xf32>
      %cst_14 = arith.constant 0.000000e+00 : f32
      %16 = vector.broadcast %cst_14 : f32 to vector<128x256xf32>
      %17 = arith.maximumf %15, %16 : vector<128x256xf32>
      %c0_15 = arith.constant 0 : index
      %c0_16 = arith.constant 0 : index
      %18 = vector.load %arg6[%c0_15, %c0_16] : memref<128x256xf32, #tpu.memory_space<vmem>>, vector<128x256xf32>
      tpu.vector_store %arg6[%c0_15, %c0_16], %17 {strides = array<i32>} : memref<128x256xf32, #tpu.memory_space<vmem>>, vector<128x256xf32>,
    } else {
    }
    return
  }
  func.func @transform_0(%arg0: i32, %arg1: i32, %arg2: i32) -> (i32, i32) {
    %c0_i32 = arith.constant 0 : i32
    return %arg0, %arg2 : i32, i32
  }
  func.func @transform_1(%arg0: i32, %arg1: i32, %arg2: i32) -> (i32, i32) {
    %c0_i32 = arith.constant 0 : i32
    return %arg2, %arg1 : i32, i32
  }
  func.func @transform_2(%arg0: i32, %arg1: i32, %arg2: i32) -> (i32, i32) {
    %c0_i32 = arith.constant 0 : i32
    %c0_i32_0 = arith.constant 0 : i32
    return %c0_i32, %arg1 : i32, i32
  }
  func.func @transform_3(%arg0: i32, %arg1: i32, %arg2: i32) -> (i32, i32) {
    %c0_i32 = arith.constant 0 : i32
    return %arg0, %arg1 : i32, i32
  }
}

module attributes {stable_mosaic.version = 11 : i64} {
  func.func @_fused_mha_ln_kernel(%arg0: i32, %arg1: memref<1x64x128xf32, #tpu.memory_space<vmem>>, %arg2: memref<1x64x128xf32, #tpu.memory_space<vmem>>, %arg3: memref<1x64x128xf32, #tpu.memory_space<vmem>>, %arg4: memref<1x64x128xf32, #tpu.memory_space<vmem>>, %arg5: memref<64x64xf32, #tpu.memory_space<vmem>>, %arg6: memref<3x128x128xf32, #tpu.memory_space<vmem>>, %arg7: memref<3x1x128xf32, #tpu.memory_space<vmem>>, %arg8: memref<128x128xf32, #tpu.memory_space<vmem>>, %arg9: memref<1x128xf32, #tpu.memory_space<vmem>>, %arg10: memref<1x128xf32, #tpu.memory_space<vmem>>, %arg11: memref<1x128xf32, #tpu.memory_space<vmem>>, %arg12: memref<1x64x128xf32, #tpu.memory_space<vmem>>) attributes {dimension_semantics = [#tpu.dimension_semantics<parallel>], iteration_bounds = array<i64: 2>, scalar_prefetch = 0 : i64, scratch_operands = 0 : i64, tpu.core_type = #tpu.core_type<tc>, window_params = [{transform_indices = @transform_0, window_bounds = array<i64: 1, 64, 128>}, {transform_indices = @transform_1, window_bounds = array<i64: 1, 64, 128>}, {transform_indices = @transform_2, window_bounds = array<i64: 1, 64, 128>}, {transform_indices = @transform_3, window_bounds = array<i64: 1, 64, 128>}, {pipeline_mode = #tpu.pipeline_mode<synchronous>, transform_indices = @transform_4, window_bounds = array<i64: 64, 64>}, {pipeline_mode = #tpu.pipeline_mode<synchronous>, transform_indices = @transform_5, window_bounds = array<i64: 3, 128, 128>}, {pipeline_mode = #tpu.pipeline_mode<synchronous>, transform_indices = @transform_6, window_bounds = array<i64: 3, 1, 128>}, {pipeline_mode = #tpu.pipeline_mode<synchronous>, transform_indices = @transform_7, window_bounds = array<i64: 128, 128>}, {pipeline_mode = #tpu.pipeline_mode<synchronous>, transform_indices = @transform_8, window_bounds = array<i64: 1, 128>}, {pipeline_mode = #tpu.pipeline_mode<synchronous>, transform_indices = @transform_9, window_bounds = array<i64: 1, 128>}, {pipeline_mode = #tpu.pipeline_mode<synchronous>, transform_indices = @transform_10, window_bounds = array<i64: 1, 128>}, {transform_indices = @transform_11, window_bounds = array<i64: 1, 64, 128>}]} {
    %c0 = arith.constant 0 : index
    %c0_0 = arith.constant 0 : index
    %c0_1 = arith.constant 0 : index
    %0 = vector.load %arg1[%c0, %c0_0, %c0_1] : memref<1x64x128xf32, #tpu.memory_space<vmem>>, vector<1x64x128xf32>
    %1 = vector.shape_cast %0 : vector<1x64x128xf32> to vector<64x128xf32>
    %c0_2 = arith.constant 0 : index
    %c0_3 = arith.constant 0 : index
    %c0_4 = arith.constant 0 : index
    %2 = vector.load %arg2[%c0_2, %c0_3, %c0_4] : memref<1x64x128xf32, #tpu.memory_space<vmem>>, vector<1x64x128xf32>
    %3 = vector.shape_cast %2 : vector<1x64x128xf32> to vector<64x128xf32>
    %c0_5 = arith.constant 0 : index
    %c0_6 = arith.constant 0 : index
    %c0_7 = arith.constant 0 : index
    %4 = vector.load %arg3[%c0_5, %c0_6, %c0_7] : memref<1x64x128xf32, #tpu.memory_space<vmem>>, vector<1x64x128xf32>
    %5 = vector.shape_cast %4 : vector<1x64x128xf32> to vector<64x128xf32>
    %c0_8 = arith.constant 0 : index
    %c0_9 = arith.constant 0 : index
    %c0_10 = arith.constant 0 : index
    %6 = vector.load %arg6[%c0_8, %c0_9, %c0_10] : memref<3x128x128xf32, #tpu.memory_space<vmem>>, vector<1x128x128xf32>
    %7 = vector.shape_cast %6 : vector<1x128x128xf32> to vector<128x128xf32>
    %cst = arith.constant dense<0.000000e+00> : vector<64x128xf32>
    %8 = tpu.matmul %1, %7, %cst {dimension_numbers = #tpu.dot_dimension_numbers<[1], [0], [0], [1], [0, 0, 1, 1], [], []>} : vector<64x128xf32>, vector<128x128xf32>, vector<64x128xf32> -> vector<64x128xf32>
    %c0_11 = arith.constant 0 : index
    %c0_12 = arith.constant 0 : index
    %c0_13 = arith.constant 0 : index
    %9 = vector.load %arg7[%c0_11, %c0_12, %c0_13] : memref<3x1x128xf32, #tpu.memory_space<vmem>>, vector<1x1x128xf32>
    %10 = vector.shape_cast %9 : vector<1x1x128xf32> to vector<1x128xf32>
    %11 = vector.broadcast %10 : vector<1x128xf32> to vector<64x128xf32>
    %12 = arith.addf %8, %11 : vector<64x128xf32>
    %c1 = arith.constant 1 : index
    %c0_14 = arith.constant 0 : index
    %c0_15 = arith.constant 0 : index
    %13 = vector.load %arg6[%c1, %c0_14, %c0_15] : memref<3x128x128xf32, #tpu.memory_space<vmem>>, vector<1x128x128xf32>
    %14 = vector.shape_cast %13 : vector<1x128x128xf32> to vector<128x128xf32>
    %cst_16 = arith.constant dense<0.000000e+00> : vector<64x128xf32>
    %15 = tpu.matmul %3, %14, %cst_16 {dimension_numbers = #tpu.dot_dimension_numbers<[1], [0], [0], [1], [0, 0, 1, 1], [], []>} : vector<64x128xf32>, vector<128x128xf32>, vector<64x128xf32> -> vector<64x128xf32>
    %c1_17 = arith.constant 1 : index
    %c0_18 = arith.constant 0 : index
    %c0_19 = arith.constant 0 : index
    %16 = vector.load %arg7[%c1_17, %c0_18, %c0_19] : memref<3x1x128xf32, #tpu.memory_space<vmem>>, vector<1x1x128xf32>
    %17 = vector.shape_cast %16 : vector<1x1x128xf32> to vector<1x128xf32>
    %18 = vector.broadcast %17 : vector<1x128xf32> to vector<64x128xf32>
    %19 = arith.addf %15, %18 : vector<64x128xf32>
    %c2 = arith.constant 2 : index
    %c0_20 = arith.constant 0 : index
    %c0_21 = arith.constant 0 : index
    %20 = vector.load %arg6[%c2, %c0_20, %c0_21] : memref<3x128x128xf32, #tpu.memory_space<vmem>>, vector<1x128x128xf32>
    %21 = vector.shape_cast %20 : vector<1x128x128xf32> to vector<128x128xf32>
    %cst_22 = arith.constant dense<0.000000e+00> : vector<64x128xf32>
    %22 = tpu.matmul %5, %21, %cst_22 {dimension_numbers = #tpu.dot_dimension_numbers<[1], [0], [0], [1], [0, 0, 1, 1], [], []>} : vector<64x128xf32>, vector<128x128xf32>, vector<64x128xf32> -> vector<64x128xf32>
    %c2_23 = arith.constant 2 : index
    %c0_24 = arith.constant 0 : index
    %c0_25 = arith.constant 0 : index
    %23 = vector.load %arg7[%c2_23, %c0_24, %c0_25] : memref<3x1x128xf32, #tpu.memory_space<vmem>>, vector<1x1x128xf32>
    %24 = vector.shape_cast %23 : vector<1x1x128xf32> to vector<1x128xf32>
    %25 = vector.broadcast %24 : vector<1x128xf32> to vector<64x128xf32>
    %26 = arith.addf %22, %25 : vector<64x128xf32>
    %c0_26 = arith.constant 0 : index
    %c0_27 = arith.constant 0 : index
    %27 = vector.load %arg5[%c0_26, %c0_27] : memref<64x64xf32, #tpu.memory_space<vmem>>, vector<64x64xf32>
    %c0_28 = arith.constant 0 : index
    %c0_29 = arith.constant 0 : index
    %28 = vector.load %arg8[%c0_28, %c0_29] : memref<128x128xf32, #tpu.memory_space<vmem>>, vector<128x128xf32>
    %cst_30 = arith.constant 0.000000e+00 : f32
    %29 = vector.broadcast %cst_30 : f32 to vector<64x128xf32>
    %30 = vector.extract_strided_slice %12 {offsets = [0, 0], sizes = [64, 32], strides = [1, 1]} : vector<64x128xf32> to vector<64x32xf32>
    %31 = vector.extract_strided_slice %19 {offsets = [0, 0], sizes = [64, 32], strides = [1, 1]} : vector<64x128xf32> to vector<64x32xf32>
    %32 = vector.extract_strided_slice %26 {offsets = [0, 0], sizes = [64, 32], strides = [1, 1]} : vector<64x128xf32> to vector<64x32xf32>
    %cst_31 = arith.constant dense<0.000000e+00> : vector<64x64xf32>
    %33 = tpu.matmul %30, %31, %cst_31 {dimension_numbers = #tpu.dot_dimension_numbers<[1], [1], [0], [0], [0, 0, 1, 0], [], []>} : vector<64x32xf32>, vector<64x32xf32>, vector<64x64xf32> -> vector<64x64xf32>
    %cst_32 = arith.constant 0.176776692 : f32
    %34 = vector.broadcast %cst_32 : f32 to vector<64x64xf32>
    %35 = arith.mulf %33, %34 : vector<64x64xf32>
    %36 = arith.addf %35, %27 : vector<64x64xf32>
    %cst_33 = arith.constant dense<0xFF800000> : vector<64xf32>
    %37 = vector.multi_reduction <maximumf>, %36, %cst_33 [1] : vector<64x64xf32> to vector<64xf32>
    %38 = vector.shape_cast %37 : vector<64xf32> to vector<64x1xf32>
    %39 = vector.broadcast %38 : vector<64x1xf32> to vector<64x64xf32>
    %40 = arith.subf %36, %39 : vector<64x64xf32>
    %41 = math.exp %40 : vector<64x64xf32>
    %cst_34 = arith.constant dense<0.000000e+00> : vector<64xf32>
    %42 = vector.multi_reduction <add>, %41, %cst_34 [1] : vector<64x64xf32> to vector<64xf32>
    %43 = vector.shape_cast %42 : vector<64xf32> to vector<64x1xf32>
    %44 = tpu.reciprocal %43 {approx = true} : vector<64x1xf32> -> vector<64x1xf32>
    %45 = arith.mulf %43, %44 : vector<64x1xf32>
    %cst_35 = arith.constant 2.000000e+00 : f32
    %46 = vector.broadcast %cst_35 : f32 to vector<64x1xf32>
    %47 = arith.subf %46, %45 : vector<64x1xf32>
    %48 = arith.mulf %44, %47 : vector<64x1xf32>
    %49 = vector.broadcast %48 : vector<64x1xf32> to vector<64x64xf32>
    %50 = arith.mulf %41, %49 : vector<64x64xf32>
    %cst_36 = arith.constant dense<0.000000e+00> : vector<64x32xf32>
    %51 = tpu.matmul %50, %32, %cst_36 {dimension_numbers = #tpu.dot_dimension_numbers<[1], [0], [0], [1], [0, 0, 1, 1], [], []>} : vector<64x64xf32>, vector<64x32xf32>, vector<64x32xf32> -> vector<64x32xf32>
    %52 = vector.extract_strided_slice %28 {offsets = [0, 0], sizes = [32, 128], strides = [1, 1]} : vector<128x128xf32> to vector<32x128xf32>
    %cst_37 = arith.constant dense<0.000000e+00> : vector<64x128xf32>
    %53 = tpu.matmul %51, %52, %cst_37 {dimension_numbers = #tpu.dot_dimension_numbers<[1], [0], [0], [1], [0, 0, 1, 1], [], []>} : vector<64x32xf32>, vector<32x128xf32>, vector<64x128xf32> -> vector<64x128xf32>
    %54 = arith.addf %29, %53 : vector<64x128xf32>
    %55 = vector.extract_strided_slice %12 {offsets = [0, 32], sizes = [64, 32], strides = [1, 1]} : vector<64x128xf32> to vector<64x32xf32>
    %56 = vector.extract_strided_slice %19 {offsets = [0, 32], sizes = [64, 32], strides = [1, 1]} : vector<64x128xf32> to vector<64x32xf32>
    %57 = vector.extract_strided_slice %26 {offsets = [0, 32], sizes = [64, 32], strides = [1, 1]} : vector<64x128xf32> to vector<64x32xf32>
    %cst_38 = arith.constant dense<0.000000e+00> : vector<64x64xf32>
    %58 = tpu.matmul %55, %56, %cst_38 {dimension_numbers = #tpu.dot_dimension_numbers<[1], [1], [0], [0], [0, 0, 1, 0], [], []>} : vector<64x32xf32>, vector<64x32xf32>, vector<64x64xf32> -> vector<64x64xf32>
    %cst_39 = arith.constant 0.176776692 : f32
    %59 = vector.broadcast %cst_39 : f32 to vector<64x64xf32>
    %60 = arith.mulf %58, %59 : vector<64x64xf32>
    %61 = arith.addf %60, %27 : vector<64x64xf32>
    %cst_40 = arith.constant dense<0xFF800000> : vector<64xf32>
    %62 = vector.multi_reduction <maximumf>, %61, %cst_40 [1] : vector<64x64xf32> to vector<64xf32>
    %63 = vector.shape_cast %62 : vector<64xf32> to vector<64x1xf32>
    %64 = vector.broadcast %63 : vector<64x1xf32> to vector<64x64xf32>
    %65 = arith.subf %61, %64 : vector<64x64xf32>
    %66 = math.exp %65 : vector<64x64xf32>
    %cst_41 = arith.constant dense<0.000000e+00> : vector<64xf32>
    %67 = vector.multi_reduction <add>, %66, %cst_41 [1] : vector<64x64xf32> to vector<64xf32>
    %68 = vector.shape_cast %67 : vector<64xf32> to vector<64x1xf32>
    %69 = tpu.reciprocal %68 {approx = true} : vector<64x1xf32> -> vector<64x1xf32>
    %70 = arith.mulf %68, %69 : vector<64x1xf32>
    %cst_42 = arith.constant 2.000000e+00 : f32
    %71 = vector.broadcast %cst_42 : f32 to vector<64x1xf32>
    %72 = arith.subf %71, %70 : vector<64x1xf32>
    %73 = arith.mulf %69, %72 : vector<64x1xf32>
    %74 = vector.broadcast %73 : vector<64x1xf32> to vector<64x64xf32>
    %75 = arith.mulf %66, %74 : vector<64x64xf32>
    %cst_43 = arith.constant dense<0.000000e+00> : vector<64x32xf32>
    %76 = tpu.matmul %75, %57, %cst_43 {dimension_numbers = #tpu.dot_dimension_numbers<[1], [0], [0], [1], [0, 0, 1, 1], [], []>} : vector<64x64xf32>, vector<64x32xf32>, vector<64x32xf32> -> vector<64x32xf32>
    %77 = vector.extract_strided_slice %28 {offsets = [32, 0], sizes = [32, 128], strides = [1, 1]} : vector<128x128xf32> to vector<32x128xf32>
    %cst_44 = arith.constant dense<0.000000e+00> : vector<64x128xf32>
    %78 = tpu.matmul %76, %77, %cst_44 {dimension_numbers = #tpu.dot_dimension_numbers<[1], [0], [0], [1], [0, 0, 1, 1], [], []>} : vector<64x32xf32>, vector<32x128xf32>, vector<64x128xf32> -> vector<64x128xf32>
    %79 = arith.addf %54, %78 : vector<64x128xf32>
    %80 = vector.extract_strided_slice %12 {offsets = [0, 64], sizes = [64, 32], strides = [1, 1]} : vector<64x128xf32> to vector<64x32xf32>
    %81 = vector.extract_strided_slice %19 {offsets = [0, 64], sizes = [64, 32], strides = [1, 1]} : vector<64x128xf32> to vector<64x32xf32>
    %82 = vector.extract_strided_slice %26 {offsets = [0, 64], sizes = [64, 32], strides = [1, 1]} : vector<64x128xf32> to vector<64x32xf32>
    %cst_45 = arith.constant dense<0.000000e+00> : vector<64x64xf32>
    %83 = tpu.matmul %80, %81, %cst_45 {dimension_numbers = #tpu.dot_dimension_numbers<[1], [1], [0], [0], [0, 0, 1, 0], [], []>} : vector<64x32xf32>, vector<64x32xf32>, vector<64x64xf32> -> vector<64x64xf32>
    %cst_46 = arith.constant 0.176776692 : f32
    %84 = vector.broadcast %cst_46 : f32 to vector<64x64xf32>
    %85 = arith.mulf %83, %84 : vector<64x64xf32>
    %86 = arith.addf %85, %27 : vector<64x64xf32>
    %cst_47 = arith.constant dense<0xFF800000> : vector<64xf32>
    %87 = vector.multi_reduction <maximumf>, %86, %cst_47 [1] : vector<64x64xf32> to vector<64xf32>
    %88 = vector.shape_cast %87 : vector<64xf32> to vector<64x1xf32>
    %89 = vector.broadcast %88 : vector<64x1xf32> to vector<64x64xf32>
    %90 = arith.subf %86, %89 : vector<64x64xf32>
    %91 = math.exp %90 : vector<64x64xf32>
    %cst_48 = arith.constant dense<0.000000e+00> : vector<64xf32>
    %92 = vector.multi_reduction <add>, %91, %cst_48 [1] : vector<64x64xf32> to vector<64xf32>
    %93 = vector.shape_cast %92 : vector<64xf32> to vector<64x1xf32>
    %94 = tpu.reciprocal %93 {approx = true} : vector<64x1xf32> -> vector<64x1xf32>
    %95 = arith.mulf %93, %94 : vector<64x1xf32>
    %cst_49 = arith.constant 2.000000e+00 : f32
    %96 = vector.broadcast %cst_49 : f32 to vector<64x1xf32>
    %97 = arith.subf %96, %95 : vector<64x1xf32>
    %98 = arith.mulf %94, %97 : vector<64x1xf32>
    %99 = vector.broadcast %98 : vector<64x1xf32> to vector<64x64xf32>
    %100 = arith.mulf %91, %99 : vector<64x64xf32>
    %cst_50 = arith.constant dense<0.000000e+00> : vector<64x32xf32>
    %101 = tpu.matmul %100, %82, %cst_50 {dimension_numbers = #tpu.dot_dimension_numbers<[1], [0], [0], [1], [0, 0, 1, 1], [], []>} : vector<64x64xf32>, vector<64x32xf32>, vector<64x32xf32> -> vector<64x32xf32>
    %102 = vector.extract_strided_slice %28 {offsets = [64, 0], sizes = [32, 128], strides = [1, 1]} : vector<128x128xf32> to vector<32x128xf32>
    %cst_51 = arith.constant dense<0.000000e+00> : vector<64x128xf32>
    %103 = tpu.matmul %101, %102, %cst_51 {dimension_numbers = #tpu.dot_dimension_numbers<[1], [0], [0], [1], [0, 0, 1, 1], [], []>} : vector<64x32xf32>, vector<32x128xf32>, vector<64x128xf32> -> vector<64x128xf32>
    %104 = arith.addf %79, %103 : vector<64x128xf32>
    %105 = vector.extract_strided_slice %12 {offsets = [0, 96], sizes = [64, 32], strides = [1, 1]} : vector<64x128xf32> to vector<64x32xf32>
    %106 = vector.extract_strided_slice %19 {offsets = [0, 96], sizes = [64, 32], strides = [1, 1]} : vector<64x128xf32> to vector<64x32xf32>
    %107 = vector.extract_strided_slice %26 {offsets = [0, 96], sizes = [64, 32], strides = [1, 1]} : vector<64x128xf32> to vector<64x32xf32>
    %cst_52 = arith.constant dense<0.000000e+00> : vector<64x64xf32>
    %108 = tpu.matmul %105, %106, %cst_52 {dimension_numbers = #tpu.dot_dimension_numbers<[1], [1], [0], [0], [0, 0, 1, 0], [], []>} : vector<64x32xf32>, vector<64x32xf32>, vector<64x64xf32> -> vector<64x64xf32>
    %cst_53 = arith.constant 0.176776692 : f32
    %109 = vector.broadcast %cst_53 : f32 to vector<64x64xf32>
    %110 = arith.mulf %108, %109 : vector<64x64xf32>
    %111 = arith.addf %110, %27 : vector<64x64xf32>
    %cst_54 = arith.constant dense<0xFF800000> : vector<64xf32>
    %112 = vector.multi_reduction <maximumf>, %111, %cst_54 [1] : vector<64x64xf32> to vector<64xf32>
    %113 = vector.shape_cast %112 : vector<64xf32> to vector<64x1xf32>
    %114 = vector.broadcast %113 : vector<64x1xf32> to vector<64x64xf32>
    %115 = arith.subf %111, %114 : vector<64x64xf32>
    %116 = math.exp %115 : vector<64x64xf32>
    %cst_55 = arith.constant dense<0.000000e+00> : vector<64xf32>
    %117 = vector.multi_reduction <add>, %116, %cst_55 [1] : vector<64x64xf32> to vector<64xf32>
    %118 = vector.shape_cast %117 : vector<64xf32> to vector<64x1xf32>
    %119 = tpu.reciprocal %118 {approx = true} : vector<64x1xf32> -> vector<64x1xf32>
    %120 = arith.mulf %118, %119 : vector<64x1xf32>
    %cst_56 = arith.constant 2.000000e+00 : f32
    %121 = vector.broadcast %cst_56 : f32 to vector<64x1xf32>
    %122 = arith.subf %121, %120 : vector<64x1xf32>
    %123 = arith.mulf %119, %122 : vector<64x1xf32>
    %124 = vector.broadcast %123 : vector<64x1xf32> to vector<64x64xf32>
    %125 = arith.mulf %116, %124 : vector<64x64xf32>
    %cst_57 = arith.constant dense<0.000000e+00> : vector<64x32xf32>
    %126 = tpu.matmul %125, %107, %cst_57 {dimension_numbers = #tpu.dot_dimension_numbers<[1], [0], [0], [1], [0, 0, 1, 1], [], []>} : vector<64x64xf32>, vector<64x32xf32>, vector<64x32xf32> -> vector<64x32xf32>
    %127 = vector.extract_strided_slice %28 {offsets = [96, 0], sizes = [32, 128], strides = [1, 1]} : vector<128x128xf32> to vector<32x128xf32>
    %cst_58 = arith.constant dense<0.000000e+00> : vector<64x128xf32>
    %128 = tpu.matmul %126, %127, %cst_58 {dimension_numbers = #tpu.dot_dimension_numbers<[1], [0], [0], [1], [0, 0, 1, 1], [], []>} : vector<64x32xf32>, vector<32x128xf32>, vector<64x128xf32> -> vector<64x128xf32>
    %129 = arith.addf %104, %128 : vector<64x128xf32>
    %c0_59 = arith.constant 0 : index
    %c0_60 = arith.constant 0 : index
    %130 = vector.load %arg9[%c0_59, %c0_60] : memref<1x128xf32, #tpu.memory_space<vmem>>, vector<1x128xf32>
    %131 = vector.broadcast %130 : vector<1x128xf32> to vector<64x128xf32>
    %132 = arith.addf %129, %131 : vector<64x128xf32>
    %c0_61 = arith.constant 0 : index
    %c0_62 = arith.constant 0 : index
    %c0_63 = arith.constant 0 : index
    %133 = vector.load %arg4[%c0_61, %c0_62, %c0_63] : memref<1x64x128xf32, #tpu.memory_space<vmem>>, vector<1x64x128xf32>
    %134 = vector.shape_cast %133 : vector<1x64x128xf32> to vector<64x128xf32>
    %135 = arith.addf %132, %134 : vector<64x128xf32>
    %cst_64 = arith.constant dense<0.000000e+00> : vector<64xf32>
    %136 = vector.multi_reduction <add>, %135, %cst_64 [1] : vector<64x128xf32> to vector<64xf32>
    %137 = vector.shape_cast %136 : vector<64xf32> to vector<64x1xf32>
    %cst_65 = arith.constant 1.280000e+02 : f32
    %138 = vector.broadcast %cst_65 : f32 to vector<64x1xf32>
    %139 = arith.divf %137, %138 : vector<64x1xf32>
    %140 = vector.broadcast %139 : vector<64x1xf32> to vector<64x128xf32>
    %141 = arith.subf %135, %140 : vector<64x128xf32>
    %142 = arith.mulf %141, %141 : vector<64x128xf32>
    %cst_66 = arith.constant dense<0.000000e+00> : vector<64xf32>
    %143 = vector.multi_reduction <add>, %142, %cst_66 [1] : vector<64x128xf32> to vector<64xf32>
    %144 = vector.shape_cast %143 : vector<64xf32> to vector<64x1xf32>
    %cst_67 = arith.constant 1.280000e+02 : f32
    %145 = vector.broadcast %cst_67 : f32 to vector<64x1xf32>
    %146 = arith.divf %144, %145 : vector<64x1xf32>
    %147 = vector.broadcast %139 : vector<64x1xf32> to vector<64x128xf32>
    %148 = arith.subf %135, %147 : vector<64x128xf32>
    %cst_68 = arith.constant 9.99999974E-6 : f32
    %149 = vector.broadcast %cst_68 : f32 to vector<64x1xf32>
    %150 = arith.addf %146, %149 : vector<64x1xf32>
    %151 = math.rsqrt %150 : vector<64x1xf32>
    %152 = vector.broadcast %151 : vector<64x1xf32> to vector<64x128xf32>
    %153 = arith.mulf %148, %152 : vector<64x128xf32>
    %c0_69 = arith.constant 0 : index
    %c0_70 = arith.constant 0 : index
    %154 = vector.load %arg10[%c0_69, %c0_70] : memref<1x128xf32, #tpu.memory_space<vmem>>, vector<1x128xf32>
    %155 = vector.broadcast %154 : vector<1x128xf32> to vector<64x128xf32>
    %156 = arith.mulf %153, %155 : vector<64x128xf32>
    %c0_71 = arith.constant 0 : index
    %c0_72 = arith.constant 0 : index
    %157 = vector.load %arg11[%c0_71, %c0_72] : memref<1x128xf32, #tpu.memory_space<vmem>>, vector<1x128xf32>
    %158 = vector.broadcast %157 : vector<1x128xf32> to vector<64x128xf32>
    %159 = arith.addf %156, %158 : vector<64x128xf32>
    %c0_73 = arith.constant 0 : index
    %c0_74 = arith.constant 0 : index
    %c0_75 = arith.constant 0 : index
    %160 = vector.load %arg12[%c0_73, %c0_74, %c0_75] : memref<1x64x128xf32, #tpu.memory_space<vmem>>, vector<1x64x128xf32>
    %161 = vector.shape_cast %160 : vector<1x64x128xf32> to vector<64x128xf32>
    %162 = vector.shape_cast %159 : vector<64x128xf32> to vector<1x64x128xf32>
    tpu.vector_store %arg12[%c0_73, %c0_74, %c0_75], %162 {strides = array<i32>} : memref<1x64x128xf32, #tpu.memory_space<vmem>>, vector<1x64x128xf32>,
    return
  }
  func.func @transform_0(%arg0: i32) -> (i32, i32, i32) {
    %c0_i32 = arith.constant 0 : i32
    %c0_i32_0 = arith.constant 0 : i32
    %c0_i32_1 = arith.constant 0 : i32
    return %arg0, %c0_i32, %c0_i32_0 : i32, i32, i32
  }
  func.func @transform_1(%arg0: i32) -> (i32, i32, i32) {
    %c0_i32 = arith.constant 0 : i32
    %c0_i32_0 = arith.constant 0 : i32
    %c0_i32_1 = arith.constant 0 : i32
    return %arg0, %c0_i32, %c0_i32_0 : i32, i32, i32
  }
  func.func @transform_2(%arg0: i32) -> (i32, i32, i32) {
    %c0_i32 = arith.constant 0 : i32
    %c0_i32_0 = arith.constant 0 : i32
    %c0_i32_1 = arith.constant 0 : i32
    return %arg0, %c0_i32, %c0_i32_0 : i32, i32, i32
  }
  func.func @transform_3(%arg0: i32) -> (i32, i32, i32) {
    %c0_i32 = arith.constant 0 : i32
    %c0_i32_0 = arith.constant 0 : i32
    %c0_i32_1 = arith.constant 0 : i32
    return %arg0, %c0_i32, %c0_i32_0 : i32, i32, i32
  }
  func.func @transform_4(%arg0: i32) -> (i32, i32) {
    %c0_i32 = arith.constant 0 : i32
    %c0_i32_0 = arith.constant 0 : i32
    %c0_i32_1 = arith.constant 0 : i32
    return %c0_i32, %c0_i32_0 : i32, i32
  }
  func.func @transform_5(%arg0: i32) -> (i32, i32, i32) {
    %c0_i32 = arith.constant 0 : i32
    %c0_i32_0 = arith.constant 0 : i32
    %c0_i32_1 = arith.constant 0 : i32
    %c0_i32_2 = arith.constant 0 : i32
    return %c0_i32, %c0_i32_0, %c0_i32_1 : i32, i32, i32
  }
  func.func @transform_6(%arg0: i32) -> (i32, i32, i32) {
    %c0_i32 = arith.constant 0 : i32
    %c0_i32_0 = arith.constant 0 : i32
    %c0_i32_1 = arith.constant 0 : i32
    %c0_i32_2 = arith.constant 0 : i32
    return %c0_i32, %c0_i32_0, %c0_i32_1 : i32, i32, i32
  }
  func.func @transform_7(%arg0: i32) -> (i32, i32) {
    %c0_i32 = arith.constant 0 : i32
    %c0_i32_0 = arith.constant 0 : i32
    %c0_i32_1 = arith.constant 0 : i32
    return %c0_i32, %c0_i32_0 : i32, i32
  }
  func.func @transform_8(%arg0: i32) -> (i32, i32) {
    %c0_i32 = arith.constant 0 : i32
    %c0_i32_0 = arith.constant 0 : i32
    %c0_i32_1 = arith.constant 0 : i32
    return %c0_i32, %c0_i32_0 : i32, i32
  }
  func.func @transform_9(%arg0: i32) -> (i32, i32) {
    %c0_i32 = arith.constant 0 : i32
    %c0_i32_0 = arith.constant 0 : i32
    %c0_i32_1 = arith.constant 0 : i32
    return %c0_i32, %c0_i32_0 : i32, i32
  }
  func.func @transform_10(%arg0: i32) -> (i32, i32) {
    %c0_i32 = arith.constant 0 : i32
    %c0_i32_0 = arith.constant 0 : i32
    %c0_i32_1 = arith.constant 0 : i32
    return %c0_i32, %c0_i32_0 : i32, i32
  }
  func.func @transform_11(%arg0: i32) -> (i32, i32, i32) {
    %c0_i32 = arith.constant 0 : i32
    %c0_i32_0 = arith.constant 0 : i32
    %c0_i32_1 = arith.constant 0 : i32
    return %arg0, %c0_i32, %c0_i32_0 : i32, i32, i32
  }
}

module attributes {stable_mosaic.version = 11 : i64} {
  func.func @_matmul_res_ln_kernel(%arg0: i32, %arg1: i32, %arg2: memref<128x256xf32, #tpu.memory_space<vmem>>, %arg3: memref<256x128xf32, #tpu.memory_space<vmem>>, %arg4: memref<1x128xf32, #tpu.memory_space<vmem>>, %arg5: memref<128x128xf32, #tpu.memory_space<vmem>>, %arg6: memref<1x128xf32, #tpu.memory_space<vmem>>, %arg7: memref<1x128xf32, #tpu.memory_space<vmem>>, %arg8: memref<128x128xf32, #tpu.memory_space<vmem>>, %arg9: memref<128x128xf32, #tpu.memory_space<vmem>>) attributes {dimension_semantics = [#tpu.dimension_semantics<parallel>, #tpu.dimension_semantics<arbitrary>], iteration_bounds = array<i64: 1, 2>, scalar_prefetch = 0 : i64, scratch_operands = 1 : i64, tpu.core_type = #tpu.core_type<tc>, window_params = [{transform_indices = @transform_0, window_bounds = array<i64: 128, 256>}, {transform_indices = @transform_1, window_bounds = array<i64: 256, 128>}, {pipeline_mode = #tpu.pipeline_mode<synchronous>, transform_indices = @transform_2, window_bounds = array<i64: 1, 128>}, {transform_indices = @transform_3, window_bounds = array<i64: 128, 128>}, {pipeline_mode = #tpu.pipeline_mode<synchronous>, transform_indices = @transform_4, window_bounds = array<i64: 1, 128>}, {pipeline_mode = #tpu.pipeline_mode<synchronous>, transform_indices = @transform_5, window_bounds = array<i64: 1, 128>}, {transform_indices = @transform_6, window_bounds = array<i64: 128, 128>}]} {
    %c0_i32 = arith.constant 0 : i32
    %0 = arith.cmpi eq, %arg1, %c0_i32 : i32
    %1 = arith.extui %0 : i1 to i32
    %c0_i32_0 = arith.constant 0 : i32
    %2 = arith.cmpi ne, %1, %c0_i32_0 : i32
    scf.if %2 {
      %cst_9 = arith.constant 0.000000e+00 : f32
      %12 = vector.broadcast %cst_9 : f32 to vector<128x128xf32>
      %c0_10 = arith.constant 0 : index
      %c0_11 = arith.constant 0 : index
      %13 = vector.load %arg9[%c0_10, %c0_11] : memref<128x128xf32, #tpu.memory_space<vmem>>, vector<128x128xf32>
      tpu.vector_store %arg9[%c0_10, %c0_11], %12 {strides = array<i32>} : memref<128x128xf32, #tpu.memory_space<vmem>>, vector<128x128xf32>,
    } else {
    }
    %c0 = arith.constant 0 : index
    %c0_1 = arith.constant 0 : index
    %3 = vector.load %arg9[%c0, %c0_1] : memref<128x128xf32, #tpu.memory_space<vmem>>, vector<128x128xf32>
    %c0_2 = arith.constant 0 : index
    %c0_3 = arith.constant 0 : index
    %4 = vector.load %arg2[%c0_2, %c0_3] : memref<128x256xf32, #tpu.memory_space<vmem>>, vector<128x256xf32>
    %c0_4 = arith.constant 0 : index
    %c0_5 = arith.constant 0 : index
    %5 = vector.load %arg3[%c0_4, %c0_5] : memref<256x128xf32, #tpu.memory_space<vmem>>, vector<256x128xf32>
    %cst = arith.constant dense<0.000000e+00> : vector<128x128xf32>
    %6 = tpu.matmul %4, %5, %cst {dimension_numbers = #tpu.dot_dimension_numbers<[1], [0], [0], [1], [0, 0, 1, 1], [], []>} : vector<128x256xf32>, vector<256x128xf32>, vector<128x128xf32> -> vector<128x128xf32>
    %7 = arith.addf %3, %6 : vector<128x128xf32>
    %c0_6 = arith.constant 0 : index
    %c0_7 = arith.constant 0 : index
    %8 = vector.load %arg9[%c0_6, %c0_7] : memref<128x128xf32, #tpu.memory_space<vmem>>, vector<128x128xf32>
    tpu.vector_store %arg9[%c0_6, %c0_7], %7 {strides = array<i32>} : memref<128x128xf32, #tpu.memory_space<vmem>>, vector<128x128xf32>,
    %c1_i32 = arith.constant 1 : i32
    %9 = arith.cmpi eq, %arg1, %c1_i32 : i32
    %10 = arith.extui %9 : i1 to i32
    %c0_i32_8 = arith.constant 0 : i32
    %11 = arith.cmpi ne, %10, %c0_i32_8 : i32
    scf.if %11 {
      %c0_9 = arith.constant 0 : index
      %c0_10 = arith.constant 0 : index
      %12 = vector.load %arg9[%c0_9, %c0_10] : memref<128x128xf32, #tpu.memory_space<vmem>>, vector<128x128xf32>
      %c0_11 = arith.constant 0 : index
      %c0_12 = arith.constant 0 : index
      %13 = vector.load %arg4[%c0_11, %c0_12] : memref<1x128xf32, #tpu.memory_space<vmem>>, vector<1x128xf32>
      %14 = vector.broadcast %13 : vector<1x128xf32> to vector<128x128xf32>
      %15 = arith.addf %12, %14 : vector<128x128xf32>
      %c0_13 = arith.constant 0 : index
      %c0_14 = arith.constant 0 : index
      %16 = vector.load %arg5[%c0_13, %c0_14] : memref<128x128xf32, #tpu.memory_space<vmem>>, vector<128x128xf32>
      %17 = arith.addf %15, %16 : vector<128x128xf32>
      %cst_15 = arith.constant dense<0.000000e+00> : vector<128xf32>
      %18 = vector.multi_reduction <add>, %17, %cst_15 [1] : vector<128x128xf32> to vector<128xf32>
      %19 = vector.shape_cast %18 : vector<128xf32> to vector<128x1xf32>
      %cst_16 = arith.constant 1.280000e+02 : f32
      %20 = vector.broadcast %cst_16 : f32 to vector<128x1xf32>
      %21 = arith.divf %19, %20 : vector<128x1xf32>
      %22 = vector.broadcast %21 : vector<128x1xf32> to vector<128x128xf32>
      %23 = arith.subf %17, %22 : vector<128x128xf32>
      %24 = arith.mulf %23, %23 : vector<128x128xf32>
      %cst_17 = arith.constant dense<0.000000e+00> : vector<128xf32>
      %25 = vector.multi_reduction <add>, %24, %cst_17 [1] : vector<128x128xf32> to vector<128xf32>
      %26 = vector.shape_cast %25 : vector<128xf32> to vector<128x1xf32>
      %cst_18 = arith.constant 1.280000e+02 : f32
      %27 = vector.broadcast %cst_18 : f32 to vector<128x1xf32>
      %28 = arith.divf %26, %27 : vector<128x1xf32>
      %29 = vector.broadcast %21 : vector<128x1xf32> to vector<128x128xf32>
      %30 = arith.subf %17, %29 : vector<128x128xf32>
      %cst_19 = arith.constant 9.99999974E-6 : f32
      %31 = vector.broadcast %cst_19 : f32 to vector<128x1xf32>
      %32 = arith.addf %28, %31 : vector<128x1xf32>
      %33 = math.rsqrt %32 : vector<128x1xf32>
      %34 = vector.broadcast %33 : vector<128x1xf32> to vector<128x128xf32>
      %35 = arith.mulf %30, %34 : vector<128x128xf32>
      %c0_20 = arith.constant 0 : index
      %c0_21 = arith.constant 0 : index
      %36 = vector.load %arg6[%c0_20, %c0_21] : memref<1x128xf32, #tpu.memory_space<vmem>>, vector<1x128xf32>
      %37 = vector.broadcast %36 : vector<1x128xf32> to vector<128x128xf32>
      %38 = arith.mulf %35, %37 : vector<128x128xf32>
      %c0_22 = arith.constant 0 : index
      %c0_23 = arith.constant 0 : index
      %39 = vector.load %arg7[%c0_22, %c0_23] : memref<1x128xf32, #tpu.memory_space<vmem>>, vector<1x128xf32>
      %40 = vector.broadcast %39 : vector<1x128xf32> to vector<128x128xf32>
      %41 = arith.addf %38, %40 : vector<128x128xf32>
      %c0_24 = arith.constant 0 : index
      %c0_25 = arith.constant 0 : index
      %42 = vector.load %arg8[%c0_24, %c0_25] : memref<128x128xf32, #tpu.memory_space<vmem>>, vector<128x128xf32>
      tpu.vector_store %arg8[%c0_24, %c0_25], %41 {strides = array<i32>} : memref<128x128xf32, #tpu.memory_space<vmem>>, vector<128x128xf32>,
    } else {
    }
    return
  }
  func.func @transform_0(%arg0: i32, %arg1: i32) -> (i32, i32) {
    %c0_i32 = arith.constant 0 : i32
    return %arg0, %arg1 : i32, i32
  }
  func.func @transform_1(%arg0: i32, %arg1: i32) -> (i32, i32) {
    %c0_i32 = arith.constant 0 : i32
    %c0_i32_0 = arith.constant 0 : i32
    return %arg1, %c0_i32 : i32, i32
  }
  func.func @transform_2(%arg0: i32, %arg1: i32) -> (i32, i32) {
    %c0_i32 = arith.constant 0 : i32
    %c0_i32_0 = arith.constant 0 : i32
    %c0_i32_1 = arith.constant 0 : i32
    return %c0_i32, %c0_i32_0 : i32, i32
  }
  func.func @transform_3(%arg0: i32, %arg1: i32) -> (i32, i32) {
    %c0_i32 = arith.constant 0 : i32
    %c0_i32_0 = arith.constant 0 : i32
    return %arg0, %c0_i32 : i32, i32
  }
  func.func @transform_4(%arg0: i32, %arg1: i32) -> (i32, i32) {
    %c0_i32 = arith.constant 0 : i32
    %c0_i32_0 = arith.constant 0 : i32
    %c0_i32_1 = arith.constant 0 : i32
    return %c0_i32, %c0_i32_0 : i32, i32
  }
  func.func @transform_5(%arg0: i32, %arg1: i32) -> (i32, i32) {
    %c0_i32 = arith.constant 0 : i32
    %c0_i32_0 = arith.constant 0 : i32
    %c0_i32_1 = arith.constant 0 : i32
    return %c0_i32, %c0_i32_0 : i32, i32
  }
  func.func @transform_6(%arg0: i32, %arg1: i32) -> (i32, i32) {
    %c0_i32 = arith.constant 0 : i32
    %c0_i32_0 = arith.constant 0 : i32
    return %arg0, %c0_i32 : i32, i32
  }
}

</mosaic_0001>

<bundles_post_ra>
// kernel: decoder_block_forward.7
= control target key start
LH: loop header
LB: loop body
LE: loop exit
PB: predicated region body
PF: predicated region fallthrough
CT: control target
= control target key end

     0   :  { %s1385_s21 = smov 0   ;;  %s1387_s22 = smov 0   ;;  %s1891_s0 = inlined_call_operand.vmem [shape: f32[128,512], index: 0, kind: input, shape index: {}]   ;;  %s1892_s1 = inlined_call_operand.vmem [shape: f32[512,128], index: 1, kind: input, shape index: {}]   ;;  %s1893_s2 = inlined_call_operand.vmem [shape: f32[1,128], index: 2, kind: input, shape index: {}]   ;;  %s1894_s3 = inlined_call_operand.vmem [shape: f32[128,128], index: 3, kind: input, shape index: {}]   ;;  %s1895_s4 = inlined_call_operand.vmem [shape: f32[1,128], index: 4, kind: input, shape index: {}]   ;;  %s1896_s5 = inlined_call_operand.vmem [shape: f32[1,128], index: 5, kind: input, shape index: {}]   ;;  %s1897_s6 = inlined_call_operand.vmem [shape: f32[128,128], index: 6, kind: output, shape index: {}]  }
   0x1   :  { %s1389_s23 = smov 0   ;;  %s1391_s24 = smov 0  }
   0x2   :  { %s1393_s25 = smov 0  }
   0x3 LB: > { %s25_s26 = sadd.s32 1, %s1343_s24  ;;  %p44_p1 = scmp.ne.s32.totalorder %s1335_s22, %s1331_s21  ;;  %s1347_s25 = sphi %s1393_s25, %s16_s25   ;;  %s1343_s24 = sphi %s1391_s24, %s1901_s24   ;;  %s1339_s23 = sphi %s1389_s23, %s1900_s23   ;;  %s1335_s22 = sphi %s1387_s22, %s1899_s22   ;;  %s1331_s21 = sphi %s1385_s21, %s1898_s21  }
   0x4   : > { %p26_p0 = scmp.ge.s32.totalorder %s25_s26, 2  ;;  %p45_p2 = scmp.eq.s32.totalorder %s1347_s25, 0 }
   0x5   : > { %s37_s28 = sadd.s32 1, %s1335_s22  ;;  %p1090_p5 = scmp.ge.s32.totalorder %s1347_s25, 2 }
   0x6   : > { %s1903_s26 = smov (%p26_p0, %s25_s26), 0  ;;  %p46_p3 = por %p45_p2, %p44_p1 }
   0x7   : > { %s33_s27 = ssub.s32 %s1343_s24, %s1903_s26  ;;  %229 = sbr.rel (%p1090_p5) target bundleno = 34 (0x22), region = 32 }
   0x8   : > { %p35_p4 = scmp.eq.s32.totalorder %s33_s27, 0 }
   0xa   : > { %s1420_s29 = scalar_select %p35_p4, %s1335_s22, %s37_s28  }
   0xe   : > { %232 = sbr.rel (!%p46_p3) target bundleno = 34 (0x22), region = 36  ;;  %s234_s30 = sand.u32 (%p46_p3), 1, %s1335_s22  }
   0xf   : > { %s1107_s7 = sshll.u32 (%p46_p3), %s1343_s24, 4  ;;  %s1091_s8 = sshll.u32 (%p46_p3), %s234_s30, 8 }
  0x10   : > { %s1428_s11 = scalar_lea.vmem (%p46_p3), %s1891_s0, %s1107_s7  ;;  %s1433_s12 = scalar_lea.vmem (%p46_p3), [#allocation3], %s1091_s8 }
  0x11   : > { %v255_v0 = vld [vmem:[%s1428_s11] sm:$0xff] (%p46_p3)  ;;  %v257_v1 = vld [vmem:[%s1428_s11 + $0x8] sm:$0xff] (%p46_p3) }
  0x12   : > { %v259_v2 = vld [vmem:[%s1428_s11 + $0x20] sm:$0xff] (%p46_p3)  ;;  %256 = vst [vmem:[%s1433_s12] sm:$0xff] (%p46_p3), %v255_v0  ;;  %258 = vst [vmem:[%s1433_s12 + $0x8] sm:$0xff] (%p46_p3), %v257_v1  ;;  %v261_v3 = vld [vmem:[%s1428_s11 + $0x28] sm:$0xff] (%p46_p3) }
  0x13   : > { %260 = vst [vmem:[%s1433_s12 + $0x10] sm:$0xff] (%p46_p3), %v259_v2  ;;  %v263_v4 = vld [vmem:[%s1428_s11 + $0x40] sm:$0xff] (%p46_p3)  ;;  %v265_v5 = vld [vmem:[%s1428_s11 + $0x48] sm:$0xff] (%p46_p3)  ;;  %262 = vst [vmem:[%s1433_s12 + $0x18] sm:$0xff] (%p46_p3), %v261_v3 }
  0x14   : > { %264 = vst [vmem:[%s1433_s12 + $0x20] sm:$0xff] (%p46_p3), %v263_v4  ;;  %266 = vst [vmem:[%s1433_s12 + $0x28] sm:$0xff] (%p46_p3), %v265_v5  ;;  %v267_v6 = vld [vmem:[%s1428_s11 + $0x60] sm:$0xff] (%p46_p3)  ;;  %v269_v7 = vld [vmem:[%s1428_s11 + $0x68] sm:$0xff] (%p46_p3) }
  0x15   : > { %v271_v8 = vld [vmem:[%s1428_s11 + $0x80] sm:$0xff]  ;;  %268 = vst [vmem:[%s1433_s12 + $0x30] sm:$0xff] %v267_v6  ;;  %270 = vst [vmem:[%s1433_s12 + $0x38] sm:$0xff] %v269_v7  ;;  %v273_v9 = vld [vmem:[%s1428_s11 + $0x88] sm:$0xff] }
  0x16   : > { %272 = vst [vmem:[%s1433_s12 + $0x40] sm:$0xff] %v271_v8  ;;  %v275_v10 = vld [vmem:[%s1428_s11 + $0xa0] sm:$0xff]  ;;  %v277_v11 = vld [vmem:[%s1428_s11 + $0xa8] sm:$0xff]  ;;  %274 = vst [vmem:[%s1433_s12 + $0x48] sm:$0xff] %v273_v9 }
  0x17   : > { %276 = vst [vmem:[%s1433_s12 + $0x50] sm:$0xff] %v275_v10  ;;  %278 = vst [vmem:[%s1433_s12 + $0x58] sm:$0xff] %v277_v11  ;;  %v279_v12 = vld [vmem:[%s1428_s11 + $0xc0] sm:$0xff]  ;;  %v281_v13 = vld [vmem:[%s1428_s11 + $0xc8] sm:$0xff] }
  0x18   : > { %v283_v14 = vld [vmem:[%s1428_s11 + $0xe0] sm:$0xff]  ;;  %280 = vst [vmem:[%s1433_s12 + $0x60] sm:$0xff] %v279_v12  ;;  %282 = vst [vmem:[%s1433_s12 + $0x68] sm:$0xff] %v281_v13  ;;  %v285_v15 = vld [vmem:[%s1428_s11 + $0xe8] sm:$0xff] }
  0x19   : > { %284 = vst [vmem:[%s1433_s12 + $0x70] sm:$0xff] %v283_v14  ;;  %v287_v16 = vld [vmem:[%s1428_s11 + $0x100] sm:$0xff]  ;;  %v289_v17 = vld [vmem:[%s1428_s11 + $0x108] sm:$0xff]  ;;  %286 = vst [vmem:[%s1433_s12 + $0x78] sm:$0xff] %v285_v15 }
  0x1a   : > { %288 = vst [vmem:[%s1433_s12 + $0x80] sm:$0xff] %v287_v16  ;;  %290 = vst [vmem:[%s1433_s12 + $0x88] sm:$0xff] %v289_v17  ;;  %v291_v18 = vld [vmem:[%s1428_s11 + $0x120] sm:$0xff]  ;;  %v293_v19 = vld [vmem:[%s1428_s11 + $0x128] sm:$0xff] }
  0x1b   : > { %v295_v20 = vld [vmem:[%s1428_s11 + $0x140] sm:$0xff]  ;;  %292 = vst [vmem:[%s1433_s12 + $0x90] sm:$0xff] %v291_v18  ;;  %294 = vst [vmem:[%s1433_s12 + $0x98] sm:$0xff] %v293_v19  ;;  %v297_v21 = vld [vmem:[%s1428_s11 + $0x148] sm:$0xff] }
  0x1c   : > { %296 = vst [vmem:[%s1433_s12 + $0xa0] sm:$0xff] %v295_v20  ;;  %v299_v22 = vld [vmem:[%s1428_s11 + $0x160] sm:$0xff]  ;;  %v301_v23 = vld [vmem:[%s1428_s11 + $0x168] sm:$0xff]  ;;  %298 = vst [vmem:[%s1433_s12 + $0xa8] sm:$0xff] %v297_v21 }
  0x1d   : > { %300 = vst [vmem:[%s1433_s12 + $0xb0] sm:$0xff] %v299_v22  ;;  %302 = vst [vmem:[%s1433_s12 + $0xb8] sm:$0xff] %v301_v23  ;;  %v303_v24 = vld [vmem:[%s1428_s11 + $0x180] sm:$0xff]  ;;  %v305_v25 = vld [vmem:[%s1428_s11 + $0x188] sm:$0xff] }
  0x1e   : > { %v307_v26 = vld [vmem:[%s1428_s11 + $0x1a0] sm:$0xff]  ;;  %304 = vst [vmem:[%s1433_s12 + $0xc0] sm:$0xff] %v303_v24  ;;  %306 = vst [vmem:[%s1433_s12 + $0xc8] sm:$0xff] %v305_v25  ;;  %v309_v27 = vld [vmem:[%s1428_s11 + $0x1a8] sm:$0xff] }
  0x1f   : > { %308 = vst [vmem:[%s1433_s12 + $0xd0] sm:$0xff] %v307_v26  ;;  %v311_v28 = vld [vmem:[%s1428_s11 + $0x1c0] sm:$0xff]  ;;  %v313_v29 = vld [vmem:[%s1428_s11 + $0x1c8] sm:$0xff]  ;;  %310 = vst [vmem:[%s1433_s12 + $0xd8] sm:$0xff] %v309_v27 }
  0x20   : > { %312 = vst [vmem:[%s1433_s12 + $0xe0] sm:$0xff] %v311_v28  ;;  %314 = vst [vmem:[%s1433_s12 + $0xe8] sm:$0xff] %v313_v29  ;;  %v315_v30 = vld [vmem:[%s1428_s11 + $0x1e0] sm:$0xff]  ;;  %v317_v31 = vld [vmem:[%s1428_s11 + $0x1e8] sm:$0xff] }
  0x21   : > { %316 = vst [vmem:[%s1433_s12 + $0xf0] sm:$0xff] %v315_v30  ;;  %318 = vst [vmem:[%s1433_s12 + $0xf8] sm:$0xff] %v317_v31 }
  0x22 PF: > { %p1094_p6 = scmp.ge.s32.totalorder %s1347_s25, 1  ;;  %p332_p7 = scmp.lt.s32.totalorder %s1347_s25, 3 }
  0x24   : > { %p333_p8 = pnand %p1094_p6, %p332_p7 }
  0x25   : > { %s339_s13 = sand.u32 (!%p333_p8), 1, %s1331_s21   ;;  %s1096_s14 = sshll.u32 (!%p333_p8), %s1339_s23, 5 }
  0x26   : > { %336 = sbr.rel (%p333_p8) target bundleno = 675 (0x2a3), region = 63  ;;  %s1095_s15 = sshll.u32 (!%p333_p8), %s339_s13, 8 }
  0x27   : > { %p381_p9 = scmp.lt.s32.totalorder (!%p333_p8), %s1096_s14, 63  ;;  %s1505_s20 = scalar_lea.vmem (!%p333_p8), [#allocation3], %s1095_s15 }
  0x28   : > { %p1098_p10 = scmp.ne.s32.totalorder (!%p333_p8), %s1339_s23, 0 }
  0x2d   : > { %s1905_s14 = smov (!%p381_p9, %s1096_s14), 63  ;;  %401 = sbr.rel (%p1098_p10) target bundleno = 55 (0x37), region = 71 }
  0x2e   : > { %s1097_s16 = sshll.u32 %s1905_s14, 3  ;;  %v1349_v32 = vmov (!%p1098_p10), 0.0  }
  0x2f   : > { %s1503_s19 = scalar_lea.vmem %s1892_s1, %s1097_s16  ;;  %402 = vst [vmem:[#allocation2] sm:$0xff] (!%p1098_p10), %v1349_v32  ;;  %403 = vst [vmem:[#allocation2 + $0x8] sm:$0xff] (!%p1098_p10), %v1349_v32 }
  0x30   : > { %404 = vst [vmem:[#allocation2 + $0x10] sm:$0xff] (!%p1098_p10), %v1349_v32  ;;  %405 = vst [vmem:[#allocation2 + $0x18] sm:$0xff] (!%p1098_p10), %v1349_v32 }
  0x31   : > { %406 = vst [vmem:[#allocation2 + $0x20] sm:$0xff] (!%p1098_p10), %v1349_v32  ;;  %407 = vst [vmem:[#allocation2 + $0x28] sm:$0xff] (!%p1098_p10), %v1349_v32 }
  0x32   : > { %408 = vst [vmem:[#allocation2 + $0x30] sm:$0xff] (!%p1098_p10), %v1349_v32  ;;  %409 = vst [vmem:[#allocation2 + $0x38] sm:$0xff] (!%p1098_p10), %v1349_v32 }
  0x33   : > { %410 = vst [vmem:[#allocation2 + $0x40] sm:$0xff] (!%p1098_p10), %v1349_v32  ;;  %411 = vst [vmem:[#allocation2 + $0x48] sm:$0xff] (!%p1098_p10), %v1349_v32 }
  0x34   : > { %412 = vst [vmem:[#allocation2 + $0x50] sm:$0xff] %v1349_v32  ;;  %413 = vst [vmem:[#allocation2 + $0x58] sm:$0xff] %v1349_v32 }
  0x35   : > { %414 = vst [vmem:[#allocation2 + $0x60] sm:$0xff] %v1349_v32  ;;  %415 = vst [vmem:[#allocation2 + $0x68] sm:$0xff] %v1349_v32 }
  0x36   : > { %416 = vst [vmem:[#allocation2 + $0x70] sm:$0xff] %v1349_v32  ;;  %417 = vst [vmem:[#allocation2 + $0x78] sm:$0xff] %v1349_v32 }
  0x37 PF: > { %v482_v33 = vld [vmem:[%s1503_s19 + $0x80] sm:$0xff]  ;;  %v483_v34 = vld [vmem:[%s1503_s19 + $0x88] sm:$0xff]  ;;  %v484_v38 = vld [vmem:[%s1503_s19 + $0x90] sm:$0xff]  ;;  %p1099_p11 = scmp.ne.s32.totalorder %s1339_s23, 1 }
  0x38   : > { %v466_v35 = vld [vmem:[%s1503_s19] sm:$0xff]  ;;  %v1188_v36 = vpack.c.bf16 %v483_v34, %v482_v33  ;;  %v467_v37 = vld [vmem:[%s1503_s19 + $0x8] sm:$0xff]  ;;  %v485_v39 = vld [vmem:[%s1503_s19 + $0x98] sm:$0xff] }
  0x39   : > { %v1190_v40 = vpack.c.bf16 %v467_v37, %v466_v35  ;;  %v1192_v41 = vpack.c.bf16 %v485_v39, %v484_v38  ;;  %v468_v42 = vld [vmem:[%s1503_s19 + $0x10] sm:$0xff]  ;;  %v469_v43 = vld [vmem:[%s1503_s19 + $0x18] sm:$0xff]  ;;  %v486_v44 = vld [vmem:[%s1503_s19 + $0xa0] sm:$0xff] }
  0x3a   : > { %1189 = vmatprep.subr.bf16.mxu0 %v1188_v36  ;;  %1220 = vmatprep.subr.bf16.mxu1 %v1188_v36  ;;  %v487_v45 = vld [vmem:[%s1503_s19 + $0xa8] sm:$0xff]  ;;  %v1194_v46 = vpack.c.bf16 %v469_v43, %v468_v42  ;;  %v470_v48 = vld [vmem:[%s1503_s19 + $0x20] sm:$0xff]  ;;  %v488_v50 = vld [vmem:[%s1503_s19 + $0xb0] sm:$0xff] }
  0x3b   : > { %1191 = vmatpush3.bf16.msra.mxu0 %v1190_v40  ;;  %1228 = vmatpush3.bf16.msra.mxu1 %v1190_v40  ;;  %v1196_v47 = vpack.c.bf16 %v487_v45, %v486_v44  ;;  %v471_v49 = vld [vmem:[%s1503_s19 + $0x28] sm:$0xff]  ;;  %v489_v51 = vld [vmem:[%s1503_s19 + $0xb8] sm:$0xff]  ;;  %v472_v54 = vld [vmem:[%s1503_s19 + $0x30] sm:$0xff] }
  0x3c   : > { %1193 = vmatprep.subr.bf16.mxu0 %v1192_v41  ;;  %1221 = vmatprep.subr.bf16.mxu1 %v1192_v41  ;;  %v1198_v52 = vpack.c.bf16 %v471_v49, %v470_v48  ;;  %v1200_v53 = vpack.c.bf16 %v489_v51, %v488_v50  ;;  %v473_v55 = vld [vmem:[%s1503_s19 + $0x38] sm:$0xff]  ;;  %v490_v56 = vld [vmem:[%s1503_s19 + $0xc0] sm:$0xff]  ;;  %v491_v57 = vld [vmem:[%s1503_s19 + $0xc8] sm:$0xff] }
  0x3d   : > { %v435_v58 = vld [vmem:[%s1505_s20 + $0x8] sm:$0xff]  ;;  %v1202_v60 = vpack.c.bf16 %v473_v55, %v472_v54  ;;  %v1204_v61 = vpack.c.bf16 %v491_v57, %v490_v56  ;;  %v474_v62 = vld [vmem:[%s1503_s19 + $0x40] sm:$0xff]  ;;  %v492_v0 = vld [vmem:[%s1503_s19 + $0xd0] sm:$0xff] }
  0x3e   : > { %562 = vmatprep.mubr.f32.mxu0 %v435_v58  ;;  %v451_v59 = vld [vmem:[%s1505_s20 + $0x88] sm:$0xff]  ;;  %v493_v1 = vld [vmem:[%s1503_s19 + $0xd8] sm:$0xff]  ;;  %v476_v4 = vld [vmem:[%s1503_s19 + $0x50] sm:$0xff] }
  0x3f   : > { %1195 = vmatpush3.bf16.msra.mxu0 %v1194_v46  ;;  %1229 = vmatpush3.bf16.msra.mxu1 %v1194_v46  ;;  %v475_v63 = vld [vmem:[%s1503_s19 + $0x48] sm:$0xff]  ;;  %v1208_v3 = vpack.c.bf16 %v493_v1, %v492_v0  ;;  %v477_v5 = vld [vmem:[%s1503_s19 + $0x58] sm:$0xff]  ;;  %v494_v6 = vld [vmem:[%s1503_s19 + $0xe0] sm:$0xff] }
  0x40   : > { %1197 = vmatprep.subr.bf16.mxu0 %v1196_v47  ;;  %1222 = vmatprep.subr.bf16.mxu1 %v1196_v47  ;;  %v1206_v2 = vpack.c.bf16 %v475_v63, %v474_v62  ;;  %v495_v7 = vld [vmem:[%s1503_s19 + $0xe8] sm:$0xff]  ;;  %v1210_v8 = vpack.c.bf16 %v477_v5, %v476_v4  ;;  %v478_v10 = vld [vmem:[%s1503_s19 + $0x60] sm:$0xff]  ;;  %v496_v12 = vld [vmem:[%s1503_s19 + $0xf0] sm:$0xff] }
  0x41   : > { %602 = vmatprep.mubr.f32.mxu1 %v451_v59  ;;  %v1212_v9 = vpack.c.bf16 %v495_v7, %v494_v6  ;;  %v479_v11 = vld [vmem:[%s1503_s19 + $0x68] sm:$0xff]  ;;  %v497_v13 = vld [vmem:[%s1503_s19 + $0xf8] sm:$0xff]  ;;  %v480_v16 = vld [vmem:[%s1503_s19 + $0x70] sm:$0xff] }
  0x42   : > { %v1214_v14 = vpack.c.bf16 %v479_v11, %v478_v10  ;;  %v1216_v15 = vpack.c.bf16 %v497_v13, %v496_v12  ;;  %v481_v17 = vld [vmem:[%s1503_s19 + $0x78] sm:$0xff]  ;;  %v434_v19 = vld [vmem:[%s1505_s20] sm:$0xff]  ;;  %v436_v23 = vld [vmem:[%s1505_s20 + $0x10] sm:$0xff] }
  0x43   : > { %1199 = vmatpush3.bf16.msra.mxu0 %v1198_v52  ;;  %1230 = vmatpush3.bf16.msra.mxu1 %v1198_v52  ;;  %v1218_v18 = vpack.c.bf16 %v481_v17, %v480_v16  ;;  %v450_v20 = vld [vmem:[%s1505_s20 + $0x80] sm:$0xff]  ;;  %v437_v21 = vld [vmem:[%s1505_s20 + $0x18] sm:$0xff]  ;;  %v452_v24 = vld [vmem:[%s1505_s20 + $0x90] sm:$0xff] }
  0x44   : > { %1201 = vmatprep.subr.bf16.mxu0 %v1200_v53  ;;  %1223 = vmatprep.subr.bf16.mxu1 %v1200_v53  ;;  %v453_v22 = vld [vmem:[%s1505_s20 + $0x98] sm:$0xff]  ;;  %v439_v25 = vld [vmem:[%s1505_s20 + $0x28] sm:$0xff]  ;;  %v438_v27 = vld [vmem:[%s1505_s20 + $0x20] sm:$0xff] }
  0x45   : > { %v455_v26 = vld [vmem:[%s1505_s20 + $0xa8] sm:$0xff]  ;;  %v454_v28 = vld [vmem:[%s1505_s20 + $0xa0] sm:$0xff]  ;;  %v441_v29 = vld [vmem:[%s1505_s20 + $0x38] sm:$0xff] }
  0x46   : > { %v457_v30 = vld [vmem:[%s1505_s20 + $0xb8] sm:$0xff]  ;;  %v440_v31 = vld [vmem:[%s1505_s20 + $0x30] sm:$0xff]  ;;  %v443_v33 = vld [vmem:[%s1505_s20 + $0x48] sm:$0xff] }
  0x47   : > { %1203 = vmatpush3.bf16.msra.mxu0 %v1202_v60  ;;  %1231 = vmatpush3.bf16.msra.mxu1 %v1202_v60  ;;  %v456_v32 = vld [vmem:[%s1505_s20 + $0xb0] sm:$0xff]  ;;  %v459_v34 = vld [vmem:[%s1505_s20 + $0xc8] sm:$0xff]  ;;  %v442_v35 = vld [vmem:[%s1505_s20 + $0x40] sm:$0xff] }
  0x48   : > { %1205 = vmatprep.subr.bf16.mxu0 %v1204_v61  ;;  %1224 = vmatprep.subr.bf16.mxu1 %v1204_v61  ;;  %v458_v36 = vld [vmem:[%s1505_s20 + $0xc0] sm:$0xff]  ;;  %v445_v37 = vld [vmem:[%s1505_s20 + $0x58] sm:$0xff]  ;;  %v444_v39 = vld [vmem:[%s1505_s20 + $0x50] sm:$0xff] }
  0x49   : > { %v461_v38 = vld [vmem:[%s1505_s20 + $0xd8] sm:$0xff]  ;;  %v460_v40 = vld [vmem:[%s1505_s20 + $0xd0] sm:$0xff]  ;;  %v447_v41 = vld [vmem:[%s1505_s20 + $0x68] sm:$0xff] }
  0x4a   : > { %v463_v42 = vld [vmem:[%s1505_s20 + $0xe8] sm:$0xff]  ;;  %v446_v43 = vld [vmem:[%s1505_s20 + $0x60] sm:$0xff]  ;;  %v449_v45 = vld [vmem:[%s1505_s20 + $0x78] sm:$0xff] }
  0x4b   : > { %1207 = vmatpush3.bf16.msra.mxu0 %v1206_v2  ;;  %1232 = vmatpush3.bf16.msra.mxu1 %v1206_v2  ;;  %v462_v44 = vld [vmem:[%s1505_s20 + $0xe0] sm:$0xff]  ;;  %v465_v46 = vld [vmem:[%s1505_s20 + $0xf8] sm:$0xff]  ;;  %v448_v47 = vld [vmem:[%s1505_s20 + $0x70] sm:$0xff] }
  0x4c   : > { %1209 = vmatprep.subr.bf16.mxu0 %v1208_v3  ;;  %1225 = vmatprep.subr.bf16.mxu1 %v1208_v3  ;;  %v464_v48 = vld [vmem:[%s1505_s20 + $0xf0] sm:$0xff]  ;;  %v418_v51 = vld [vmem:[#allocation2] sm:$0xff]  ;;  %v419_v61 = vld [vmem:[#allocation2 + $0x8] sm:$0xff] }
  0x4d   : > { %v426_v53 = vld [vmem:[#allocation2 + $0x40] sm:$0xff]  ;;  %v427_v63 = vld [vmem:[#allocation2 + $0x48] sm:$0xff]  ;;  %v420_v7 = vld [vmem:[#allocation2 + $0x10] sm:$0xff] }
  0x4e   : > { %v421_v17 = vld [vmem:[#allocation2 + $0x18] sm:$0xff] }
  0x4f   : > { %1211 = vmatpush3.bf16.msra.mxu0 %v1210_v8  ;;  %1233 = vmatpush3.bf16.msra.mxu1 %v1210_v8 }
  0x50   : > { %1213 = vmatprep.subr.bf16.mxu0 %v1212_v9  ;;  %1226 = vmatprep.subr.bf16.mxu1 %v1212_v9  ;;  %v428_v9 = vld [vmem:[#allocation2 + $0x50] sm:$0xff] }
  0x53   : > { %1215 = vmatpush3.bf16.msra.mxu0 %v1214_v14  ;;  %1234 = vmatpush3.bf16.msra.mxu1 %v1214_v14 }
  0x54   : > { %1217 = vmatprep.subr.bf16.mxu0 %v1216_v15  ;;  %1227 = vmatprep.subr.bf16.mxu1 %v1216_v15 }
  0x57   : > { %1219 = vmatpush3.bf16.msra.mxu0 %v1218_v18  ;;  %1235 = vmatpush3.bf16.msra.mxu1 %v1218_v18 }
  0x5a   : > { %563 = vmatmul.mubr.f32.vlgmr.msra.gmra.mrb[0].mxu0 %v434_v19  ;;  %603 = vmatmul.mubr.f32.vlgmr.msra.gmra.mrb[0].mxu1 %v450_v20  ;;  %v429_v19 = vld [vmem:[#allocation2 + $0x58] sm:$0xff] }
  0x5b   : > { %567 = vmatprep.mubr.f32.mxu0 %v437_v21  ;;  %607 = vmatprep.mubr.f32.mxu1 %v453_v22 }
  0x5e   : > { %568 = vmatmul.mubr.f32.gmra.mrb[2].mxu0 %v436_v23  ;;  %608 = vmatmul.mubr.f32.gmra.mrb[2].mxu1 %v452_v24 }
  0x5f   : > { %572 = vmatprep.mubr.f32.mxu0 %v439_v25  ;;  %612 = vmatprep.mubr.f32.mxu1 %v455_v26 }
  0x62   : > { %573 = vmatmul.mubr.f32.gmra.mrb[4].mxu0 %v438_v27  ;;  %613 = vmatmul.mubr.f32.gmra.mrb[4].mxu1 %v454_v28  ;;  %v422_v27 = vld [vmem:[#allocation2 + $0x20] sm:$0xff] }
  0x63   : > { %577 = vmatprep.mubr.f32.mxu0 %v441_v29  ;;  %617 = vmatprep.mubr.f32.mxu1 %v457_v30  ;;  %v430_v29 = vld [vmem:[#allocation2 + $0x60] sm:$0xff] }
  0x66   : > { %578 = vmatmul.mubr.f32.gmra.mrb[6].mxu0 %v440_v31  ;;  %618 = vmatmul.mubr.f32.gmra.mrb[6].mxu1 %v456_v32 }
  0x67   : > { %582 = vmatprep.mubr.f32.mxu0 %v443_v33  ;;  %622 = vmatprep.mubr.f32.mxu1 %v459_v34 }
  0x6a   : > { %583 = vmatmul.mubr.f32.gmra.mrb[8].mxu0 %v442_v35  ;;  %623 = vmatmul.mubr.f32.gmra.mrb[8].mxu1 %v458_v36 }
  0x6b   : > { %587 = vmatprep.mubr.f32.mxu0 %v445_v37  ;;  %627 = vmatprep.mubr.f32.mxu1 %v461_v38  ;;  %v423_v37 = vld [vmem:[#allocation2 + $0x28] sm:$0xff] }
  0x6e   : > { %588 = vmatmul.mubr.f32.gmra.mrb[10].mxu0 %v444_v39  ;;  %628 = vmatmul.mubr.f32.gmra.mrb[10].mxu1 %v460_v40  ;;  %v431_v39 = vld [vmem:[#allocation2 + $0x68] sm:$0xff] }
  0x6f   : > { %592 = vmatprep.mubr.f32.mxu0 %v447_v41  ;;  %632 = vmatprep.mubr.f32.mxu1 %v463_v42 }
  0x72   : > { %593 = vmatmul.mubr.f32.gmra.mrb[12].mxu0 %v446_v43  ;;  %633 = vmatmul.mubr.f32.gmra.mrb[12].mxu1 %v462_v44 }
  0x73   : > { %597 = vmatprep.mubr.f32.mxu0 %v449_v45  ;;  %637 = vmatprep.mubr.f32.mxu1 %v465_v46 }
  0x76   : > { %598 = vmatmul.mubr.f32.gmra.mrb[14].mxu0 %v448_v47  ;;  %638 = vmatmul.mubr.f32.gmra.mrb[14].mxu1 %v464_v48  ;;  %v424_v47 = vld [vmem:[#allocation2 + $0x30] sm:$0xff] }
 0x12d   : > { %v1140_v49 = vpop.f32.mrb[0].mxu0  ;;  %v1164_v50 = vpop.f32.mrb[0].mxu1 }
 0x12e   : > { %v1141_v52 = vpop.f32.mrb[1].mxu0  ;;  %v1165_v54 = vpop.f32.mrb[1].mxu1 }
 0x12f   : > { %v1142_v55 = vadd.f32 %v1141_v52, %v1140_v49  ;;  %v1166_v56 = vadd.f32 %v1165_v54, %v1164_v50  ;;  %v432_v49 = vld [vmem:[#allocation2 + $0x70] sm:$0xff] }
 0x131   : > { %v643_v57 = vadd.f32 %v1142_v55, %v418_v51  ;;  %v651_v58 = vadd.f32 %v1166_v56, %v426_v53  ;;  %v1143_v59 = vpop.f32.mrb[2].mxu0  ;;  %v1167_v60 = vpop.f32.mrb[2].mxu1 }
 0x132   : > { %v1144_v62 = vpop.f32.mrb[3].mxu0  ;;  %v1168_v0 = vpop.f32.mrb[3].mxu1 }
 0x133   : > { %659 = vst [vmem:[#allocation2] sm:$0xff] %v643_v57  ;;  %667 = vst [vmem:[#allocation2 + $0x40] sm:$0xff] %v651_v58  ;;  %v1145_v1 = vadd.f32 %v1144_v62, %v1143_v59  ;;  %v1169_v2 = vadd.f32 %v1168_v0, %v1167_v60  ;;  %v425_v57 = vld [vmem:[#allocation2 + $0x38] sm:$0xff] }
 0x134   : > { %v433_v59 = vld [vmem:[#allocation2 + $0x78] sm:$0xff] }
 0x135   : > { %v644_v3 = vadd.f32 %v1145_v1, %v419_v61  ;;  %v652_v4 = vadd.f32 %v1169_v2, %v427_v63  ;;  %v1146_v5 = vpop.f32.mrb[4].mxu0  ;;  %v1170_v6 = vpop.f32.mrb[4].mxu1  ;;  %v1576_v2 = vld [vmem:[%s1893_s2] ss:$0 sm:$0xff] (!%p1099_p11) }
 0x136   : > { %v1147_v8 = vpop.f32.mrb[5].mxu0  ;;  %v1171_v10 = vpop.f32.mrb[5].mxu1 }
 0x137   : > { %660 = vst [vmem:[#allocation2 + $0x8] sm:$0xff] %v644_v3  ;;  %668 = vst [vmem:[#allocation2 + $0x48] sm:$0xff] %v652_v4  ;;  %v1148_v11 = vadd.f32 %v1147_v8, %v1146_v5  ;;  %v1172_v12 = vadd.f32 %v1171_v10, %v1170_v6  ;;  %v718_v3 = vld [vmem:[%s1894_s3] sm:$0xff] (!%p1099_p11)  ;;  %v720_v6 = vld [vmem:[%s1894_s3 + $0x10] sm:$0xff] (!%p1099_p11) }
 0x138   : > { %v719_v10 = vld [vmem:[%s1894_s3 + $0x8] sm:$0xff] (!%p1099_p11) }
 0x139   : > { %v645_v13 = vadd.f32 %v1148_v11, %v420_v7  ;;  %v653_v14 = vadd.f32 %v1172_v12, %v428_v9  ;;  %v1149_v15 = vpop.f32.mrb[6].mxu0  ;;  %v1173_v16 = vpop.f32.mrb[6].mxu1 }
 0x13a   : > { %v1150_v18 = vpop.f32.mrb[7].mxu0  ;;  %v1174_v20 = vpop.f32.mrb[7].mxu1  ;;  %v679_v1 = vld [vmem:[#allocation2] sm:$0xff] (!%p1099_p11) }
 0x13b   : > { %661 = vst [vmem:[#allocation2 + $0x10] sm:$0xff] %v645_v13  ;;  %669 = vst [vmem:[#allocation2 + $0x50] sm:$0xff] %v653_v14  ;;  %v1151_v21 = vadd.f32 %v1150_v18, %v1149_v15  ;;  %v1175_v22 = vadd.f32 %v1174_v20, %v1173_v16  ;;  %v702_v4 = vadd.f32 (!%p1099_p11), %v1576_v2, %v679_v1  ;;  %v721_v14 = vld [vmem:[%s1894_s3 + $0x18] sm:$0xff] (!%p1099_p11) }
 0x13d   : > { %v646_v23 = vadd.f32 %v1151_v21, %v421_v17  ;;  %v654_v24 = vadd.f32 %v1175_v22, %v429_v19  ;;  %v1152_v25 = vpop.f32.mrb[8].mxu0  ;;  %v1176_v26 = vpop.f32.mrb[8].mxu1  ;;  %v1590_v12 = vadd.f32 (!%p1099_p11), %v718_v3, %v702_v4  ;;  %v722_v21 = vld [vmem:[%s1894_s3 + $0x20] sm:$0xff] (!%p1099_p11) }
 0x13e   : > { %v1153_v28 = vpop.f32.mrb[9].mxu0  ;;  %v1177_v30 = vpop.f32.mrb[9].mxu1  ;;  %v680_v7 = vld [vmem:[#allocation2 + $0x8] sm:$0xff] (!%p1099_p11) }
 0x13f   : > { %662 = vst [vmem:[#allocation2 + $0x18] sm:$0xff] %v646_v23  ;;  %670 = vst [vmem:[#allocation2 + $0x58] sm:$0xff] %v654_v24  ;;  %v1154_v31 = vadd.f32 %v1153_v28, %v1152_v25  ;;  %v1178_v32 = vadd.f32 %v1177_v30, %v1176_v26  ;;  %v703_v9 = vadd.f32 (!%p1099_p11), %v1576_v2, %v680_v7  ;;  %750 = vadd.xlane.f32.xlu0 (!%p1099_p11), %v1590_v12  ;;  %v723_v24 = vld [vmem:[%s1894_s3 + $0x28] sm:$0xff] (!%p1099_p11) }
 0x141   : > { %v647_v33 = vadd.f32 %v1154_v31, %v422_v27  ;;  %v655_v34 = vadd.f32 %v1178_v32, %v430_v29  ;;  %v1155_v35 = vpop.f32.mrb[10].mxu0  ;;  %v1179_v36 = vpop.f32.mrb[10].mxu1  ;;  %v1599_v18 = vadd.f32 (!%p1099_p11), %v719_v10, %v703_v9  ;;  %v724_v29 = vld [vmem:[%s1894_s3 + $0x30] sm:$0xff] (!%p1099_p11)  ;;  %v687_v31 = vld [vmem:[#allocation2 + $0x40] sm:$0xff] (!%p1099_p11)  ;;  %v725_v32 = vld [vmem:[%s1894_s3 + $0x38] sm:$0xff] (!%p1099_p11) }
 0x142   : > { %v1156_v38 = vpop.f32.mrb[11].mxu0  ;;  %v1180_v40 = vpop.f32.mrb[11].mxu1  ;;  %v681_v5 = vld [vmem:[#allocation2 + $0x10] sm:$0xff] (!%p1099_p11) }
 0x143   : > { %663 = vst [vmem:[#allocation2 + $0x20] sm:$0xff] %v647_v33  ;;  %671 = vst [vmem:[#allocation2 + $0x60] sm:$0xff] %v655_v34  ;;  %v1157_v41 = vadd.f32 %v1156_v38, %v1155_v35  ;;  %v1181_v42 = vadd.f32 %v1180_v40, %v1179_v36  ;;  %v704_v8 = vadd.f32 (!%p1099_p11), %v1576_v2, %v681_v5  ;;  %752 = vadd.xlane.f32.xlu0 (!%p1099_p11), %v1599_v18  ;;  %v688_v33 = vld [vmem:[#allocation2 + $0x48] sm:$0xff] (!%p1099_p11) }
 0x144   : > { %v710_v35 = vadd.f32 (!%p1099_p11), %v1576_v2, %v687_v31  ;;  %v711_v38 = vadd.f32 (!%p1099_p11), %v1576_v2, %v688_v33  ;;  %v727_v40 = vld [vmem:[%s1894_s3 + $0x48] sm:$0xff] (!%p1099_p11) }
 0x145   : > { %v648_v43 = vadd.f32 %v1157_v41, %v423_v37  ;;  %v656_v44 = vadd.f32 %v1181_v42, %v431_v39  ;;  %v1158_v45 = vpop.f32.mrb[12].mxu0  ;;  %v1182_v46 = vpop.f32.mrb[12].mxu1  ;;  %v1596_v17 = vadd.f32 (!%p1099_p11), %v720_v6, %v704_v8  ;;  %v726_v37 = vld [vmem:[%s1894_s3 + $0x40] sm:$0xff] (!%p1099_p11)  ;;  %v689_v39 = vld [vmem:[#allocation2 + $0x50] sm:$0xff] (!%p1099_p11) }
 0x146   : > { %v1159_v48 = vpop.f32.mrb[13].mxu0  ;;  %v1183_v50 = vpop.f32.mrb[13].mxu1  ;;  %v682_v11 = vld [vmem:[#allocation2 + $0x18] sm:$0xff] (!%p1099_p11)  ;;  %v1641_v42 = vadd.f32 (!%p1099_p11), %v726_v37, %v710_v35 }
 0x147   : > { %664 = vst [vmem:[#allocation2 + $0x28] sm:$0xff] %v648_v43  ;;  %672 = vst [vmem:[#allocation2 + $0x68] sm:$0xff] %v656_v44  ;;  %v1160_v51 = vadd.f32 %v1159_v48, %v1158_v45  ;;  %v1184_v52 = vadd.f32 %v1183_v50, %v1182_v46  ;;  %v705_v13 = vadd.f32 (!%p1099_p11), %v1576_v2, %v682_v11  ;;  %754 = vadd.xlane.f32.xlu1 (!%p1099_p11), %v1596_v17  ;;  %v690_v41 = vld [vmem:[#allocation2 + $0x58] sm:$0xff] (!%p1099_p11)  ;;  %v728_v45 = vld [vmem:[%s1894_s3 + $0x50] sm:$0xff] (!%p1099_p11) }
 0x148   : > { %v712_v43 = vadd.f32 (!%p1099_p11), %v1576_v2, %v689_v39  ;;  %v1645_v44 = vadd.f32 (!%p1099_p11), %v727_v40, %v711_v38  ;;  %v713_v46 = vadd.f32 (!%p1099_p11), %v1576_v2, %v690_v41  ;;  %v729_v48 = vld [vmem:[%s1894_s3 + $0x58] sm:$0xff] (!%p1099_p11) }
 0x149   : > { %v649_v53 = vadd.f32 %v1160_v51, %v424_v47  ;;  %v657_v54 = vadd.f32 %v1184_v52, %v432_v49  ;;  %v1161_v55 = vpop.f32.mrb[14].mxu0  ;;  %v1185_v56 = vpop.f32.mrb[14].mxu1  ;;  %678 = sbr.rel (%p1099_p11) target bundleno = 675 (0x2a3), region = 75  ;;  %v1603_v20 = vadd.f32 (!%p1099_p11), %v721_v14, %v705_v13 }
 0x14a   : > { %v1162_v58 = vpop.f32.mrb[15].mxu0  ;;  %v1186_v60 = vpop.f32.mrb[15].mxu1  ;;  %v683_v15 = vld [vmem:[#allocation2 + $0x20] sm:$0xff] (!%p1099_p11)  ;;  %v1655_v50 = vadd.f32 (!%p1099_p11), %v728_v45, %v712_v43  ;;  %v1659_v52 = vadd.f32 (!%p1099_p11), %v729_v48, %v713_v46 }
 0x14b   : > { %665 = vst [vmem:[#allocation2 + $0x30] sm:$0xff] %v649_v53  ;;  %673 = vst [vmem:[#allocation2 + $0x70] sm:$0xff] %v657_v54  ;;  %v1163_v61 = vadd.f32 %v1162_v58, %v1161_v55  ;;  %v1187_v62 = vadd.f32 %v1186_v60, %v1185_v56  ;;  %v706_v19 = vadd.f32 (!%p1099_p11), %v1576_v2, %v683_v15  ;;  %756 = vadd.xlane.f32.xlu1 (!%p1099_p11), %v1603_v20  ;;  %v691_v47 = vld [vmem:[#allocation2 + $0x60] sm:$0xff] (!%p1099_p11)  ;;  %v731_v56 = vld [vmem:[%s1894_s3 + $0x68] sm:$0xff] (!%p1099_p11) }
 0x14c   : > { %v714_v51 = vadd.f32 (!%p1099_p11), %v1576_v2, %v691_v47  ;;  %v730_v53 = vld [vmem:[%s1894_s3 + $0x60] sm:$0xff] (!%p1099_p11) }
 0x14d   : > { %v650_v63 = vadd.f32 %v1163_v61, %v425_v57  ;;  %v658_v0 = vadd.f32 %v1187_v62, %v433_v59  ;;  %v1613_v26 = vadd.f32 (!%p1099_p11), %v722_v21, %v706_v19  ;;  %v732_v61 = vld [vmem:[%s1894_s3 + $0x70] sm:$0xff] (!%p1099_p11) }
 0x14e   : > { %v684_v16 = vld [vmem:[#allocation2 + $0x28] sm:$0xff] (!%p1099_p11)  ;;  %v1669_v58 = vadd.f32 (!%p1099_p11), %v730_v53, %v714_v51 }
 0x14f   : > { %666 = vst [vmem:[#allocation2 + $0x38] sm:$0xff] %v650_v63  ;;  %674 = vst [vmem:[#allocation2 + $0x78] sm:$0xff] %v658_v0  ;;  %v707_v22 = vadd.f32 (!%p1099_p11), %v1576_v2, %v684_v16  ;;  %758 = vadd.xlane.f32.xlu0 (!%p1099_p11), %v1613_v26  ;;  %v692_v49 = vld [vmem:[#allocation2 + $0x68] sm:$0xff] (!%p1099_p11)  ;;  %v733_v63 = vld [vmem:[%s1894_s3 + $0x78] sm:$0xff] (!%p1099_p11) }
 0x150   : > { %v715_v54 = vadd.f32 %v1576_v2, %v692_v49 }
 0x151   : > { %v1617_v28 = vadd.f32 %v723_v24, %v707_v22 }
 0x152   : > { %v685_v23 = vld [vmem:[#allocation2 + $0x30] sm:$0xff]  ;;  %v1673_v60 = vadd.f32 %v731_v56, %v715_v54 }
 0x153   : > { %v708_v27 = vadd.f32 %v1576_v2, %v685_v23  ;;  %760 = vadd.xlane.f32.xlu1 %v1617_v28  ;;  %v693_v55 = vld [vmem:[#allocation2 + $0x70] sm:$0xff] }
 0x154   : > { %v716_v59 = vadd.f32 %v1576_v2, %v693_v55 }
 0x155   : > { %v1627_v34 = vadd.f32 %v724_v29, %v708_v27 }
 0x156   : > { %v686_v25 = vld [vmem:[#allocation2 + $0x38] sm:$0xff]  ;;  %v1683_v0 = vadd.f32 %v732_v61, %v716_v59 }
 0x157   : > { %v709_v30 = vadd.f32 %v1576_v2, %v686_v25  ;;  %762 = vadd.xlane.f32.xlu0 %v1627_v34  ;;  %v694_v57 = vld [vmem:[#allocation2 + $0x78] sm:$0xff] }
 0x158   : > { %v717_v62 = vadd.f32 %v1576_v2, %v694_v57 }
 0x159   : > { %v1631_v36 = vadd.f32 %v725_v32, %v709_v30 }
 0x15a   : > { %v1686_v1 = vadd.f32 %v733_v63, %v717_v62 }
 0x15b   : > { %764 = vadd.xlane.f32.xlu1 %v1631_v36  ;;  %766 = vadd.xlane.f32.xlu0 %v1641_v42 }
 0x15f   : > { %768 = vadd.xlane.f32.xlu1 %v1645_v44  ;;  %770 = vadd.xlane.f32.xlu0 %v1655_v50 }
 0x163   : > { %772 = vadd.xlane.f32.xlu1 %v1659_v52  ;;  %774 = vadd.xlane.f32.xlu0 %v1669_v58 }
 0x167   : > { %776 = vadd.xlane.f32.xlu1 %v1673_v60  ;;  %778 = vadd.xlane.f32.xlu0 %v1683_v0 }
 0x16b   : > { %780 = vadd.xlane.f32.xlu1 %v1686_v1 }
 0x1cc   : > { %v751_v3 = vpop.xlane.xlu0 %750 }
 0x1cd   : > { %v783_v4 = vmul.f32 0.0078125, %v751_v3 }
 0x1cf   : > { %v1691_v6 = vsub.f32 %v1590_v12, %v783_v4 }
 0x1d0   : > { %v753_v8 = vpop.xlane.xlu0 %752 }
 0x1d1   : > { %v784_v9 = vmul.f32 0.0078125, %v753_v8  ;;  %v815_v10 = vmul.f32 %v1691_v6, %v1691_v6 }
 0x1d3   : > { %v1699_v14 = vsub.f32 %v1599_v18, %v784_v9  ;;  %831 = vadd.xlane.f32.xlu0 %v815_v10 }
 0x1d4   : > { %v755_v5 = vpop.xlane.xlu1 %754 }
 0x1d5   : > { %v785_v2 = vmul.f32 0.0078125, %v755_v5  ;;  %v816_v19 = vmul.f32 %v1699_v14, %v1699_v14 }
 0x1d7   : > { %v1694_v7 = vsub.f32 %v1596_v17, %v785_v2  ;;  %833 = vadd.xlane.f32.xlu1 %v816_v19 }
 0x1d8   : > { %v757_v11 = vpop.xlane.xlu1 %756 }
 0x1d9   : > { %v786_v13 = vmul.f32 0.0078125, %v757_v11  ;;  %v817_v15 = vmul.f32 %v1694_v7, %v1694_v7 }
 0x1db   : > { %v1704_v12 = vsub.f32 %v1603_v20, %v786_v13  ;;  %835 = vadd.xlane.f32.xlu0 %v817_v15 }
 0x1dc   : > { %v759_v16 = vpop.xlane.xlu0 %758 }
 0x1dd   : > { %v787_v17 = vmul.f32 0.0078125, %v759_v16  ;;  %v818_v18 = vmul.f32 %v1704_v12, %v1704_v12 }
 0x1df   : > { %v1709_v23 = vsub.f32 %v1613_v26, %v787_v17  ;;  %837 = vadd.xlane.f32.xlu1 %v818_v18 }
 0x1e0   : > { %v761_v21 = vpop.xlane.xlu1 %760 }
 0x1e1   : > { %v788_v22 = vmul.f32 0.0078125, %v761_v21  ;;  %v819_v27 = vmul.f32 %v1709_v23, %v1709_v23 }
 0x1e3   : > { %v1714_v24 = vsub.f32 %v1617_v28, %v788_v22  ;;  %839 = vadd.xlane.f32.xlu0 %v819_v27 }
 0x1e4   : > { %v763_v20 = vpop.xlane.xlu0 %762 }
 0x1e5   : > { %v789_v25 = vmul.f32 0.0078125, %v763_v20  ;;  %v820_v26 = vmul.f32 %v1714_v24, %v1714_v24 }
 0x1e7   : > { %v1719_v31 = vsub.f32 %v1627_v34, %v789_v25  ;;  %841 = vadd.xlane.f32.xlu1 %v820_v26 }
 0x1e8   : > { %v765_v29 = vpop.xlane.xlu1 %764  ;;  %v767_v28 = vpop.xlane.xlu0 %766 }
 0x1e9   : > { %v790_v30 = vmul.f32 0.0078125, %v765_v29  ;;  %v791_v33 = vmul.f32 0.0078125, %v767_v28  ;;  %v821_v35 = vmul.f32 %v1719_v31, %v1719_v31 }
 0x1eb   : > { %v1724_v32 = vsub.f32 %v1631_v36, %v790_v30  ;;  %v1729_v39 = vsub.f32 %v1641_v42, %v791_v33  ;;  %843 = vadd.xlane.f32.xlu0 %v821_v35  ;;  %v1773_v30 = vld [vmem:[%s1895_s4] ss:$0 sm:$0xff] }
 0x1ec   : > { %v769_v37 = vpop.xlane.xlu1 %768  ;;  %v771_v36 = vpop.xlane.xlu0 %770 }
 0x1ed   : > { %v792_v38 = vmul.f32 0.0078125, %v769_v37  ;;  %v822_v34 = vmul.f32 %v1724_v32, %v1724_v32  ;;  %v793_v41 = vmul.f32 0.0078125, %v771_v36  ;;  %v823_v43 = vmul.f32 %v1729_v39, %v1729_v39 }
 0x1ef   : > { %v1734_v40 = vsub.f32 %v1645_v44, %v792_v38  ;;  %v1739_v47 = vsub.f32 %v1655_v50, %v793_v41  ;;  %845 = vadd.xlane.f32.xlu1 %v822_v34  ;;  %847 = vadd.xlane.f32.xlu0 %v823_v43  ;;  %v1779_v38 = vld [vmem:[%s1896_s5] ss:$0 sm:$0xff] }
 0x1f0   : > { %v773_v45 = vpop.xlane.xlu1 %772  ;;  %v775_v44 = vpop.xlane.xlu0 %774 }
 0x1f1   : > { %v794_v46 = vmul.f32 0.0078125, %v773_v45  ;;  %v824_v42 = vmul.f32 %v1734_v40, %v1734_v40  ;;  %v795_v49 = vmul.f32 0.0078125, %v775_v44  ;;  %v825_v51 = vmul.f32 %v1739_v47, %v1739_v47 }
 0x1f3   : > { %v1744_v48 = vsub.f32 %v1659_v52, %v794_v46  ;;  %v1749_v55 = vsub.f32 %v1669_v58, %v795_v49  ;;  %849 = vadd.xlane.f32.xlu1 %v824_v42  ;;  %851 = vadd.xlane.f32.xlu0 %v825_v51 }
 0x1f4   : > { %v777_v53 = vpop.xlane.xlu1 %776  ;;  %v779_v52 = vpop.xlane.xlu0 %778 }
 0x1f5   : > { %v796_v54 = vmul.f32 0.0078125, %v777_v53  ;;  %v826_v50 = vmul.f32 %v1744_v48, %v1744_v48  ;;  %v797_v57 = vmul.f32 0.0078125, %v779_v52  ;;  %v827_v59 = vmul.f32 %v1749_v55, %v1749_v55 }
 0x1f7   : > { %v1754_v56 = vsub.f32 %v1673_v60, %v796_v54  ;;  %v1759_v63 = vsub.f32 %v1683_v0, %v797_v57  ;;  %853 = vadd.xlane.f32.xlu1 %v826_v50  ;;  %855 = vadd.xlane.f32.xlu0 %v827_v59 }
 0x1f8   : > { %v781_v61 = vpop.xlane.xlu1 %780 }
 0x1f9   : > { %v798_v62 = vmul.f32 0.0078125, %v781_v61  ;;  %v828_v58 = vmul.f32 %v1754_v56, %v1754_v56  ;;  %v829_v60 = vmul.f32 %v1759_v63, %v1759_v63 }
 0x1fb   : > { %v1764_v3 = vsub.f32 %v1686_v1, %v798_v62  ;;  %857 = vadd.xlane.f32.xlu1 %v828_v58  ;;  %859 = vadd.xlane.f32.xlu0 %v829_v60 }
 0x1fd   : > { %v830_v4 = vmul.f32 %v1764_v3, %v1764_v3 }
 0x1ff   : > { %861 = vadd.xlane.f32.xlu1 %v830_v4 }
 0x260   : > { %v832_v5 = vpop.xlane.xlu0 %831 }
 0x261   : > { %v863_v0 = vmul.f32 0.0078125, %v832_v5 }
 0x263   : > { %v879_v2 = vadd.f32 1e-05, %v863_v0 }
 0x264   : > { %v834_v8 = vpop.xlane.xlu1 %833 }
 0x265   : > { %1277 = vrsqrt.f32 %v879_v2  ;;  %v864_v10 = vmul.f32 0.0078125, %v834_v8 }
 0x267   : > { %v880_v13 = vadd.f32 1e-05, %v864_v10 }
 0x268   : > { %v836_v9 = vpop.xlane.xlu0 %835 }
 0x269   : > { %v865_v11 = vmul.f32 0.0078125, %v836_v9  ;;  %1279 = vrsqrt.f32 %v880_v13 }
 0x26b   : > { %v881_v1 = vadd.f32 1e-05, %v865_v11 }
 0x26c   : > { %v838_v15 = vpop.xlane.xlu1 %837 }
 0x26d   : > { %v866_v17 = vmul.f32 0.0078125, %v838_v15  ;;  %1281 = vrsqrt.f32 %v881_v1 }
 0x26f   : > { %v882_v21 = vadd.f32 1e-05, %v866_v17  ;;  %v1278_v29 = vpop.eup %1277 }
 0x270   : > { %v840_v16 = vpop.xlane.xlu0 %839  ;;  %v911_v33 = vmul.f32 %v1278_v29, %v1691_v6 }
 0x271   : > { %v867_v19 = vmul.f32 0.0078125, %v840_v16  ;;  %1283 = vrsqrt.f32 %v882_v21 }
 0x272   : > { %v934_v41 = vmul.f32 %v1773_v30, %v911_v33 }
 0x273   : > { %v883_v22 = vadd.f32 1e-05, %v867_v19  ;;  %v1280_v43 = vpop.eup %1279 }
 0x274   : > { %v842_v18 = vpop.xlane.xlu1 %841  ;;  %v957_v44 = vadd.f32 %v1779_v38, %v934_v41  ;;  %v912_v6 = vmul.f32 %v1280_v43, %v1699_v14 }
 0x275   : > { %v868_v25 = vmul.f32 0.0078125, %v842_v18  ;;  %1285 = vrsqrt.f32 %v883_v22 }
 0x276   : > { %973 = vst [vmem:[%s1897_s6] sm:$0xff] %v957_v44  ;;  %v935_v52 = vmul.f32 %v1773_v30, %v912_v6 }
 0x277   : > { %v884_v26 = vadd.f32 1e-05, %v868_v25  ;;  %v1282_v42 = vpop.eup %1281 }
 0x278   : > { %v844_v20 = vpop.xlane.xlu0 %843  ;;  %v913_v53 = vmul.f32 %v1282_v42, %v1694_v7  ;;  %v958_v58 = vadd.f32 %v1779_v38, %v935_v52 }
 0x279   : > { %v869_v27 = vmul.f32 0.0078125, %v844_v20  ;;  %1287 = vrsqrt.f32 %v884_v26 }
 0x27a   : > { %v936_v59 = vmul.f32 %v1773_v30, %v913_v53  ;;  %974 = vst [vmem:[%s1897_s6 + $0x8] sm:$0xff] %v958_v58 }
 0x27b   : > { %v885_v28 = vadd.f32 1e-05, %v869_v27  ;;  %v1284_v57 = vpop.eup %1283 }
 0x27c   : > { %v846_v35 = vpop.xlane.xlu1 %845  ;;  %v848_v37 = vpop.xlane.xlu0 %847  ;;  %v914_v7 = vmul.f32 %v1284_v57, %v1704_v12  ;;  %v959_v5 = vadd.f32 %v1779_v38, %v936_v59 }
 0x27d   : > { %v870_v34 = vmul.f32 0.0078125, %v846_v35  ;;  %v871_v36 = vmul.f32 0.0078125, %v848_v37  ;;  %1289 = vrsqrt.f32 %v885_v28 }
 0x27e   : > { %v937_v8 = vmul.f32 %v1773_v30, %v914_v7  ;;  %975 = vst [vmem:[%s1897_s6 + $0x10] sm:$0xff] %v959_v5 }
 0x27f   : > { %v886_v45 = vadd.f32 1e-05, %v870_v34  ;;  %v887_v46 = vadd.f32 1e-05, %v871_v36  ;;  %v1286_v14 = vpop.eup %1285 }
 0x280   : > { %v850_v49 = vpop.xlane.xlu1 %849  ;;  %v852_v51 = vpop.xlane.xlu0 %851  ;;  %v915_v0 = vmul.f32 %v1286_v14, %v1709_v23  ;;  %v960_v23 = vadd.f32 %v1779_v38, %v937_v8 }
 0x281   : > { %1291 = vrsqrt.f32 %v886_v45  ;;  %v872_v54 = vmul.f32 0.0078125, %v850_v49  ;;  %v873_v50 = vmul.f32 0.0078125, %v852_v51 }
 0x282   : > { %1293 = vrsqrt.f32 %v887_v46  ;;  %v938_v12 = vmul.f32 %v1773_v30, %v915_v0  ;;  %976 = vst [vmem:[%s1897_s6 + $0x18] sm:$0xff] %v960_v23 }
 0x283   : > { %v888_v61 = vadd.f32 1e-05, %v872_v54  ;;  %v889_v62 = vadd.f32 1e-05, %v873_v50  ;;  %v1288_v10 = vpop.eup %1287 }
 0x284   : > { %v854_v60 = vpop.xlane.xlu1 %853  ;;  %v856_v4 = vpop.xlane.xlu0 %855  ;;  %v916_v1 = vmul.f32 %v1288_v10, %v1714_v24  ;;  %v961_v19 = vadd.f32 %v1779_v38, %v938_v12 }
 0x285   : > { %1295 = vrsqrt.f32 %v888_v61  ;;  %v874_v2 = vmul.f32 0.0078125, %v854_v60  ;;  %v875_v9 = vmul.f32 0.0078125, %v856_v4 }
 0x286   : > { %1297 = vrsqrt.f32 %v889_v62  ;;  %v939_v18 = vmul.f32 %v1773_v30, %v916_v1  ;;  %977 = vst [vmem:[%s1897_s6 + $0x20] sm:$0xff] %v961_v19 }
 0x287   : > { %v890_v11 = vadd.f32 1e-05, %v874_v2  ;;  %v1290_v13 = vpop.eup %1289  ;;  %v891_v15 = vadd.f32 1e-05, %v875_v9 }
 0x288   : > { %v858_v16 = vpop.xlane.xlu1 %857  ;;  %v860_v17 = vpop.xlane.xlu0 %859  ;;  %v917_v21 = vmul.f32 %v1290_v13, %v1719_v31  ;;  %v962_v31 = vadd.f32 %v1779_v38, %v939_v18 }
 0x289   : > { %1299 = vrsqrt.f32 %v890_v11  ;;  %v876_v22 = vmul.f32 0.0078125, %v858_v16  ;;  %v877_v20 = vmul.f32 0.0078125, %v860_v17 }
 0x28a   : > { %1301 = vrsqrt.f32 %v891_v15  ;;  %v940_v24 = vmul.f32 %v1773_v30, %v917_v21  ;;  %978 = vst [vmem:[%s1897_s6 + $0x28] sm:$0xff] %v962_v31 }
 0x28b   : > { %v1292_v25 = vpop.eup %1291  ;;  %v892_v27 = vadd.f32 1e-05, %v876_v22  ;;  %v893_v28 = vadd.f32 1e-05, %v877_v20 }
 0x28c   : > { %v1294_v29 = vpop.eup %1293  ;;  %v918_v26 = vmul.f32 %v1292_v25, %v1724_v32  ;;  %v862_v33 = vpop.xlane.xlu1 %861  ;;  %v963_v35 = vadd.f32 %v1779_v38, %v940_v24 }
 0x28d   : > { %v919_v37 = vmul.f32 %v1294_v29, %v1729_v39  ;;  %1303 = vrsqrt.f32 %v892_v27  ;;  %v878_v34 = vmul.f32 0.0078125, %v862_v33 }
 0x28e   : > { %v941_v36 = vmul.f32 %v1773_v30, %v918_v26  ;;  %1305 = vrsqrt.f32 %v893_v28  ;;  %979 = vst [vmem:[%s1897_s6 + $0x30] sm:$0xff] %v963_v35 }
 0x28f   : > { %v1296_v41 = vpop.eup %1295  ;;  %v942_v32 = vmul.f32 %v1773_v30, %v919_v37  ;;  %v894_v43 = vadd.f32 1e-05, %v878_v34 }
 0x290   : > { %v1298_v45 = vpop.eup %1297  ;;  %v964_v39 = vadd.f32 %v1779_v38, %v941_v36  ;;  %v920_v46 = vmul.f32 %v1296_v41, %v1734_v40 }
 0x291   : > { %v965_v42 = vadd.f32 %v1779_v38, %v942_v32  ;;  %v921_v44 = vmul.f32 %v1298_v45, %v1739_v47  ;;  %1307 = vrsqrt.f32 %v894_v43 }
 0x292   : > { %980 = vst [vmem:[%s1897_s6 + $0x38] sm:$0xff] %v964_v39  ;;  %v943_v6 = vmul.f32 %v1773_v30, %v920_v46 }
 0x293   : > { %v1300_v49 = vpop.eup %1299  ;;  %981 = vst [vmem:[%s1897_s6 + $0x40] sm:$0xff] %v965_v42  ;;  %v944_v51 = vmul.f32 %v1773_v30, %v921_v44 }
 0x294   : > { %v1302_v53 = vpop.eup %1301  ;;  %v966_v40 = vadd.f32 %v1779_v38, %v943_v6  ;;  %v922_v54 = vmul.f32 %v1300_v49, %v1744_v48 }
 0x295   : > { %v967_v47 = vadd.f32 %v1779_v38, %v944_v51  ;;  %v923_v50 = vmul.f32 %v1302_v53, %v1749_v55 }
 0x296   : > { %982 = vst [vmem:[%s1897_s6 + $0x48] sm:$0xff] %v966_v40  ;;  %v945_v52 = vmul.f32 %v1773_v30, %v922_v54 }
 0x297   : > { %v1304_v57 = vpop.eup %1303  ;;  %983 = vst [vmem:[%s1897_s6 + $0x50] sm:$0xff] %v967_v47  ;;  %v946_v59 = vmul.f32 %v1773_v30, %v923_v50 }
 0x298   : > { %v1306_v61 = vpop.eup %1305  ;;  %v968_v48 = vadd.f32 %v1779_v38, %v945_v52  ;;  %v924_v62 = vmul.f32 %v1304_v57, %v1754_v56 }
 0x299   : > { %v969_v55 = vadd.f32 %v1779_v38, %v946_v59  ;;  %v925_v14 = vmul.f32 %v1306_v61, %v1759_v63 }
 0x29a   : > { %984 = vst [vmem:[%s1897_s6 + $0x58] sm:$0xff] %v968_v48  ;;  %v947_v58 = vmul.f32 %v1773_v30, %v924_v62 }
 0x29b   : > { %v1308_v7 = vpop.eup %1307  ;;  %985 = vst [vmem:[%s1897_s6 + $0x60] sm:$0xff] %v969_v55  ;;  %v948_v60 = vmul.f32 %v1773_v30, %v925_v14 }
 0x29c   : > { %v970_v4 = vadd.f32 %v1779_v38, %v947_v58  ;;  %v926_v56 = vmul.f32 %v1308_v7, %v1764_v3 }
 0x29d   : > { %v971_v5 = vadd.f32 %v1779_v38, %v948_v60 }
 0x29e   : > { %986 = vst [vmem:[%s1897_s6 + $0x68] sm:$0xff] %v970_v4  ;;  %v949_v63 = vmul.f32 %v1773_v30, %v926_v56 }
 0x29f   : > { %987 = vst [vmem:[%s1897_s6 + $0x70] sm:$0xff] %v971_v5 }
 0x2a0   : > { %v972_v0 = vadd.f32 %v1779_v38, %v949_v63 }
 0x2a2   : > { %988 = vst [vmem:[%s1897_s6 + $0x78] sm:$0xff] %v972_v0 }
 0x2a3 PF: > { %s16_s25 = sadd.s32 1, %s1347_s25   ;;  %s1898_s21 = smov %s1335_s22 }
 0x2a4   : > { %p13_p12 = scmp.ge.s32.totalorder %s16_s25, 4   ;;  %s1899_s22 = smov %s1420_s29 }
 0x2a5   : > { %s1900_s23 = smov %s1343_s24  ;;  %s1901_s24 = smov %s1903_s26 }
 0x2a6   :  { %15 = sbr.rel (!%p13_p12) target bundleno = 3 (0x3), region = 116 }

// kernel: decoder_block_forward.6
= control target key start
LH: loop header
LB: loop body
LE: loop exit
PB: predicated region body
PF: predicated region fallthrough
CT: control target
= control target key end

     0   :  { %s1175_s12 = smov 0   ;;  %s1177_s13 = smov 0   ;;  %s1557_s0 = inlined_call_operand.vmem [shape: f32[128,128], index: 0, kind: input, shape index: {}]   ;;  %s1558_s1 = inlined_call_operand.vmem [shape: f32[128,512], index: 1, kind: input, shape index: {}]   ;;  %s1559_s2 = inlined_call_operand.vmem [shape: f32[1,512], index: 2, kind: input, shape index: {}]   ;;  %s1560_s3 = inlined_call_operand.vmem [shape: f32[128,512], index: 3, kind: output, shape index: {}]  }
   0x1   :  { %s1179_s14 = smov 0   ;;  %s1181_s15 = smov 0  }
   0x2   :  { %s1183_s16 = smov 0  }
   0x3 LB: > { %s28_s17 = sadd.s32 1, %s1148_s15  ;;  %s1006_s18 = sadd.s32 4294967295, %s1152_s16   ;;  %s1152_s16 = sphi %s1183_s16, %s13_s16   ;;  %s1148_s15 = sphi %s1181_s15, %s1565_s15   ;;  %s1144_s14 = sphi %s1179_s14, %s1564_s14   ;;  %s1140_s13 = sphi %s1177_s13, %s1563_s13   ;;  %s1136_s12 = sphi %s1175_s12, %s1562_s12  }
   0x4   : > { %p30_p0 = scmp.ge.s32.totalorder %s28_s17, 2  ;;  %p76_p1 = scmp.ne.s32.totalorder %s1140_s13, %s1136_s12 }
   0x5   : > { %p77_p2 = scmp.eq.s32.totalorder %s1152_s16, 0  ;;  %p134_p4 = scmp.eq.s32.totalorder %s1006_s18, 1 }
   0x6   : > { %s1567_s17 = smov (%p30_p0, %s28_s17), 0  ;;  %s69_s20 = sadd.s32 1, %s1140_s13 }
   0x7   : > { %p78_p3 = por %p77_p2, %p76_p1  ;;  %s65_s19 = ssub.s32 %s1148_s15, %s1567_s17 }
   0x8   : > { %p67_p5 = scmp.eq.s32.totalorder %s65_s19, 0  ;;  %p1210_p6 = por %p134_p4, %p76_p1 }
   0x9   : > { %p1010_p7 = scmp.ge.s32.totalorder %s1152_s16, 2 }
   0xa   : > { %s1215_s22 = scalar_select %p67_p5, %s1140_s13, %s69_s20  }
   0xb   : > { %168 = sbr.rel (%p1010_p7) target bundleno = 38 (0x26), region = 20 }
  0x12   : > { %171 = sbr.rel (!%p78_p3) target bundleno = 38 (0x26), region = 24  ;;  %s173_s23 = sand.u32 (%p78_p3), 1, %s1140_s13  }
  0x13   : > { %s1023_s24 = sshll.u32 (%p78_p3), %s1148_s15, 4  ;;  %s1011_s25 = sshll.u32 (%p78_p3), %s173_s23, 8 }
  0x14   : > { %s1223_s28 = scalar_lea.vmem (%p78_p3), %s1558_s1, %s1023_s24  ;;  %s1228_s29 = scalar_lea.vmem (%p78_p3), [#allocation3], %s1011_s25 }
  0x15   : > { %v194_v0 = vld [vmem:[%s1223_s28] sm:$0xff] (%p78_p3)  ;;  %v196_v1 = vld [vmem:[%s1223_s28 + $0x8] sm:$0xff] (%p78_p3) }
  0x16   : > { %v198_v2 = vld [vmem:[%s1223_s28 + $0x20] sm:$0xff] (%p78_p3)  ;;  %195 = vst [vmem:[%s1228_s29] sm:$0xff] (%p78_p3), %v194_v0  ;;  %197 = vst [vmem:[%s1228_s29 + $0x8] sm:$0xff] (%p78_p3), %v196_v1  ;;  %v200_v3 = vld [vmem:[%s1223_s28 + $0x28] sm:$0xff] (%p78_p3) }
  0x17   : > { %199 = vst [vmem:[%s1228_s29 + $0x10] sm:$0xff] (%p78_p3), %v198_v2  ;;  %v202_v4 = vld [vmem:[%s1223_s28 + $0x40] sm:$0xff] (%p78_p3)  ;;  %v204_v5 = vld [vmem:[%s1223_s28 + $0x48] sm:$0xff] (%p78_p3)  ;;  %201 = vst [vmem:[%s1228_s29 + $0x18] sm:$0xff] (%p78_p3), %v200_v3 }
  0x18   : > { %203 = vst [vmem:[%s1228_s29 + $0x20] sm:$0xff] (%p78_p3), %v202_v4  ;;  %205 = vst [vmem:[%s1228_s29 + $0x28] sm:$0xff] (%p78_p3), %v204_v5  ;;  %v206_v6 = vld [vmem:[%s1223_s28 + $0x60] sm:$0xff] (%p78_p3)  ;;  %v208_v7 = vld [vmem:[%s1223_s28 + $0x68] sm:$0xff] (%p78_p3) }
  0x19   : > { %v210_v8 = vld [vmem:[%s1223_s28 + $0x80] sm:$0xff]  ;;  %207 = vst [vmem:[%s1228_s29 + $0x30] sm:$0xff] %v206_v6  ;;  %209 = vst [vmem:[%s1228_s29 + $0x38] sm:$0xff] %v208_v7  ;;  %v212_v9 = vld [vmem:[%s1223_s28 + $0x88] sm:$0xff] }
  0x1a   : > { %211 = vst [vmem:[%s1228_s29 + $0x40] sm:$0xff] %v210_v8  ;;  %v214_v10 = vld [vmem:[%s1223_s28 + $0xa0] sm:$0xff]  ;;  %v216_v11 = vld [vmem:[%s1223_s28 + $0xa8] sm:$0xff]  ;;  %213 = vst [vmem:[%s1228_s29 + $0x48] sm:$0xff] %v212_v9 }
  0x1b   : > { %215 = vst [vmem:[%s1228_s29 + $0x50] sm:$0xff] %v214_v10  ;;  %217 = vst [vmem:[%s1228_s29 + $0x58] sm:$0xff] %v216_v11  ;;  %v218_v12 = vld [vmem:[%s1223_s28 + $0xc0] sm:$0xff]  ;;  %v220_v13 = vld [vmem:[%s1223_s28 + $0xc8] sm:$0xff] }
  0x1c   : > { %v222_v14 = vld [vmem:[%s1223_s28 + $0xe0] sm:$0xff]  ;;  %219 = vst [vmem:[%s1228_s29 + $0x60] sm:$0xff] %v218_v12  ;;  %221 = vst [vmem:[%s1228_s29 + $0x68] sm:$0xff] %v220_v13  ;;  %v224_v15 = vld [vmem:[%s1223_s28 + $0xe8] sm:$0xff] }
  0x1d   : > { %223 = vst [vmem:[%s1228_s29 + $0x70] sm:$0xff] %v222_v14  ;;  %v226_v16 = vld [vmem:[%s1223_s28 + $0x100] sm:$0xff]  ;;  %v228_v17 = vld [vmem:[%s1223_s28 + $0x108] sm:$0xff]  ;;  %225 = vst [vmem:[%s1228_s29 + $0x78] sm:$0xff] %v224_v15 }
  0x1e   : > { %227 = vst [vmem:[%s1228_s29 + $0x80] sm:$0xff] %v226_v16  ;;  %229 = vst [vmem:[%s1228_s29 + $0x88] sm:$0xff] %v228_v17  ;;  %v230_v18 = vld [vmem:[%s1223_s28 + $0x120] sm:$0xff]  ;;  %v232_v19 = vld [vmem:[%s1223_s28 + $0x128] sm:$0xff] }
  0x1f   : > { %v234_v20 = vld [vmem:[%s1223_s28 + $0x140] sm:$0xff]  ;;  %231 = vst [vmem:[%s1228_s29 + $0x90] sm:$0xff] %v230_v18  ;;  %233 = vst [vmem:[%s1228_s29 + $0x98] sm:$0xff] %v232_v19  ;;  %v236_v21 = vld [vmem:[%s1223_s28 + $0x148] sm:$0xff] }
  0x20   : > { %235 = vst [vmem:[%s1228_s29 + $0xa0] sm:$0xff] %v234_v20  ;;  %v238_v22 = vld [vmem:[%s1223_s28 + $0x160] sm:$0xff]  ;;  %v240_v23 = vld [vmem:[%s1223_s28 + $0x168] sm:$0xff]  ;;  %237 = vst [vmem:[%s1228_s29 + $0xa8] sm:$0xff] %v236_v21 }
  0x21   : > { %239 = vst [vmem:[%s1228_s29 + $0xb0] sm:$0xff] %v238_v22  ;;  %241 = vst [vmem:[%s1228_s29 + $0xb8] sm:$0xff] %v240_v23  ;;  %v242_v24 = vld [vmem:[%s1223_s28 + $0x180] sm:$0xff]  ;;  %v244_v25 = vld [vmem:[%s1223_s28 + $0x188] sm:$0xff] }
  0x22   : > { %v246_v26 = vld [vmem:[%s1223_s28 + $0x1a0] sm:$0xff]  ;;  %243 = vst [vmem:[%s1228_s29 + $0xc0] sm:$0xff] %v242_v24  ;;  %245 = vst [vmem:[%s1228_s29 + $0xc8] sm:$0xff] %v244_v25  ;;  %v248_v27 = vld [vmem:[%s1223_s28 + $0x1a8] sm:$0xff] }
  0x23   : > { %247 = vst [vmem:[%s1228_s29 + $0xd0] sm:$0xff] %v246_v26  ;;  %v250_v28 = vld [vmem:[%s1223_s28 + $0x1c0] sm:$0xff]  ;;  %v252_v29 = vld [vmem:[%s1223_s28 + $0x1c8] sm:$0xff]  ;;  %249 = vst [vmem:[%s1228_s29 + $0xd8] sm:$0xff] %v248_v27 }
  0x24   : > { %251 = vst [vmem:[%s1228_s29 + $0xe0] sm:$0xff] %v250_v28  ;;  %253 = vst [vmem:[%s1228_s29 + $0xe8] sm:$0xff] %v252_v29  ;;  %v254_v30 = vld [vmem:[%s1223_s28 + $0x1e0] sm:$0xff]  ;;  %v256_v31 = vld [vmem:[%s1223_s28 + $0x1e8] sm:$0xff] }
  0x25   : > { %255 = vst [vmem:[%s1228_s29 + $0xf0] sm:$0xff] %v254_v30  ;;  %257 = vst [vmem:[%s1228_s29 + $0xf8] sm:$0xff] %v256_v31 }
  0x26 PF: > { %p1014_p8 = scmp.ge.s32.totalorder %s1152_s16, 1  ;;  %p270_p9 = scmp.lt.s32.totalorder %s1152_s16, 3 }
  0x28   : > { %p271_p10 = pnand %p1014_p8, %p270_p9 }
  0x29   : > { %s277_s30 = sand.u32 (!%p271_p10), 1, %s1136_s12   ;;  %v1154_v32 = vmov (!%p271_p10), 0.0   ;;  %v397_v17 = vld [vmem:[%s1557_s0] sm:$0xff] (!%p271_p10)  ;;  %v398_v19 = vld [vmem:[%s1557_s0 + $0x8] sm:$0xff] (!%p271_p10)  ;;  %v399_v21 = vld [vmem:[%s1557_s0 + $0x10] sm:$0xff] (!%p271_p10)  ;;  %s1017_s26 = sshll.u32 (!%p271_p10), %s1144_s14, 1 }
  0x2a   : > { %274 = sbr.rel (%p271_p10) target bundleno = 335 (0x14f), region = 51  ;;  %s1294_s4 = sshll.u32 (!%p271_p10), %s277_s30, 8  ;;  %509 = vmatprep.mubr.f32.mxu0 (!%p271_p10), %v1154_v32  ;;  %557 = vmatprep.mubr.f32.mxu1 (!%p271_p10), %v1154_v32  ;;  %v405_v18 = vld [vmem:[%s1557_s0 + $0x40] sm:$0xff] (!%p271_p10)  ;;  %v406_v20 = vld [vmem:[%s1557_s0 + $0x48] sm:$0xff] (!%p271_p10)  ;;  %v407_v22 = vld [vmem:[%s1557_s0 + $0x50] sm:$0xff] (!%p271_p10) }
  0x2b   : > { %s1299_s5 = scalar_lea.vmem (!%p271_p10), [#allocation3], %s1294_s4  ;;  %v400_v23 = vld [vmem:[%s1557_s0 + $0x18] sm:$0xff] (!%p271_p10)  ;;  %v401_v25 = vld [vmem:[%s1557_s0 + $0x20] sm:$0xff] (!%p271_p10)  ;;  %v402_v27 = vld [vmem:[%s1557_s0 + $0x28] sm:$0xff] (!%p271_p10)  ;;  %p323_p11 = scmp.lt.s32.totalorder (!%p271_p10), %s1017_s26, 3 }
  0x2c   : > { %v414_v33 = vld [vmem:[%s1299_s5 + $0x8] sm:$0xff] (!%p271_p10)  ;;  %v416_v34 = vld [vmem:[%s1299_s5 + $0x18] sm:$0xff] (!%p271_p10)  ;;  %v413_v35 = vld [vmem:[%s1299_s5] sm:$0xff] (!%p271_p10)  ;;  %s1408_s30 = scalar_lea.vmem (!%p271_p10), [#allocation4], %s1294_s4 }
  0x2d   : > { %v1025_v36 = vpack.c.bf16 (!%p271_p10), %v416_v34, %v414_v33  ;;  %v415_v37 = vld [vmem:[%s1299_s5 + $0x10] sm:$0xff] (!%p271_p10)  ;;  %v418_v38 = vld [vmem:[%s1299_s5 + $0x28] sm:$0xff] (!%p271_p10)  ;;  %v420_v39 = vld [vmem:[%s1299_s5 + $0x38] sm:$0xff] (!%p271_p10)  ;;  %v707_v34 = vlaneseq (!%p271_p10) }
  0x2e   : > { %v1027_v40 = vpack.c.bf16 (!%p271_p10), %v415_v37, %v413_v35  ;;  %v1029_v41 = vpack.c.bf16 (!%p271_p10), %v420_v39, %v418_v38  ;;  %v417_v42 = vld [vmem:[%s1299_s5 + $0x20] sm:$0xff] (!%p271_p10)  ;;  %v419_v43 = vld [vmem:[%s1299_s5 + $0x30] sm:$0xff] (!%p271_p10)  ;;  %v422_v44 = vld [vmem:[%s1299_s5 + $0x48] sm:$0xff] (!%p271_p10) }
  0x2f   : > { %1026 = vmatprep.subr.bf16.mxu0 (!%p271_p10), %v1025_v36  ;;  %1057 = vmatprep.subr.bf16.mxu1 (!%p271_p10), %v1025_v36  ;;  %v424_v45 = vld [vmem:[%s1299_s5 + $0x58] sm:$0xff] (!%p271_p10)  ;;  %v1031_v46 = vpack.c.bf16 (!%p271_p10), %v419_v43, %v417_v42  ;;  %v421_v48 = vld [vmem:[%s1299_s5 + $0x40] sm:$0xff] (!%p271_p10)  ;;  %v423_v49 = vld [vmem:[%s1299_s5 + $0x50] sm:$0xff] (!%p271_p10)  ;;  %v708_v35 = vshrl.u32 (!%p271_p10), %v707_v34, 7 }
  0x30   : > { %1028 = vmatpush1.bf16.msra.mxu0 (!%p271_p10), %v1027_v40  ;;  %1065 = vmatpush1.bf16.msra.mxu1 (!%p271_p10), %v1027_v40  ;;  %v1033_v47 = vpack.c.bf16 (!%p271_p10), %v424_v45, %v422_v44  ;;  %v426_v50 = vld [vmem:[%s1299_s5 + $0x68] sm:$0xff] (!%p271_p10)  ;;  %v428_v51 = vld [vmem:[%s1299_s5 + $0x78] sm:$0xff] (!%p271_p10)  ;;  %v1035_v52 = vpack.c.bf16 (!%p271_p10), %v423_v49, %v421_v48  ;;  %v425_v54 = vld [vmem:[%s1299_s5 + $0x60] sm:$0xff] (!%p271_p10) }
  0x31   : > { %1030 = vmatprep.subr.bf16.mxu0 %v1029_v41  ;;  %1058 = vmatprep.subr.bf16.mxu1 %v1029_v41  ;;  %v1037_v53 = vpack.c.bf16 %v428_v51, %v426_v50  ;;  %v427_v55 = vld [vmem:[%s1299_s5 + $0x70] sm:$0xff]  ;;  %v430_v56 = vld [vmem:[%s1299_s5 + $0x88] sm:$0xff]  ;;  %v432_v57 = vld [vmem:[%s1299_s5 + $0x98] sm:$0xff]  ;;  %s1569_s26 = smov (!%p323_p11, %s1017_s26), 3  ;;  %v713_v37 = vsub.s32 1, %v708_v35  ;;  %s1024_s4 = sshll.u32 (%p1210_p6), %s1144_s14, 4 }
  0x32   : > { %v1039_v58 = vpack.c.bf16 %v427_v55, %v425_v54  ;;  %v1041_v59 = vpack.c.bf16 %v432_v57, %v430_v56  ;;  %v429_v60 = vld [vmem:[%s1299_s5 + $0x80] sm:$0xff]  ;;  %v431_v61 = vld [vmem:[%s1299_s5 + $0x90] sm:$0xff]  ;;  %v434_v62 = vld [vmem:[%s1299_s5 + $0xa8] sm:$0xff]  ;;  %s325_s29 = scalar_lea.vmem %s1559_s2, %s1569_s26  ;;  %s1479_s7 = scalar_lea.vmem (%p1210_p6), %s1560_s3, %s1024_s4 }
  0x33   : > { %v436_v63 = vld [vmem:[%s1299_s5 + $0xb8] sm:$0xff]  ;;  %v1043_v0 = vpack.c.bf16 %v431_v61, %v429_v60  ;;  %v433_v2 = vld [vmem:[%s1299_s5 + $0xa0] sm:$0xff]  ;;  %v435_v3 = vld [vmem:[%s1299_s5 + $0xb0] sm:$0xff] }
  0x34   : > { %1032 = vmatpush1.bf16.msra.mxu0 %v1031_v46  ;;  %1066 = vmatpush1.bf16.msra.mxu1 %v1031_v46  ;;  %v1045_v1 = vpack.c.bf16 %v436_v63, %v434_v62  ;;  %v438_v4 = vld [vmem:[%s1299_s5 + $0xc8] sm:$0xff]  ;;  %v440_v5 = vld [vmem:[%s1299_s5 + $0xd8] sm:$0xff]  ;;  %v1047_v6 = vpack.c.bf16 %v435_v3, %v433_v2  ;;  %v437_v8 = vld [vmem:[%s1299_s5 + $0xc0] sm:$0xff] }
  0x35   : > { %1034 = vmatprep.subr.bf16.mxu0 %v1033_v47  ;;  %1059 = vmatprep.subr.bf16.mxu1 %v1033_v47  ;;  %v1049_v7 = vpack.c.bf16 %v440_v5, %v438_v4  ;;  %v439_v9 = vld [vmem:[%s1299_s5 + $0xd0] sm:$0xff]  ;;  %v442_v10 = vld [vmem:[%s1299_s5 + $0xe8] sm:$0xff]  ;;  %v444_v11 = vld [vmem:[%s1299_s5 + $0xf8] sm:$0xff] }
  0x36   : > { %v1051_v12 = vpack.c.bf16 %v439_v9, %v437_v8  ;;  %v1053_v13 = vpack.c.bf16 %v444_v11, %v442_v10  ;;  %v441_v14 = vld [vmem:[%s1299_s5 + $0xe0] sm:$0xff]  ;;  %v443_v15 = vld [vmem:[%s1299_s5 + $0xf0] sm:$0xff]  ;;  %v408_v24 = vld [vmem:[%s1557_s0 + $0x58] sm:$0xff] }
  0x37   : > { %v1055_v16 = vpack.c.bf16 %v443_v15, %v441_v14  ;;  %v409_v26 = vld [vmem:[%s1557_s0 + $0x60] sm:$0xff]  ;;  %v410_v28 = vld [vmem:[%s1557_s0 + $0x68] sm:$0xff]  ;;  %v403_v29 = vld [vmem:[%s1557_s0 + $0x30] sm:$0xff] }
  0x38   : > { %1036 = vmatpush1.bf16.msra.mxu0 %v1035_v52  ;;  %1067 = vmatpush1.bf16.msra.mxu1 %v1035_v52  ;;  %v411_v30 = vld [vmem:[%s1557_s0 + $0x70] sm:$0xff]  ;;  %v404_v31 = vld [vmem:[%s1557_s0 + $0x38] sm:$0xff]  ;;  %v705_v36 = vld [vmem:[%s325_s29] sm:$0x3] }
  0x39   : > { %1038 = vmatprep.subr.bf16.mxu0 %v1037_v53  ;;  %1060 = vmatprep.subr.bf16.mxu1 %v1037_v53  ;;  %v412_v33 = vld [vmem:[%s1557_s0 + $0x78] sm:$0xff]  ;;  %v1401_v39 = vrot.slane %v705_v36, %v713_v37 }
  0x3c   : > { %1040 = vmatpush1.bf16.msra.mxu0 %v1039_v58  ;;  %1068 = vmatpush1.bf16.msra.mxu1 %v1039_v58 }
  0x3d   : > { %1042 = vmatprep.subr.bf16.mxu0 %v1041_v59  ;;  %1061 = vmatprep.subr.bf16.mxu1 %v1041_v59 }
  0x40   : > { %1044 = vmatpush1.bf16.msra.mxu0 %v1043_v0  ;;  %1069 = vmatpush1.bf16.msra.mxu1 %v1043_v0 }
  0x41   : > { %1046 = vmatprep.subr.bf16.mxu0 %v1045_v1  ;;  %1062 = vmatprep.subr.bf16.mxu1 %v1045_v1 }
  0x44   : > { %1048 = vmatpush1.bf16.msra.mxu0 %v1047_v6  ;;  %1070 = vmatpush1.bf16.msra.mxu1 %v1047_v6 }
  0x45   : > { %1050 = vmatprep.subr.bf16.mxu0 %v1049_v7  ;;  %1063 = vmatprep.subr.bf16.mxu1 %v1049_v7 }
  0x48   : > { %1052 = vmatpush1.bf16.msra.mxu0 %v1051_v12  ;;  %1071 = vmatpush1.bf16.msra.mxu1 %v1051_v12 }
  0x49   : > { %1054 = vmatprep.subr.bf16.mxu0 %v1053_v13  ;;  %1064 = vmatprep.subr.bf16.mxu1 %v1053_v13 }
  0x4c   : > { %1056 = vmatpush1.bf16.msra.mxu0 %v1055_v16  ;;  %1072 = vmatpush1.bf16.msra.mxu1 %v1055_v16 }
  0x4f   : > { %510 = vmatmul.mubr.f32.vlgmr.msra.gmra.mrb[0].mxu0 %v397_v17  ;;  %558 = vmatmul.mubr.f32.vlgmr.msra.gmra.mrb[0].mxu1 %v405_v18 }
  0x50   : > { %515 = vmatprep.mubr.f32.mxu0 %v1154_v32  ;;  %563 = vmatprep.mubr.f32.mxu1 %v1154_v32 }
  0x53   : > { %516 = vmatmul.mubr.f32.gmra.mrb[2].mxu0 %v398_v19  ;;  %564 = vmatmul.mubr.f32.gmra.mrb[2].mxu1 %v406_v20 }
  0x54   : > { %521 = vmatprep.mubr.f32.mxu0 %v1154_v32  ;;  %569 = vmatprep.mubr.f32.mxu1 %v1154_v32 }
  0x57   : > { %522 = vmatmul.mubr.f32.gmra.mrb[4].mxu0 %v399_v21  ;;  %570 = vmatmul.mubr.f32.gmra.mrb[4].mxu1 %v407_v22 }
  0x58   : > { %527 = vmatprep.mubr.f32.mxu0 %v1154_v32  ;;  %575 = vmatprep.mubr.f32.mxu1 %v1154_v32 }
  0x5b   : > { %528 = vmatmul.mubr.f32.gmra.mrb[6].mxu0 %v400_v23  ;;  %576 = vmatmul.mubr.f32.gmra.mrb[6].mxu1 %v408_v24 }
  0x5c   : > { %533 = vmatprep.mubr.f32.mxu0 %v1154_v32  ;;  %581 = vmatprep.mubr.f32.mxu1 %v1154_v32 }
  0x5f   : > { %534 = vmatmul.mubr.f32.gmra.mrb[8].mxu0 %v401_v25  ;;  %582 = vmatmul.mubr.f32.gmra.mrb[8].mxu1 %v409_v26 }
  0x60   : > { %539 = vmatprep.mubr.f32.mxu0 %v1154_v32  ;;  %587 = vmatprep.mubr.f32.mxu1 %v1154_v32 }
  0x63   : > { %540 = vmatmul.mubr.f32.gmra.mrb[10].mxu0 %v402_v27  ;;  %588 = vmatmul.mubr.f32.gmra.mrb[10].mxu1 %v410_v28 }
  0x64   : > { %545 = vmatprep.mubr.f32.mxu0 %v1154_v32  ;;  %593 = vmatprep.mubr.f32.mxu1 %v1154_v32 }
  0x67   : > { %546 = vmatmul.mubr.f32.gmra.mrb[12].mxu0 %v403_v29  ;;  %594 = vmatmul.mubr.f32.gmra.mrb[12].mxu1 %v411_v30 }
  0x68   : > { %551 = vmatprep.mubr.f32.mxu0 %v1154_v32  ;;  %599 = vmatprep.mubr.f32.mxu1 %v1154_v32  ;;  %v709_v32 = vsub.s32 0, %v708_v35 }
  0x6a   : > { %v1399_v38 = vrot.slane %v705_v36, %v709_v32 }
  0x6b   : > { %552 = vmatmul.mubr.f32.gmra.mrb[14].mxu0 %v404_v31  ;;  %600 = vmatmul.mubr.f32.gmra.mrb[14].mxu1 %v412_v33 }
 0x122   : > { %v511_v40 = vpop.f32.mrb[0].mxu0  ;;  %v559_v41 = vpop.f32.mrb[0].mxu1 }
 0x123   : > { %v717_v42 = vadd.f32 %v1399_v38, %v511_v40  ;;  %v733_v43 = vadd.f32 %v1399_v38, %v559_v41  ;;  %v513_v44 = vpop.f32.mrb[1].mxu0  ;;  %v561_v45 = vpop.f32.mrb[1].mxu1 }
 0x124   : > { %v718_v46 = vadd.f32 %v1401_v39, %v513_v44  ;;  %v734_v47 = vadd.f32 %v1401_v39, %v561_v45 }
 0x125   : > { %v749_v48 = vmax.f32 %v717_v42, 0.0  ;;  %v765_v49 = vmax.f32 %v733_v43, 0.0 }
 0x126   : > { %v750_v50 = vmax.f32 %v718_v46, 0.0  ;;  %v766_v51 = vmax.f32 %v734_v47, 0.0  ;;  %v517_v52 = vpop.f32.mrb[2].mxu0  ;;  %v565_v53 = vpop.f32.mrb[2].mxu1 }
 0x127   : > { %781 = vst [vmem:[%s1408_s30] sm:$0xff] %v749_v48  ;;  %797 = vst [vmem:[%s1408_s30 + $0x80] sm:$0xff] %v765_v49  ;;  %v719_v54 = vadd.f32 %v1399_v38, %v517_v52  ;;  %v735_v55 = vadd.f32 %v1399_v38, %v565_v53  ;;  %v519_v56 = vpop.f32.mrb[3].mxu0  ;;  %v567_v57 = vpop.f32.mrb[3].mxu1 }
 0x128   : > { %782 = vst [vmem:[%s1408_s30 + $0x8] sm:$0xff] %v750_v50  ;;  %798 = vst [vmem:[%s1408_s30 + $0x88] sm:$0xff] %v766_v51  ;;  %v720_v58 = vadd.f32 %v1401_v39, %v519_v56  ;;  %v736_v59 = vadd.f32 %v1401_v39, %v567_v57 }
 0x129   : > { %v751_v60 = vmax.f32 %v719_v54, 0.0  ;;  %v767_v61 = vmax.f32 %v735_v55, 0.0 }
 0x12a   : > { %v752_v62 = vmax.f32 %v720_v58, 0.0  ;;  %v768_v63 = vmax.f32 %v736_v59, 0.0  ;;  %v523_v0 = vpop.f32.mrb[4].mxu0  ;;  %v571_v1 = vpop.f32.mrb[4].mxu1 }
 0x12b   : > { %783 = vst [vmem:[%s1408_s30 + $0x10] sm:$0xff] %v751_v60  ;;  %799 = vst [vmem:[%s1408_s30 + $0x90] sm:$0xff] %v767_v61  ;;  %v721_v2 = vadd.f32 %v1399_v38, %v523_v0  ;;  %v737_v3 = vadd.f32 %v1399_v38, %v571_v1  ;;  %v525_v4 = vpop.f32.mrb[5].mxu0  ;;  %v573_v5 = vpop.f32.mrb[5].mxu1 }
 0x12c   : > { %784 = vst [vmem:[%s1408_s30 + $0x18] sm:$0xff] %v752_v62  ;;  %800 = vst [vmem:[%s1408_s30 + $0x98] sm:$0xff] %v768_v63  ;;  %v722_v6 = vadd.f32 %v1401_v39, %v525_v4  ;;  %v738_v7 = vadd.f32 %v1401_v39, %v573_v5 }
 0x12d   : > { %v753_v8 = vmax.f32 %v721_v2, 0.0  ;;  %v769_v9 = vmax.f32 %v737_v3, 0.0 }
 0x12e   : > { %v754_v10 = vmax.f32 %v722_v6, 0.0  ;;  %v770_v11 = vmax.f32 %v738_v7, 0.0  ;;  %v529_v12 = vpop.f32.mrb[6].mxu0  ;;  %v577_v13 = vpop.f32.mrb[6].mxu1 }
 0x12f   : > { %785 = vst [vmem:[%s1408_s30 + $0x20] sm:$0xff] %v753_v8  ;;  %801 = vst [vmem:[%s1408_s30 + $0xa0] sm:$0xff] %v769_v9  ;;  %v723_v14 = vadd.f32 %v1399_v38, %v529_v12  ;;  %v739_v15 = vadd.f32 %v1399_v38, %v577_v13  ;;  %v531_v16 = vpop.f32.mrb[7].mxu0  ;;  %v579_v17 = vpop.f32.mrb[7].mxu1 }
 0x130   : > { %786 = vst [vmem:[%s1408_s30 + $0x28] sm:$0xff] %v754_v10  ;;  %802 = vst [vmem:[%s1408_s30 + $0xa8] sm:$0xff] %v770_v11  ;;  %v724_v18 = vadd.f32 %v1401_v39, %v531_v16  ;;  %v740_v19 = vadd.f32 %v1401_v39, %v579_v17 }
 0x131   : > { %v755_v20 = vmax.f32 %v723_v14, 0.0  ;;  %v771_v21 = vmax.f32 %v739_v15, 0.0 }
 0x132   : > { %v756_v22 = vmax.f32 %v724_v18, 0.0  ;;  %v772_v23 = vmax.f32 %v740_v19, 0.0  ;;  %v535_v24 = vpop.f32.mrb[8].mxu0  ;;  %v583_v25 = vpop.f32.mrb[8].mxu1  ;;  %v842_v10 = vld [vmem:[%s1408_s30 + $0x10] sm:$0xff] (%p1210_p6) }
 0x133   : > { %787 = vst [vmem:[%s1408_s30 + $0x30] sm:$0xff] %v755_v20  ;;  %803 = vst [vmem:[%s1408_s30 + $0xb0] sm:$0xff] %v771_v21  ;;  %v725_v26 = vadd.f32 %v1399_v38, %v535_v24  ;;  %v741_v27 = vadd.f32 %v1399_v38, %v583_v25  ;;  %v537_v28 = vpop.f32.mrb[9].mxu0  ;;  %v585_v29 = vpop.f32.mrb[9].mxu1  ;;  %v844_v11 = vld [vmem:[%s1408_s30 + $0x18] sm:$0xff] (%p1210_p6)  ;;  %v870_v24 = vld [vmem:[%s1408_s30 + $0x80] sm:$0xff] (%p1210_p6) }
 0x134   : > { %788 = vst [vmem:[%s1408_s30 + $0x38] sm:$0xff] %v756_v22  ;;  %804 = vst [vmem:[%s1408_s30 + $0xb8] sm:$0xff] %v772_v23  ;;  %v726_v30 = vadd.f32 %v1401_v39, %v537_v28  ;;  %v742_v31 = vadd.f32 %v1401_v39, %v585_v29  ;;  %v872_v25 = vld [vmem:[%s1408_s30 + $0x88] sm:$0xff] (%p1210_p6) }
 0x135   : > { %v757_v33 = vmax.f32 %v725_v26, 0.0  ;;  %v773_v34 = vmax.f32 %v741_v27, 0.0  ;;  %843 = vst [vmem:[%s1479_s7 + $0x20] sm:$0xff] (%p1210_p6), %v842_v10  ;;  %845 = vst [vmem:[%s1479_s7 + $0x28] sm:$0xff] (%p1210_p6), %v844_v11  ;;  %v874_v26 = vld [vmem:[%s1408_s30 + $0x90] sm:$0xff] (%p1210_p6)  ;;  %v876_v27 = vld [vmem:[%s1408_s30 + $0x98] sm:$0xff] (%p1210_p6) }
 0x136   : > { %v758_v35 = vmax.f32 %v726_v30, 0.0  ;;  %v774_v32 = vmax.f32 %v742_v31, 0.0  ;;  %v541_v36 = vpop.f32.mrb[10].mxu0  ;;  %v589_v37 = vpop.f32.mrb[10].mxu1  ;;  %v846_v12 = vld [vmem:[%s1408_s30 + $0x20] sm:$0xff] (%p1210_p6)  ;;  %871 = vst [vmem:[%s1479_s7 + $0x100] sm:$0xff] (%p1210_p6), %v870_v24 }
 0x137   : > { %789 = vst [vmem:[%s1408_s30 + $0x40] sm:$0xff] %v757_v33  ;;  %805 = vst [vmem:[%s1408_s30 + $0xc0] sm:$0xff] %v773_v34  ;;  %v727_v40 = vadd.f32 %v1399_v38, %v541_v36  ;;  %v743_v41 = vadd.f32 %v1399_v38, %v589_v37  ;;  %v543_v42 = vpop.f32.mrb[11].mxu0  ;;  %v591_v43 = vpop.f32.mrb[11].mxu1  ;;  %v848_v13 = vld [vmem:[%s1408_s30 + $0x28] sm:$0xff] (%p1210_p6)  ;;  %v878_v28 = vld [vmem:[%s1408_s30 + $0xa0] sm:$0xff] (%p1210_p6) }
 0x138   : > { %790 = vst [vmem:[%s1408_s30 + $0x48] sm:$0xff] %v758_v35  ;;  %806 = vst [vmem:[%s1408_s30 + $0xc8] sm:$0xff] %v774_v32  ;;  %v728_v44 = vadd.f32 %v1401_v39, %v543_v42  ;;  %v744_v45 = vadd.f32 %v1401_v39, %v591_v43  ;;  %v880_v29 = vld [vmem:[%s1408_s30 + $0xa8] sm:$0xff] (%p1210_p6) }
 0x139   : > { %v759_v46 = vmax.f32 %v727_v40, 0.0  ;;  %v775_v47 = vmax.f32 %v743_v41, 0.0  ;;  %847 = vst [vmem:[%s1479_s7 + $0x40] sm:$0xff] (%p1210_p6), %v846_v12  ;;  %849 = vst [vmem:[%s1479_s7 + $0x48] sm:$0xff] (%p1210_p6), %v848_v13 }
 0x13a   : > { %v760_v48 = vmax.f32 %v728_v44, 0.0  ;;  %v776_v49 = vmax.f32 %v744_v45, 0.0  ;;  %v547_v50 = vpop.f32.mrb[12].mxu0  ;;  %v595_v51 = vpop.f32.mrb[12].mxu1  ;;  %v850_v14 = vld [vmem:[%s1408_s30 + $0x30] sm:$0xff] (%p1210_p6)  ;;  %873 = vst [vmem:[%s1479_s7 + $0x108] sm:$0xff] (%p1210_p6), %v872_v25 }
 0x13b   : > { %791 = vst [vmem:[%s1408_s30 + $0x50] sm:$0xff] %v759_v46  ;;  %807 = vst [vmem:[%s1408_s30 + $0xd0] sm:$0xff] %v775_v47  ;;  %v729_v52 = vadd.f32 %v1399_v38, %v547_v50  ;;  %v745_v53 = vadd.f32 %v1399_v38, %v595_v51  ;;  %v549_v54 = vpop.f32.mrb[13].mxu0  ;;  %v597_v55 = vpop.f32.mrb[13].mxu1  ;;  %v852_v15 = vld [vmem:[%s1408_s30 + $0x38] sm:$0xff] (%p1210_p6)  ;;  %v882_v30 = vld [vmem:[%s1408_s30 + $0xb0] sm:$0xff] (%p1210_p6) }
 0x13c   : > { %792 = vst [vmem:[%s1408_s30 + $0x58] sm:$0xff] %v760_v48  ;;  %808 = vst [vmem:[%s1408_s30 + $0xd8] sm:$0xff] %v776_v49  ;;  %v730_v56 = vadd.f32 %v1401_v39, %v549_v54  ;;  %v746_v57 = vadd.f32 %v1401_v39, %v597_v55  ;;  %v884_v31 = vld [vmem:[%s1408_s30 + $0xb8] sm:$0xff] (%p1210_p6) }
 0x13d   : > { %v761_v58 = vmax.f32 %v729_v52, 0.0  ;;  %v777_v59 = vmax.f32 %v745_v53, 0.0  ;;  %851 = vst [vmem:[%s1479_s7 + $0x60] sm:$0xff] (%p1210_p6), %v850_v14  ;;  %853 = vst [vmem:[%s1479_s7 + $0x68] sm:$0xff] (%p1210_p6), %v852_v15 }
 0x13e   : > { %v762_v60 = vmax.f32 %v730_v56, 0.0  ;;  %v778_v61 = vmax.f32 %v746_v57, 0.0  ;;  %v553_v62 = vpop.f32.mrb[14].mxu0  ;;  %v601_v63 = vpop.f32.mrb[14].mxu1  ;;  %819 = sbr.rel (!%p1210_p6) target bundleno = 335 (0x14f), region = 67  ;;  %v854_v16 = vld [vmem:[%s1408_s30 + $0x40] sm:$0xff] (%p1210_p6) }
 0x13f   : > { %793 = vst [vmem:[%s1408_s30 + $0x60] sm:$0xff] %v761_v58  ;;  %809 = vst [vmem:[%s1408_s30 + $0xe0] sm:$0xff] %v777_v59  ;;  %v731_v0 = vadd.f32 %v1399_v38, %v553_v62  ;;  %v747_v1 = vadd.f32 %v1399_v38, %v601_v63  ;;  %v555_v2 = vpop.f32.mrb[15].mxu0  ;;  %v603_v3 = vpop.f32.mrb[15].mxu1  ;;  %v838_v38 = vld [vmem:[%s1408_s30] sm:$0xff] (%p1210_p6)  ;;  %v856_v17 = vld [vmem:[%s1408_s30 + $0x48] sm:$0xff] (%p1210_p6) }
 0x140   : > { %794 = vst [vmem:[%s1408_s30 + $0x68] sm:$0xff] %v762_v60  ;;  %810 = vst [vmem:[%s1408_s30 + $0xe8] sm:$0xff] %v778_v61  ;;  %v732_v4 = vadd.f32 %v1401_v39, %v555_v2  ;;  %v748_v5 = vadd.f32 %v1401_v39, %v603_v3  ;;  %v840_v39 = vld [vmem:[%s1408_s30 + $0x8] sm:$0xff] (%p1210_p6)  ;;  %v886_v33 = vld [vmem:[%s1408_s30 + $0xc0] sm:$0xff] (%p1210_p6) }
 0x141   : > { %v763_v6 = vmax.f32 %v731_v0, 0.0  ;;  %v779_v7 = vmax.f32 %v747_v1, 0.0  ;;  %839 = vst [vmem:[%s1479_s7] sm:$0xff] (%p1210_p6), %v838_v38  ;;  %841 = vst [vmem:[%s1479_s7 + $0x8] sm:$0xff] (%p1210_p6), %v840_v39  ;;  %v888_v34 = vld [vmem:[%s1408_s30 + $0xc8] sm:$0xff] (%p1210_p6) }
 0x142   : > { %v764_v8 = vmax.f32 %v732_v4, 0.0  ;;  %v780_v9 = vmax.f32 %v748_v5, 0.0  ;;  %855 = vst [vmem:[%s1479_s7 + $0x80] sm:$0xff] (%p1210_p6), %v854_v16  ;;  %v858_v18 = vld [vmem:[%s1408_s30 + $0x50] sm:$0xff] (%p1210_p6)  ;;  %857 = vst [vmem:[%s1479_s7 + $0x88] sm:$0xff] (%p1210_p6), %v856_v17 }
 0x143   : > { %795 = vst [vmem:[%s1408_s30 + $0x70] sm:$0xff] %v763_v6  ;;  %811 = vst [vmem:[%s1408_s30 + $0xf0] sm:$0xff] %v779_v7  ;;  %v860_v19 = vld [vmem:[%s1408_s30 + $0x58] sm:$0xff] (%p1210_p6)  ;;  %v890_v35 = vld [vmem:[%s1408_s30 + $0xd0] sm:$0xff] (%p1210_p6) }
 0x144   : > { %796 = vst [vmem:[%s1408_s30 + $0x78] sm:$0xff] %v764_v8  ;;  %812 = vst [vmem:[%s1408_s30 + $0xf8] sm:$0xff] %v780_v9  ;;  %v892_v32 = vld [vmem:[%s1408_s30 + $0xd8] sm:$0xff] (%p1210_p6) }
 0x145   : > { %859 = vst [vmem:[%s1479_s7 + $0xa0] sm:$0xff] %v858_v18  ;;  %861 = vst [vmem:[%s1479_s7 + $0xa8] sm:$0xff] %v860_v19 }
 0x146   : > { %v862_v20 = vld [vmem:[%s1408_s30 + $0x60] sm:$0xff]  ;;  %875 = vst [vmem:[%s1479_s7 + $0x120] sm:$0xff] %v874_v26  ;;  %877 = vst [vmem:[%s1479_s7 + $0x128] sm:$0xff] %v876_v27 }
 0x147   : > { %v864_v21 = vld [vmem:[%s1408_s30 + $0x68] sm:$0xff]  ;;  %863 = vst [vmem:[%s1479_s7 + $0xc0] sm:$0xff] %v862_v20  ;;  %879 = vst [vmem:[%s1479_s7 + $0x140] sm:$0xff] %v878_v28  ;;  %v894_v36 = vld [vmem:[%s1408_s30 + $0xe0] sm:$0xff] }
 0x148   : > { %865 = vst [vmem:[%s1479_s7 + $0xc8] sm:$0xff] %v864_v21  ;;  %881 = vst [vmem:[%s1479_s7 + $0x148] sm:$0xff] %v880_v29  ;;  %v896_v37 = vld [vmem:[%s1408_s30 + $0xe8] sm:$0xff] }
 0x149   : > { %883 = vst [vmem:[%s1479_s7 + $0x160] sm:$0xff] %v882_v30  ;;  %885 = vst [vmem:[%s1479_s7 + $0x168] sm:$0xff] %v884_v31 }
 0x14a   : > { %v866_v22 = vld [vmem:[%s1408_s30 + $0x70] sm:$0xff]  ;;  %887 = vst [vmem:[%s1479_s7 + $0x180] sm:$0xff] %v886_v33  ;;  %889 = vst [vmem:[%s1479_s7 + $0x188] sm:$0xff] %v888_v34 }
 0x14b   : > { %867 = vst [vmem:[%s1479_s7 + $0xe0] sm:$0xff] %v866_v22  ;;  %v868_v23 = vld [vmem:[%s1408_s30 + $0x78] sm:$0xff]  ;;  %891 = vst [vmem:[%s1479_s7 + $0x1a0] sm:$0xff] %v890_v35  ;;  %v898_v40 = vld [vmem:[%s1408_s30 + $0xf0] sm:$0xff] }
 0x14c   : > { %869 = vst [vmem:[%s1479_s7 + $0xe8] sm:$0xff] %v868_v23  ;;  %893 = vst [vmem:[%s1479_s7 + $0x1a8] sm:$0xff] %v892_v32  ;;  %v900_v41 = vld [vmem:[%s1408_s30 + $0xf8] sm:$0xff] }
 0x14d   : > { %895 = vst [vmem:[%s1479_s7 + $0x1c0] sm:$0xff] %v894_v36  ;;  %897 = vst [vmem:[%s1479_s7 + $0x1c8] sm:$0xff] %v896_v37 }
 0x14e   : > { %899 = vst [vmem:[%s1479_s7 + $0x1e0] sm:$0xff] %v898_v40  ;;  %901 = vst [vmem:[%s1479_s7 + $0x1e8] sm:$0xff] %v900_v41 }
 0x14f PF: > { %s13_s16 = sadd.s32 1, %s1152_s16   ;;  %s1562_s12 = smov %s1140_s13 }
 0x150   : > { %p10_p12 = scmp.ge.s32.totalorder %s13_s16, 4   ;;  %s1563_s13 = smov %s1215_s22 }
 0x151   : > { %s1564_s14 = smov %s1148_s15  ;;  %s1565_s15 = smov %s1567_s17 }
 0x152   :  { %12 = sbr.rel (!%p10_p12) target bundleno = 3 (0x3), region = 127 }

// kernel: decoder_block_forward.4
= control target key start
LH: loop header
LB: loop body
LE: loop exit
PB: predicated region body
PF: predicated region fallthrough
CT: control target
= control target key end

     0   :  { %s4974_s17 = smov 0   ;;  %s6063_s0 = inlined_call_operand.vmem [shape: f32[2,64,128], index: 0, kind: input, shape index: {}, may-alias: {0,1,2,3}]   ;;  %s6064_s1 = inlined_call_operand.vmem [shape: f32[2,64,128], index: 1, kind: input, shape index: {}, may-alias: {0,1,2,3}]   ;;  %s6065_s2 = inlined_call_operand.vmem [shape: f32[2,64,128], index: 2, kind: input, shape index: {}, may-alias: {0,1,2,3}]   ;;  %s6066_s3 = inlined_call_operand.vmem [shape: f32[2,64,128], index: 3, kind: input, shape index: {}, may-alias: {0,1,2,3}]   ;;  %s6067_s4 = inlined_call_operand.vmem [shape: f32[64,64], index: 4, kind: input, shape index: {}]   ;;  %s6068_s5 = inlined_call_operand.vmem [shape: f32[3,128,128], index: 5, kind: input, shape index: {}]   ;;  %s6069_s6 = inlined_call_operand.vmem [shape: f32[3,1,128], index: 6, kind: input, shape index: {}]   ;;  %s6070_s7 = inlined_call_operand.vmem [shape: f32[128,128], index: 7, kind: input, shape index: {}]   ;;  %s6071_s8 = inlined_call_operand.vmem [shape: f32[1,128], index: 8, kind: input, shape index: {}]   ;;  %s6072_s9 = inlined_call_operand.vmem [shape: f32[1,128], index: 9, kind: input, shape index: {}]   ;;  %s6073_s10 = inlined_call_operand.vmem [shape: f32[1,128], index: 10, kind: input, shape index: {}]   ;;  %s6074_s11 = inlined_call_operand.vmem [shape: f32[2,64,128], index: 11, kind: output, shape index: {}]  }
   0x1 LB: > { %s3434_s18 = sadd.s32 4294967295, %s4909_s17   ;;  %p3438_p0 = scmp.ge.s32.totalorder %s4909_s17, 1  ;;  %s4909_s17 = sphi %s4974_s17, %s21_s17  }
   0x2   : > { %p367_p1 = scmp.lt.s32.totalorder %s4909_s17, 3 }
   0x4   : > { %p368_p2 = pnand %p3438_p0, %p367_p1 }
   0x6   : > { %371 = sbr.rel (%p368_p2) target bundleno = 2765 (0xacd), region = 64 }
   0xd   : > { %v3450_v0 = vld [vmem:[%s6068_s5 + $0x80] sm:$0xff]  ;;  %v3451_v1 = vld [vmem:[%s6068_s5 + $0x88] sm:$0xff]  ;;  %v3452_v2 = vld [vmem:[%s6068_s5 + $0x90] sm:$0xff]  ;;  %p422_p3 = scmp.lt.s32.totalorder %s3434_s18, 1  ;;  %vm883_vm0 = vcmask 261120   ;;  %vm1053_vm2 = vcmask 523264  }
   0xe   : > { %v4340_v3 = vpack.c.bf16 %v3451_v1, %v3450_v0  ;;  %v3453_v4 = vld [vmem:[%s6068_s5 + $0x98] sm:$0xff]  ;;  %v3454_v6 = vld [vmem:[%s6068_s5 + $0xa0] sm:$0xff]  ;;  %v3455_v7 = vld [vmem:[%s6068_s5 + $0xa8] sm:$0xff]  ;;  %s4911_s13 = smov 96   ;;  %s4912_s14 = smov 64  }
   0xf   : > { %v4344_v5 = vpack.c.bf16 %v3453_v4, %v3452_v2  ;;  %s6082_s18 = smov (!%p422_p3, %s3434_s18), 1  ;;  %v4348_v8 = vpack.c.bf16 %v3455_v7, %v3454_v6  ;;  %v3456_v9 = vld [vmem:[%s6068_s5 + $0xb0] sm:$0xff]  ;;  %v471_v10 = vld [vmem:[%s6068_s5] sm:$0xff]  ;;  %v472_v11 = vld [vmem:[%s6068_s5 + $0x8] sm:$0xff]  ;;  %s4913_s15 = smov 32  }
  0x10   : > { %4341 = vmatprep.subr.bf16.mxu1 %v4340_v3  ;;  %s5000_s12 = sshll.u32 %s6082_s18, 6  ;;  %v3457_v12 = vld [vmem:[%s6068_s5 + $0xb8] sm:$0xff]  ;;  %v4308_v14 = vpack.c.bf16 %v472_v11, %v471_v10  ;;  %v473_v15 = vld [vmem:[%s6068_s5 + $0x10] sm:$0xff]  ;;  %v475_v18 = vld [vmem:[%s6068_s5 + $0x20] sm:$0xff] }
  0x11   : > { %4343 = vmatpush3.bf16.msra.mxu1 %v4340_v3  ;;  %s5009_s19 = scalar_lea.vmem %s6064_s1, %s5000_s12  ;;  %v474_v16 = vld [vmem:[%s6068_s5 + $0x18] sm:$0xff]  ;;  %v476_v19 = vld [vmem:[%s6068_s5 + $0x28] sm:$0xff]  ;;  %v4352_v20 = vpack.c.bf16 %v3457_v12, %v3456_v9  ;;  %v3458_v21 = vld [vmem:[%s6068_s5 + $0xc0] sm:$0xff]  ;;  %s5043_s23 = scalar_lea.vmem %s6063_s0, %s5000_s12 }
  0x12   : > { %4345 = vmatprep.subr.bf16.mxu1 %v4344_v5  ;;  %v455_v13 = vld [vmem:[%s5009_s19] sm:$0xff]  ;;  %4309 = vmatprep.subr.bf16.mxu0 %v4308_v14  ;;  %v4312_v17 = vpack.c.bf16 %v474_v16, %v473_v15  ;;  %v3459_v22 = vld [vmem:[%s6068_s5 + $0xc8] sm:$0xff]  ;;  %v4316_v23 = vpack.c.bf16 %v476_v19, %v475_v18  ;;  %v477_v24 = vld [vmem:[%s6068_s5 + $0x30] sm:$0xff]  ;;  %s5198_s27 = scalar_lea.vmem %s6065_s2, %s5000_s12  ;;  %s5987_s16 = scalar_lea.vmem %s6066_s3, %s5000_s12 }
  0x13   : > { %3948 = vmatprep.mubr.f32.mxu1 %v455_v13  ;;  %4311 = vmatpush3.bf16.msra.mxu0 %v4308_v14  ;;  %v478_v25 = vld [vmem:[%s6068_s5 + $0x38] sm:$0xff]  ;;  %v4356_v26 = vpack.c.bf16 %v3459_v22, %v3458_v21  ;;  %v447_v27 = vld [vmem:[%s5043_s23] sm:$0xff]  ;;  %v3460_v28 = vld [vmem:[%s6068_s5 + $0xd0] sm:$0xff] }
  0x14   : > { %4313 = vmatprep.subr.bf16.mxu0 %v4312_v17  ;;  %v3461_v29 = vld [vmem:[%s6068_s5 + $0xd8] sm:$0xff]  ;;  %v4320_v30 = vpack.c.bf16 %v478_v25, %v477_v24  ;;  %3904 = vmatprep.mubr.f32.mxu0 %v447_v27  ;;  %v479_v31 = vld [vmem:[%s6068_s5 + $0x40] sm:$0xff]  ;;  %v480_v32 = vld [vmem:[%s6068_s5 + $0x48] sm:$0xff] }
  0x15   : > { %4347 = vmatpush3.bf16.msra.mxu1 %v4344_v5  ;;  %v4360_v33 = vpack.c.bf16 %v3461_v29, %v3460_v28  ;;  %v3462_v34 = vld [vmem:[%s6068_s5 + $0xe0] sm:$0xff]  ;;  %v3463_v35 = vld [vmem:[%s6068_s5 + $0xe8] sm:$0xff]  ;;  %v4324_v36 = vpack.c.bf16 %v480_v32, %v479_v31  ;;  %v481_v37 = vld [vmem:[%s6068_s5 + $0x50] sm:$0xff] }
  0x16   : > { %4349 = vmatprep.subr.bf16.mxu1 %v4348_v8  ;;  %v482_v38 = vld [vmem:[%s6068_s5 + $0x58] sm:$0xff]  ;;  %v4364_v39 = vpack.c.bf16 %v3463_v35, %v3462_v34  ;;  %v3464_v40 = vld [vmem:[%s6068_s5 + $0xf0] sm:$0xff]  ;;  %v483_v43 = vld [vmem:[%s6068_s5 + $0x60] sm:$0xff] }
  0x17   : > { %4315 = vmatpush3.bf16.msra.mxu0 %v4312_v17  ;;  %v3465_v41 = vld [vmem:[%s6068_s5 + $0xf8] sm:$0xff]  ;;  %v4328_v42 = vpack.c.bf16 %v482_v38, %v481_v37  ;;  %v484_v44 = vld [vmem:[%s6068_s5 + $0x68] sm:$0xff]  ;;  %v485_v47 = vld [vmem:[%s6068_s5 + $0x70] sm:$0xff] }
  0x18   : > { %4317 = vmatprep.subr.bf16.mxu0 %v4316_v23  ;;  %v4368_v45 = vpack.c.bf16 %v3465_v41, %v3464_v40  ;;  %v4332_v46 = vpack.c.bf16 %v484_v44, %v483_v43  ;;  %v486_v48 = vld [vmem:[%s6068_s5 + $0x78] sm:$0xff]  ;;  %v456_v50 = vld [vmem:[%s5009_s19 + $0x8] sm:$0xff]  ;;  %v457_v51 = vld [vmem:[%s5009_s19 + $0x10] sm:$0xff] }
  0x19   : > { %4351 = vmatpush3.bf16.msra.mxu1 %v4348_v8  ;;  %v4336_v49 = vpack.c.bf16 %v486_v48, %v485_v47  ;;  %v458_v52 = vld [vmem:[%s5009_s19 + $0x18] sm:$0xff]  ;;  %v459_v53 = vld [vmem:[%s5009_s19 + $0x20] sm:$0xff]  ;;  %v448_v54 = vld [vmem:[%s5043_s23 + $0x8] sm:$0xff] }
  0x1a   : > { %4353 = vmatprep.subr.bf16.mxu1 %v4352_v20  ;;  %v449_v55 = vld [vmem:[%s5043_s23 + $0x10] sm:$0xff]  ;;  %v460_v56 = vld [vmem:[%s5009_s19 + $0x28] sm:$0xff]  ;;  %v450_v58 = vld [vmem:[%s5043_s23 + $0x18] sm:$0xff] }
  0x1b   : > { %4319 = vmatpush3.bf16.msra.mxu0 %v4316_v23  ;;  %v461_v57 = vld [vmem:[%s5009_s19 + $0x30] sm:$0xff]  ;;  %v451_v59 = vld [vmem:[%s5043_s23 + $0x20] sm:$0xff]  ;;  %v462_v60 = vld [vmem:[%s5009_s19 + $0x38] sm:$0xff]  ;;  %s6044_s19 = scalar_lea.vmem %s6074_s11, %s5000_s12 }
  0x1c   : > { %4321 = vmatprep.subr.bf16.mxu0 %v4320_v30  ;;  %v452_v61 = vld [vmem:[%s5043_s23 + $0x28] sm:$0xff]  ;;  %v453_v62 = vld [vmem:[%s5043_s23 + $0x30] sm:$0xff]  ;;  %v454_v63 = vld [vmem:[%s5043_s23 + $0x38] sm:$0xff] }
  0x1d   : > { %4355 = vmatpush3.bf16.msra.mxu1 %v4352_v20  ;;  %v3467_v0 = vld [vmem:[%s6069_s6 + $0x1] ss:$0 sm:$0xff]  ;;  %vm5113_vm1 = vmpackc.low %vm883_vm0, %vm883_vm0  ;;  %v3449_v8 = vld [vmem:[%s6069_s6] ss:$0 sm:$0xff] }
  0x1e   : > { %4357 = vmatprep.subr.bf16.mxu1 %v4356_v26  ;;  %v3468_v43 = vld [vmem:[%s6068_s5 + $0x100] sm:$0xff]  ;;  %v3469_v44 = vld [vmem:[%s6068_s5 + $0x108] sm:$0xff]  ;;  %v3471_v47 = vld [vmem:[%s6068_s5 + $0x118] sm:$0xff] }
  0x1f   : > { %4323 = vmatpush3.bf16.msra.mxu0 %v4320_v30 }
  0x20   : > { %4325 = vmatprep.subr.bf16.mxu0 %v4324_v36 }
  0x21   : > { %4359 = vmatpush3.bf16.msra.mxu1 %v4356_v26 }
  0x22   : > { %4361 = vmatprep.subr.bf16.mxu1 %v4360_v33 }
  0x23   : > { %4327 = vmatpush3.bf16.msra.mxu0 %v4324_v36 }
  0x24   : > { %4329 = vmatprep.subr.bf16.mxu0 %v4328_v42 }
  0x25   : > { %4363 = vmatpush3.bf16.msra.mxu1 %v4360_v33 }
  0x26   : > { %4365 = vmatprep.subr.bf16.mxu1 %v4364_v39 }
  0x27   : > { %4331 = vmatpush3.bf16.msra.mxu0 %v4328_v42 }
  0x28   : > { %4333 = vmatprep.subr.bf16.mxu0 %v4332_v46 }
  0x29   : > { %4367 = vmatpush3.bf16.msra.mxu1 %v4364_v39 }
  0x2a   : > { %4369 = vmatprep.subr.bf16.mxu1 %v4368_v45 }
  0x2b   : > { %4335 = vmatpush3.bf16.msra.mxu0 %v4332_v46  ;;  %v4372_v46 = vpack.c.bf16 %v3469_v44, %v3468_v43  ;;  %v5266_v43 = vld [vmem:[%s6067_s4 + $0x20] sm:$0xff] }
  0x2c   : > { %4337 = vmatprep.subr.bf16.mxu0 %v4336_v49 }
  0x2d   : > { %4371 = vmatpush3.bf16.msra.mxu1 %v4368_v45  ;;  %v3470_v45 = vld [vmem:[%s6068_s5 + $0x110] sm:$0xff] }
  0x2e   : > { %v4376_v48 = vpack.c.bf16 %v3471_v47, %v3470_v45 }
  0x2f   : > { %4339 = vmatpush3.bf16.msra.mxu0 %v4336_v49  ;;  %v3472_v49 = vld [vmem:[%s6068_s5 + $0x120] sm:$0xff] }
  0x30   : > { %3949 = vmatmul.mubr.f32.vlgmr.msra.gmra.mrb[0].mxu1 %v456_v50  ;;  %v3473_v50 = vld [vmem:[%s6068_s5 + $0x128] sm:$0xff]  ;;  %4373 = vmatprep.subr.bf16.mxu0 %v4372_v46 }
  0x31   : > { %3951 = vmatprep.mubr.f32.mxu1 %v457_v51  ;;  %v4380_v51 = vpack.c.bf16 %v3473_v50, %v3472_v49 }
  0x32   : > { %3905 = vmatmul.mubr.f32.vlgmr.msra.gmra.mrb[0].mxu0 %v448_v54  ;;  %v3475_v54 = vld [vmem:[%s6068_s5 + $0x138] sm:$0xff] }
  0x33   : > { %3907 = vmatprep.mubr.f32.mxu0 %v449_v55  ;;  %4375 = vmatpush3.bf16.msra.mxu0 %v4372_v46 }
  0x34   : > { %3952 = vmatmul.mubr.f32.gmra.mrb[2].mxu1 %v458_v52  ;;  %4377 = vmatprep.subr.bf16.mxu0 %v4376_v48  ;;  %v463_v52 = vld [vmem:[%s5198_s27] sm:$0xff] }
  0x35   : > { %3954 = vmatprep.mubr.f32.mxu1 %v459_v53  ;;  %v3474_v53 = vld [vmem:[%s6068_s5 + $0x130] sm:$0xff] }
  0x36   : > { %3908 = vmatmul.mubr.f32.gmra.mrb[2].mxu0 %v450_v58  ;;  %v4384_v55 = vpack.c.bf16 %v3475_v54, %v3474_v53  ;;  %v5280_v53 = vld [vmem:[%s6067_s4 + $0x30] sm:$0xff] }
  0x37   : > { %3910 = vmatprep.mubr.f32.mxu0 %v451_v59  ;;  %4379 = vmatpush3.bf16.msra.mxu0 %v4376_v48  ;;  %v3478_v59 = vld [vmem:[%s6068_s5 + $0x150] sm:$0xff]  ;;  %v5273_v48 = vld [vmem:[%s6067_s4 + $0x28] sm:$0xff] }
  0x38   : > { %3955 = vmatmul.mubr.f32.gmra.mrb[4].mxu1 %v460_v56  ;;  %4381 = vmatprep.subr.bf16.mxu0 %v4380_v51  ;;  %v3476_v56 = vld [vmem:[%s6068_s5 + $0x140] sm:$0xff] }
  0x39   : > { %3957 = vmatprep.mubr.f32.mxu1 %v461_v57  ;;  %v3477_v57 = vld [vmem:[%s6068_s5 + $0x148] sm:$0xff] }
  0x3a   : > { %3911 = vmatmul.mubr.f32.gmra.mrb[4].mxu0 %v452_v61  ;;  %v4388_v58 = vpack.c.bf16 %v3477_v57, %v3476_v56 }
  0x3b   : > { %3913 = vmatprep.mubr.f32.mxu0 %v453_v62  ;;  %4383 = vmatpush3.bf16.msra.mxu0 %v4380_v51  ;;  %v3480_v62 = vld [vmem:[%s6068_s5 + $0x160] sm:$0xff] }
  0x3c   : > { %3958 = vmatmul.mubr.f32.gmra.mrb[6].mxu1 %v462_v60  ;;  %4385 = vmatprep.subr.bf16.mxu0 %v4384_v55  ;;  %v3479_v60 = vld [vmem:[%s6068_s5 + $0x158] sm:$0xff] }
  0x3d   : > { %v4392_v61 = vpack.c.bf16 %v3479_v60, %v3478_v59 }
  0x3e   : > { %3914 = vmatmul.mubr.f32.gmra.mrb[6].mxu0 %v454_v63  ;;  %v3481_v63 = vld [vmem:[%s6068_s5 + $0x168] sm:$0xff] }
  0x3f   : > { %3992 = vmatprep.mubr.f32.mxu0 %v463_v52  ;;  %4387 = vmatpush3.bf16.msra.mxu0 %v4384_v55 }
  0x40   : > { %4389 = vmatprep.subr.bf16.mxu0 %v4388_v58 }
  0x43   : > { %4391 = vmatpush3.bf16.msra.mxu0 %v4388_v58  ;;  %v5287_v58 = vld [vmem:[%s6067_s4 + $0x38] sm:$0xff] }
  0x44   : > { %4393 = vmatprep.subr.bf16.mxu0 %v4392_v61 }
  0x47   : > { %4395 = vmatpush3.bf16.msra.mxu0 %v4392_v61 }
 0x103   : > { %v3950_v1 = vpop.f32.mrb[0].mxu1 }
 0x104   : > { %v696_v2 = vadd.f32 %v3950_v1, %v3467_v0  ;;  %v690_v3 = vpop.f32.mrb[1].mxu1  ;;  %v3482_v1 = vld [vmem:[%s6068_s5 + $0x170] sm:$0xff] }
 0x105   : > { %v691_v4 = vadd.f32 %v3467_v0, %v690_v3  ;;  %v3906_v12 = vpop.f32.mrb[0].mxu0 }
 0x106   : > { %v560_v14 = vpop.f32.mrb[1].mxu0  ;;  %v5150_v37 = vadd.f32 %v3906_v12, %v3449_v8  ;;  %v470_v12 = vld [vmem:[%s5198_s27 + $0x38] sm:$0xff] }
 0x107   : > { %v4404_v6 = vpack.c.bf16 %v696_v2, %v691_v4  ;;  %v3953_v7 = vpop.f32.mrb[2].mxu1  ;;  %v5120_v9 = vpack.i.bf16 %v696_v2, %v691_v4  ;;  %v5126_v15 = vadd.f32 %v3449_v8, %v560_v14  ;;  %v3483_v2 = vld [vmem:[%s6068_s5 + $0x178] sm:$0xff]  ;;  %v464_v4 = vld [vmem:[%s5198_s27 + $0x8] sm:$0xff] }
 0x108   : > { %v706_v10 = vadd.f32 %v3953_v7, %v3467_v0  ;;  %v700_v11 = vpop.f32.mrb[3].mxu1  ;;  %v4400_v3 = vpack.c.bf16 %v3483_v2, %v3482_v1  ;;  %v466_v7 = vld [vmem:[%s5198_s27 + $0x18] sm:$0xff] }
 0x109   : > { %4406 = vmatprep.subr.msk.bf16.mxu1 %vm5113_vm1, %v4404_v6  ;;  %v701_v13 = vadd.f32 %v3467_v0, %v700_v11  ;;  %4020 = vmatprep.mubr.msk.f32.mxu1 %vm883_vm0, %v5126_v15  ;;  %v3909_v21 = vpop.f32.mrb[2].mxu0  ;;  %v469_v11 = vld [vmem:[%s5198_s27 + $0x30] sm:$0xff] }
 0x10a   : > { %4409 = vmatpush3.bf16.xpose.msk.msra.mxu1 %vm5113_vm1, %v4404_v6  ;;  %v570_v23 = vpop.f32.mrb[3].mxu0  ;;  %v5152_v38 = vadd.f32 %v3909_v21, %v3449_v8  ;;  %v465_v6 = vld [vmem:[%s5198_s27 + $0x10] sm:$0xff] }
 0x10b   : > { %v4410_v16 = vpack.c.bf16 %v706_v10, %v701_v13  ;;  %v3956_v17 = vpop.f32.mrb[4].mxu1  ;;  %v5128_v18 = vpack.i.bf16 %v706_v10, %v701_v13  ;;  %v5148_v36 = vadd.f32 %v3449_v8, %v570_v23  ;;  %v468_v10 = vld [vmem:[%s5198_s27 + $0x28] sm:$0xff] }
 0x10c   : > { %v716_v19 = vadd.f32 %v3956_v17, %v3467_v0  ;;  %v710_v20 = vpop.f32.mrb[5].mxu1 }
 0x10d   : > { %4412 = vmatprep.subr.msk.bf16.mxu1 %vm5113_vm1, %v4410_v16  ;;  %v711_v22 = vadd.f32 %v3467_v0, %v710_v20  ;;  %v3912_v29 = vpop.f32.mrb[4].mxu0  ;;  %v5246_v20 = vld [vmem:[%s6067_s4 + $0x8] sm:$0xff] }
 0x10e   : > { %v580_v31 = vpop.f32.mrb[5].mxu0  ;;  %v5160_v40 = vadd.f32 %v3912_v29, %v3449_v8 }
 0x10f   : > { %v4416_v24 = vpack.c.bf16 %v716_v19, %v711_v22  ;;  %v3959_v25 = vpop.f32.mrb[6].mxu1  ;;  %v5134_v26 = vpack.i.bf16 %v716_v19, %v711_v22  ;;  %v5158_v39 = vadd.f32 %v3449_v8, %v580_v31 }
 0x110   : > { %v726_v27 = vadd.f32 %v3959_v25, %v3467_v0  ;;  %v720_v28 = vpop.f32.mrb[7].mxu1  ;;  %v5252_v25 = vld [vmem:[%s6067_s4 + $0x10] sm:$0xff] }
 0x111   : > { %v721_v30 = vadd.f32 %v3467_v0, %v720_v28  ;;  %v3915_v34 = vpop.f32.mrb[6].mxu0  ;;  %v4396_v0 = vpack.c.bf16 %v3481_v63, %v3480_v62 }
 0x112   : > { %4415 = vmatpush3.bf16.xpose.msk.msra.mxu1 %vm5113_vm1, %v4410_v16  ;;  %v590_v35 = vpop.f32.mrb[7].mxu0  ;;  %v5168_v42 = vadd.f32 %v3915_v34, %v3449_v8  ;;  %v5241_v16 = vld [vmem:[%s6067_s4] sm:$0xff] }
 0x113   : > { %4418 = vmatprep.subr.msk.bf16.mxu1 %vm5113_vm1, %v4416_v24  ;;  %v4422_v32 = vpack.c.bf16 %v726_v27, %v721_v30  ;;  %v5140_v33 = vpack.i.bf16 %v726_v27, %v721_v30  ;;  %v5166_v41 = vadd.f32 %v3449_v8, %v590_v35  ;;  %4397 = vmatprep.subr.bf16.mxu0 %v4396_v0  ;;  %v467_v8 = vld [vmem:[%s5198_s27 + $0x20] sm:$0xff]  ;;  %v5259_v30 = vld [vmem:[%s6067_s4 + $0x18] sm:$0xff] }
 0x114   : > { %4399 = vmatpush3.bf16.msra.mxu0 %v4396_v0  ;;  %v5297_v0 = vld [vmem:[%s6069_s6 + $0x2] ss:$0 sm:$0xff] }
 0x115   : > { %4401 = vmatprep.subr.bf16.mxu0 %v4400_v3 }
 0x118   : > { %4403 = vmatpush3.bf16.msra.mxu0 %v4400_v3 }
 0x11a   : > { %4421 = vmatpush3.bf16.xpose.msk.msra.mxu1 %vm5113_vm1, %v4416_v24 }
 0x11b   : > { %4424 = vmatprep.subr.msk.bf16.mxu1 %vm5113_vm1, %v4422_v32  ;;  %3993 = vmatmul.mubr.f32.vlgmr.msra.gmra.mrb[8].mxu0 %v464_v4 }
 0x11c   : > { %3995 = vmatprep.mubr.f32.mxu0 %v465_v6 }
 0x11f   : > { %3996 = vmatmul.mubr.f32.gmra.mrb[10].mxu0 %v466_v7 }
 0x120   : > { %3998 = vmatprep.mubr.f32.mxu0 %v467_v8 }
 0x122   : > { %4427 = vmatpush3.bf16.xpose.msk.msra.mxu1 %vm5113_vm1, %v4422_v32 }
 0x123   : > { %3999 = vmatmul.mubr.f32.gmra.mrb[12].mxu0 %v468_v10 }
 0x124   : > { %4001 = vmatprep.mubr.f32.mxu0 %v469_v11 }
 0x127   : > { %4002 = vmatmul.mubr.f32.gmra.mrb[14].mxu0 %v470_v12 }
 0x129   : > { %4021 = vmatmul.mubr.msk.f32.vlgmr.msra.gmra.mrb[8].mxu1 %vm883_vm0, %v5150_v37 }
 0x12a   : > { %4023 = vmatprep.mubr.msk.f32.mxu1 %vm883_vm0, %v5148_v36 }
 0x12d   : > { %4024 = vmatmul.mubr.msk.f32.gmra.mrb[10].mxu1 %vm883_vm0, %v5152_v38 }
 0x12e   : > { %4026 = vmatprep.mubr.msk.f32.mxu1 %vm883_vm0, %v5158_v39 }
 0x131   : > { %4027 = vmatmul.mubr.msk.f32.gmra.mrb[12].mxu1 %vm883_vm0, %v5160_v40 }
 0x132   : > { %4029 = vmatprep.mubr.msk.f32.mxu1 %vm883_vm0, %v5166_v41 }
 0x135   : > { %4030 = vmatmul.mubr.msk.f32.gmra.mrb[14].mxu1 %vm883_vm0, %v5168_v42 }
 0x1ee   : > { %v3994_v1 = vpop.f32.mrb[8].mxu0 }
 0x1ef   : > { %v5300_v2 = vadd.f32 %v3994_v1, %v5297_v0  ;;  %v820_v3 = vpop.f32.mrb[9].mxu0 }
 0x1f0   : > { %v821_v4 = vadd.f32 %v5297_v0, %v820_v3 }
 0x1f2   : > { %v3997_v6 = vpop.f32.mrb[10].mxu0  ;;  %v4428_v7 = vpack.c.bf16 %v5300_v2, %v821_v4 }
 0x1f3   : > { %v830_v8 = vpop.f32.mrb[11].mxu0 }
 0x1f4   : > { %4429 = vmatprep.subr.bf16.mxu1 %v4428_v7 }
 0x1f5   : > { %4431 = vmatpush3.bf16.msra.mxu1 %v4428_v7 }
 0x1fc   : > { %v4022_v13 = vpop.f32.mrb[8].mxu1 }
 0x1fd   : > { %v998_v14 = vpop.f32.mrb[9].mxu1  ;;  %v1038_v17 = vmul.f32 0.17677669, %v4022_v13 }
 0x1fe   : > { %v1037_v19 = vmul.f32 0.17677669, %v998_v14 }
 0x1ff   : > { %v1046_v29 = vadd.f32 %v1038_v17, %v5246_v20 }
 0x200   : > { %v4025_v21 = vpop.f32.mrb[10].mxu1  ;;  %v1045_v22 = vadd.f32 %v1037_v19, %v5241_v16 }
 0x201   : > { %v1040_v23 = vmul.f32 0.17677669, %v4025_v21  ;;  %v1008_v24 = vpop.f32.mrb[11].mxu1  ;;  %v1057_v46 = vsel %vm1053_vm2, %v1046_v29, -inf }
 0x202   : > { %v1039_v27 = vmul.f32 0.17677669, %v1008_v24  ;;  %v1054_v28 = vsel %vm1053_vm2, %v1045_v22, -inf }
 0x203   : > { %1055 = vmax.xlane.f32.xlu0 %v1054_v28  ;;  %v1048_v35 = vadd.f32 %v1040_v23, %v5259_v30 }
 0x204   : > { %v4028_v31 = vpop.f32.mrb[12].mxu1  ;;  %v1047_v32 = vadd.f32 %v1039_v27, %v5252_v25 }
 0x205   : > { %v1018_v34 = vpop.f32.mrb[13].mxu1  ;;  %v1042_v44 = vmul.f32 0.17677669, %v4028_v31  ;;  %v1063_v52 = vsel %vm1053_vm2, %v1048_v35, -inf }
 0x206   : > { %v1041_v45 = vmul.f32 0.17677669, %v1018_v34  ;;  %v1060_v47 = vsel %vm1053_vm2, %v1047_v32, -inf }
 0x207   : > { %1058 = vmax.xlane.f32.xlu0 %v1057_v46  ;;  %1061 = vmax.xlane.f32.xlu1 %v1060_v47  ;;  %v1050_v57 = vadd.f32 %v1042_v44, %v5273_v48 }
 0x208   : > { %v4031_v49 = vpop.f32.mrb[14].mxu1  ;;  %v1049_v50 = vadd.f32 %v1041_v45, %v5266_v43 }
 0x209   : > { %v1028_v51 = vpop.f32.mrb[15].mxu1  ;;  %v1044_v54 = vmul.f32 0.17677669, %v4031_v49  ;;  %v1069_v60 = vsel %vm1053_vm2, %v1050_v57, -inf }
 0x20a   : > { %v1043_v55 = vmul.f32 0.17677669, %v1028_v51  ;;  %v1066_v56 = vsel %vm1053_vm2, %v1049_v50, -inf }
 0x20b   : > { %1064 = vmax.xlane.f32.xlu1 %v1063_v52  ;;  %1067 = vmax.xlane.f32.xlu0 %v1066_v56  ;;  %v1052_v62 = vadd.f32 %v1044_v54, %v5287_v58 }
 0x20c   : > { %v1051_v59 = vadd.f32 %v1043_v55, %v5280_v53 }
 0x20d   : > { %v1075_v63 = vsel %vm1053_vm2, %v1052_v62, -inf }
 0x20e   : > { %v1072_v61 = vsel %vm1053_vm2, %v1051_v59, -inf }
 0x20f   : > { %1070 = vmax.xlane.f32.xlu1 %v1069_v60  ;;  %1073 = vmax.xlane.f32.xlu0 %v1072_v61 }
 0x213   : > { %1076 = vmax.xlane.f32.xlu1 %v1075_v63 }
 0x290   : > { %v1056_v10 = vpop.xlane.xlu0 %1055 }
 0x291   : > { %v1078_v11 = vsub.f32 %v1045_v22, %v1056_v10  ;;  %v836_v10 = vadd.f32 %v3997_v6, %v5297_v0 }
 0x293   : > { %v1086_v12 = vmul.f32 1.442695, %v1078_v11  ;;  %v831_v11 = vadd.f32 %v5297_v0, %v830_v8 }
 0x294   : > { %v1059_v13 = vpop.xlane.xlu0 %1058  ;;  %v1062_v14 = vpop.xlane.xlu1 %1061 }
 0x295   : > { %4751 = vpow2.f32 %v1086_v12  ;;  %v1079_v17 = vsub.f32 %v1046_v29, %v1059_v13  ;;  %v1080_v19 = vsub.f32 %v1047_v32, %v1062_v14  ;;  %v5335_v12 = vpack.i.bf16 %v5300_v2, %v821_v4 }
 0x297   : > { %v1088_v21 = vmul.f32 1.442695, %v1079_v17  ;;  %v1090_v23 = vmul.f32 1.442695, %v1080_v19  ;;  %v4000_v17 = vpop.f32.mrb[12].mxu0  ;;  %v4432_v19 = vpack.c.bf16 %v836_v10, %v831_v11 }
 0x298   : > { %v1065_v24 = vpop.xlane.xlu1 %1064  ;;  %v1068_v27 = vpop.xlane.xlu0 %1067 }
 0x299   : > { %4753 = vpow2.f32 %v1088_v21  ;;  %v1081_v28 = vsub.f32 %v1048_v35, %v1065_v24  ;;  %v1082_v31 = vsub.f32 %v1049_v50, %v1068_v27  ;;  %v840_v21 = vpop.f32.mrb[13].mxu0  ;;  %v846_v24 = vadd.f32 %v4000_v17, %v5297_v0  ;;  %4433 = vmatprep.subr.bf16.mxu1 %v4432_v19 }
 0x29a   : > { %4755 = vpow2.f32 %v1090_v23  ;;  %v5341_v23 = vpack.i.bf16 %v836_v10, %v831_v11  ;;  %v841_v6 = vadd.f32 %v5297_v0, %v840_v21  ;;  %4435 = vmatpush3.bf16.msra.mxu1 %v4432_v19  ;;  %v4003_v8 = vpop.f32.mrb[14].mxu0 }
 0x29b   : > { %v1092_v34 = vmul.f32 1.442695, %v1081_v28  ;;  %v1094_v44 = vmul.f32 1.442695, %v1082_v31  ;;  %v850_v4 = vpop.f32.mrb[15].mxu0  ;;  %v856_v28 = vadd.f32 %v4003_v8, %v5297_v0 }
 0x29c   : > { %v1071_v45 = vpop.xlane.xlu1 %1070  ;;  %v1074_v46 = vpop.xlane.xlu0 %1073  ;;  %v4436_v2 = vpack.c.bf16 %v846_v24, %v841_v6  ;;  %v5345_v27 = vpack.i.bf16 %v846_v24, %v841_v6  ;;  %v851_v31 = vadd.f32 %v5297_v0, %v850_v4 }
 0x29d   : > { %4757 = vpow2.f32 %v1092_v34  ;;  %v1083_v22 = vsub.f32 %v1050_v57, %v1071_v45  ;;  %v1084_v47 = vsub.f32 %v1051_v59, %v1074_v46 }
 0x29e   : > { %4759 = vpow2.f32 %v1094_v44  ;;  %4437 = vmatprep.subr.bf16.mxu1 %v4436_v2  ;;  %v4440_v34 = vpack.c.bf16 %v856_v28, %v851_v31  ;;  %v5349_v44 = vpack.i.bf16 %v856_v28, %v851_v31 }
 0x29f   : > { %v5304_v49 = vpop.eup %4751  ;;  %v1096_v29 = vmul.f32 1.442695, %v1083_v22  ;;  %v1098_v32 = vmul.f32 1.442695, %v1084_v47  ;;  %4439 = vmatpush3.bf16.msra.mxu1 %v4436_v2 }
 0x2a0   : > { %v1077_v51 = vpop.xlane.xlu1 %1076  ;;  %v1102_v52 = vsel %vm1053_vm2, %v5304_v49, 0.0  ;;  %4441 = vmatprep.subr.bf16.mxu1 %v4440_v34 }
 0x2a1   : > { %4761 = vpow2.f32 %v1096_v29  ;;  %v1085_v35 = vsub.f32 %v1052_v62, %v1077_v51  ;;  %1103 = vadd.xlane.f32.xlu0 %v1102_v52 }
 0x2a2   : > { %4763 = vpow2.f32 %v1098_v32 }
 0x2a3   : > { %v5308_v50 = vpop.eup %4753  ;;  %v1100_v54 = vmul.f32 1.442695, %v1085_v35  ;;  %4443 = vmatpush3.bf16.msra.mxu1 %v4440_v34 }
 0x2a4   : > { %v5310_v55 = vpop.eup %4755  ;;  %v1105_v56 = vsel %vm1053_vm2, %v5308_v50, 0.0 }
 0x2a5   : > { %4765 = vpow2.f32 %v1100_v54  ;;  %1106 = vadd.xlane.f32.xlu1 %v1105_v56  ;;  %v1108_v57 = vsel %vm1053_vm2, %v5310_v55, 0.0 }
 0x2a6   : > { %1109 = vadd.xlane.f32.xlu0 %v1108_v57 }
 0x2a7   : > { %v5316_v59 = vpop.eup %4757 }
 0x2a8   : > { %v5318_v60 = vpop.eup %4759  ;;  %v1111_v61 = vsel %vm1053_vm2, %v5316_v59, 0.0 }
 0x2a9   : > { %1112 = vadd.xlane.f32.xlu1 %v1111_v61  ;;  %v1114_v62 = vsel %vm1053_vm2, %v5318_v60, 0.0 }
 0x2aa   : > { %1115 = vadd.xlane.f32.xlu0 %v1114_v62 }
 0x2ab   : > { %v5324_v63 = vpop.eup %4761 }
 0x2ac   : > { %v5326_v1 = vpop.eup %4763  ;;  %v1117_v3 = vsel %vm1053_vm2, %v5324_v63, 0.0 }
 0x2ad   : > { %1118 = vadd.xlane.f32.xlu1 %v1117_v3  ;;  %v1120_v7 = vsel %vm1053_vm2, %v5326_v1, 0.0 }
 0x2ae   : > { %1121 = vadd.xlane.f32.xlu0 %v1120_v7 }
 0x2af   : > { %v5337_v13 = vpop.eup %4765 }
 0x2b0   : > { %v1123_v14 = vsel %vm1053_vm2, %v5337_v13, 0.0 }
 0x2b1   : > { %1124 = vadd.xlane.f32.xlu1 %v1123_v14 }
 0x2c2   : > { %4637 = vrot.lane.b32.xlu1 %v5128_v18, %s4911_s13 }
 0x2c4   : > { %4632 = vrot.lane.b32.xlu0 %v5120_v9, %s4911_s13 }
 0x2c6   : > { %4642 = vrot.lane.b32.xlu1 %v5134_v26, %s4911_s13 }
 0x2c8   : > { %1295 = vrot.lane.b32.xlu0 %v5126_v15, %s4911_s13 }
 0x2ca   : > { %4647 = vrot.lane.b32.xlu1 %v5140_v33, %s4911_s13 }
 0x2cc   : > { %1299 = vrot.lane.b32.xlu0 %v5148_v36, %s4911_s13 }
 0x2ce   : > { %1297 = vrot.lane.b32.xlu1 %v5150_v37, %s4911_s13 }
 0x2d0   : > { %1303 = vrot.lane.b32.xlu0 %v5158_v39, %s4911_s13 }
 0x2d2   : > { %1301 = vrot.lane.b32.xlu1 %v5152_v38, %s4911_s13 }
 0x2d4   : > { %1307 = vrot.lane.b32.xlu0 %v5166_v41, %s4911_s13 }
 0x2d6   : > { %1305 = vrot.lane.b32.xlu1 %v5160_v40, %s4911_s13 }
 0x2d8   : > { %4652 = vrot.lane.b32.xlu0 %v5120_v9, %s4912_s14 }
 0x2da   : > { %1309 = vrot.lane.b32.xlu1 %v5168_v42, %s4911_s13 }
 0x2dc   : > { %4662 = vrot.lane.b32.xlu0 %v5134_v26, %s4912_s14 }
 0x2de   : > { %4657 = vrot.lane.b32.xlu1 %v5128_v18, %s4912_s14 }
 0x2e0   : > { %2011 = vrot.lane.b32.xlu0 %v5126_v15, %s4912_s14 }
 0x2e2   : > { %4667 = vrot.lane.b32.xlu1 %v5140_v33, %s4912_s14 }
 0x2e4   : > { %2015 = vrot.lane.b32.xlu0 %v5148_v36, %s4912_s14 }
 0x2e6   : > { %2013 = vrot.lane.b32.xlu1 %v5150_v37, %s4912_s14 }
 0x2e8   : > { %2019 = vrot.lane.b32.xlu0 %v5158_v39, %s4912_s14 }
 0x2ea   : > { %2017 = vrot.lane.b32.xlu1 %v5152_v38, %s4912_s14 }
 0x2ec   : > { %2023 = vrot.lane.b32.xlu0 %v5166_v41, %s4912_s14 }
 0x2ee   : > { %2021 = vrot.lane.b32.xlu1 %v5160_v40, %s4912_s14 }
 0x2f2   : > { %2025 = vrot.lane.b32.xlu1 %v5168_v42, %s4912_s14 }
 0x32e   : > { %v1104_v0 = vpop.xlane.xlu0 %1103 }
 0x32f   : > { %4767 = vrcp.f32 %v1104_v0 }
 0x332   : > { %v1107_v45 = vpop.xlane.xlu1 %1106 }
 0x333   : > { %4769 = vrcp.f32 %v1107_v45  ;;  %v1110_v46 = vpop.xlane.xlu0 %1109 }
 0x334   : > { %4771 = vrcp.f32 %v1110_v46 }
 0x336   : > { %v1113_v22 = vpop.xlane.xlu1 %1112 }
 0x337   : > { %4773 = vrcp.f32 %v1113_v22  ;;  %v1116_v47 = vpop.xlane.xlu0 %1115 }
 0x338   : > { %4775 = vrcp.f32 %v1116_v47 }
 0x339   : > { %v4768_v29 = vpop.eup %4767 }
 0x33a   : > { %v1134_v32 = vmul.f32 %v4768_v29, %v1104_v0  ;;  %v1119_v51 = vpop.xlane.xlu1 %1118 }
 0x33b   : > { %4777 = vrcp.f32 %v1119_v51  ;;  %v1122_v52 = vpop.xlane.xlu0 %1121 }
 0x33c   : > { %v1142_v35 = vsub.f32 2.0, %v1134_v32  ;;  %4779 = vrcp.f32 %v1122_v52 }
 0x33d   : > { %v4770_v54 = vpop.eup %4769 }
 0x33e   : > { %v4772_v56 = vpop.eup %4771  ;;  %v1150_v57 = vmul.f32 %v4768_v29, %v1142_v35  ;;  %v1135_v61 = vmul.f32 %v4770_v54, %v1107_v45  ;;  %v1125_v62 = vpop.xlane.xlu1 %1124 }
 0x33f   : > { %v1136_v3 = vmul.f32 %v4772_v56, %v1110_v46  ;;  %4781 = vrcp.f32 %v1125_v62  ;;  %v4633_v7 = vpop.permute.xlu0 %4632 }
 0x340   : > { %v1143_v10 = vsub.f32 2.0, %v1135_v61  ;;  %v4635_v11 = vunpack.i.h.bf16 %v4633_v7  ;;  %v4634_v14 = vunpack.i.l.bf16 %v4633_v7  ;;  %v1158_v17 = vmul.f32 %v5304_v49, %v1150_v57 }
 0x341   : > { %v4774_v19 = vpop.eup %4773  ;;  %v1144_v21 = vsub.f32 2.0, %v1136_v3 }
 0x342   : > { %v4776_v24 = vpop.eup %4775  ;;  %v1151_v6 = vmul.f32 %v4770_v54, %v1143_v10  ;;  %v1137_v8 = vmul.f32 %v4774_v19, %v1113_v22  ;;  %v4444_v2 = vpack.c.bf16 %v4635_v11, %v4634_v14  ;;  %v4638_v4 = vpop.permute.xlu1 %4637  ;;  %4048 = vmatprep.mubr.msk.f32.mxu1 %vm1053_vm2, %v1158_v17 }
 0x343   : > { %v1152_v28 = vmul.f32 %v4772_v56, %v1144_v21  ;;  %v1138_v31 = vmul.f32 %v4776_v24, %v1116_v47  ;;  %v4640_v34 = vunpack.i.h.bf16 %v4638_v4  ;;  %v4639_v0 = vunpack.i.l.bf16 %v4638_v4  ;;  %v1296_v45 = vpop.permute.xlu0 %1295 }
 0x344   : > { %v1159_v46 = vmul.f32 %v5308_v50, %v1151_v6  ;;  %v1145_v29 = vsub.f32 2.0, %v1137_v8  ;;  %4446 = vmatprep.subr.msk.bf16.mxu1 %vm5113_vm1, %v4444_v2 }
 0x345   : > { %v4778_v49 = vpop.eup %4777  ;;  %v1146_v32 = vsub.f32 2.0, %v1138_v31  ;;  %v4450_v35 = vpack.c.bf16 %v4640_v34, %v4639_v0  ;;  %v1160_v22 = vmul.f32 %v5310_v55, %v1152_v28 }
 0x346   : > { %v4780_v54 = vpop.eup %4779  ;;  %v1153_v57 = vmul.f32 %v4774_v19, %v1145_v29  ;;  %v1139_v61 = vmul.f32 %v4778_v49, %v1119_v51  ;;  %v4643_v3 = vpop.permute.xlu1 %4642  ;;  %4049 = vmatmul.mubr.msk.f32.vlgmr.msra.gmra.mrb[16].mxu1 %vm1053_vm2, %v1159_v46 }
 0x347   : > { %v1154_v47 = vmul.f32 %v4776_v24, %v1146_v32  ;;  %v1140_v56 = vmul.f32 %v4780_v54, %v1122_v52  ;;  %v1300_v7 = vpop.permute.xlu0 %1299  ;;  %4449 = vmatpush3.bf16.xpose.msk.msra.mxu1 %vm5113_vm1, %v4444_v2  ;;  %4051 = vmatprep.mubr.msk.f32.mxu1 %vm1053_vm2, %v1160_v22  ;;  %v4645_v19 = vunpack.i.h.bf16 %v4643_v3  ;;  %v4644_v52 = vunpack.i.l.bf16 %v4643_v3 }
 0x348   : > { %v1147_v50 = vsub.f32 2.0, %v1139_v61  ;;  %4452 = vmatprep.subr.msk.bf16.mxu1 %vm5113_vm1, %v4450_v35  ;;  %v1161_v55 = vmul.f32 %v5316_v59, %v1153_v57 }
 0x349   : > { %v4782_v10 = vpop.eup %4781  ;;  %v1148_v11 = vsub.f32 2.0, %v1140_v56  ;;  %v1162_v51 = vmul.f32 %v5318_v60, %v1154_v47  ;;  %v4456_v28 = vpack.c.bf16 %v4645_v19, %v4644_v52 }
 0x34a   : > { %v1155_v14 = vmul.f32 %v4778_v49, %v1147_v50  ;;  %v1141_v17 = vmul.f32 %v4782_v10, %v1125_v62  ;;  %v4648_v21 = vpop.permute.xlu1 %4647  ;;  %4052 = vmatmul.mubr.msk.f32.gmra.mrb[18].mxu1 %vm1053_vm2, %v1161_v55 }
 0x34b   : > { %v1156_v24 = vmul.f32 %v4780_v54, %v1148_v11  ;;  %v1304_v6 = vpop.permute.xlu0 %1303  ;;  %4054 = vmatprep.mubr.msk.f32.mxu1 %vm1053_vm2, %v1162_v51  ;;  %v4650_v34 = vunpack.i.h.bf16 %v4648_v21 }
 0x34c   : > { %v1149_v8 = vsub.f32 2.0, %v1141_v17  ;;  %v1163_v2 = vmul.f32 %v5324_v63, %v1155_v14  ;;  %v4649_v63 = vunpack.i.l.bf16 %v4648_v21 }
 0x34d   : > { %v1164_v59 = vmul.f32 %v5326_v1, %v1156_v24 }
 0x34e   : > { %v1157_v4 = vmul.f32 %v4782_v10, %v1149_v8  ;;  %v1298_v31 = vpop.permute.xlu1 %1297  ;;  %4055 = vmatmul.mubr.msk.f32.gmra.mrb[20].mxu1 %vm1053_vm2, %v1163_v2  ;;  %v4462_v1 = vpack.c.bf16 %v4650_v34, %v4649_v63 }
 0x34f   : > { %4455 = vmatpush3.bf16.xpose.msk.msra.mxu1 %vm5113_vm1, %v4450_v35  ;;  %4057 = vmatprep.mubr.msk.f32.mxu1 %vm1053_vm2, %v1164_v59  ;;  %v1308_v62 = vpop.permute.xlu0 %1307 }
 0x350   : > { %4458 = vmatprep.subr.msk.bf16.mxu1 %vm5113_vm1, %v4456_v28  ;;  %v1165_v60 = vmul.f32 %v5337_v13, %v1157_v4 }
 0x352   : > { %v1302_v0 = vpop.permute.xlu1 %1301  ;;  %4058 = vmatmul.mubr.msk.f32.gmra.mrb[22].mxu1 %vm1053_vm2, %v1165_v60 }
 0x353   : > { %4076 = vmatprep.mubr.msk.f32.mxu1 %vm883_vm0, %v1296_v45  ;;  %v4653_v29 = vpop.permute.xlu0 %4652 }
 0x354   : > { %v4655_v49 = vunpack.i.h.bf16 %v4653_v29  ;;  %v4654_v32 = vunpack.i.l.bf16 %v4653_v29 }
 0x356   : > { %v1306_v46 = vpop.permute.xlu1 %1305  ;;  %v4500_v35 = vpack.c.bf16 %v4655_v49, %v4654_v32 }
 0x357   : > { %4461 = vmatpush3.bf16.xpose.msk.msra.mxu1 %vm5113_vm1, %v4456_v28  ;;  %v4663_v61 = vpop.permute.xlu0 %4662 }
 0x358   : > { %4464 = vmatprep.subr.msk.bf16.mxu1 %vm5113_vm1, %v4462_v1  ;;  %v4665_v3 = vunpack.i.h.bf16 %v4663_v61  ;;  %v4664_v47 = vunpack.i.l.bf16 %v4663_v61 }
 0x35a   : > { %v1310_v13 = vpop.permute.xlu1 %1309  ;;  %v4512_v56 = vpack.c.bf16 %v4665_v3, %v4664_v47 }
 0x35e   : > { %v4658_v22 = vpop.permute.xlu1 %4657 }
 0x35f   : > { %4467 = vmatpush3.bf16.xpose.msk.msra.mxu1 %vm5113_vm1, %v4462_v1  ;;  %v4660_v45 = vunpack.i.h.bf16 %v4658_v22  ;;  %v4659_v54 = vunpack.i.l.bf16 %v4658_v22 }
 0x360   : > { %4502 = vmatprep.subr.msk.bf16.mxu1 %vm5113_vm1, %v4500_v35 }
 0x361   : > { %v4506_v57 = vpack.c.bf16 %v4660_v45, %v4659_v54 }
 0x362   : > { %v4668_v50 = vpop.permute.xlu1 %4667 }
 0x363   : > { %v4670_v55 = vunpack.i.h.bf16 %v4668_v50  ;;  %v4669_v10 = vunpack.i.l.bf16 %v4668_v50 }
 0x365   : > { %v4518_v11 = vpack.c.bf16 %v4670_v55, %v4669_v10 }
 0x366   : > { %4077 = vmatmul.mubr.msk.f32.vlgmr.msra.gmra.mrb[24].mxu1 %vm883_vm0, %v1298_v31  ;;  %v2014_v51 = vpop.permute.xlu1 %2013 }
 0x367   : > { %4079 = vmatprep.mubr.msk.f32.mxu1 %vm883_vm0, %v1300_v7  ;;  %4505 = vmatpush3.bf16.xpose.msk.msra.mxu1 %vm5113_vm1, %v4500_v35  ;;  %v2012_v7 = vpop.permute.xlu0 %2011 }
 0x368   : > { %4508 = vmatprep.subr.msk.bf16.mxu1 %vm5113_vm1, %v4506_v57 }
 0x36a   : > { %4080 = vmatmul.mubr.msk.f32.gmra.mrb[26].mxu1 %vm883_vm0, %v1302_v0  ;;  %v2018_v17 = vpop.permute.xlu1 %2017 }
 0x36b   : > { %4082 = vmatprep.mubr.msk.f32.mxu1 %vm883_vm0, %v1304_v6  ;;  %v2016_v14 = vpop.permute.xlu0 %2015 }
 0x36e   : > { %4083 = vmatmul.mubr.msk.f32.gmra.mrb[28].mxu1 %vm883_vm0, %v1306_v46  ;;  %v2022_v52 = vpop.permute.xlu1 %2021 }
 0x36f   : > { %4085 = vmatprep.mubr.msk.f32.mxu1 %vm883_vm0, %v1308_v62  ;;  %4511 = vmatpush3.bf16.xpose.msk.msra.mxu1 %vm5113_vm1, %v4506_v57  ;;  %v2020_v19 = vpop.permute.xlu0 %2019 }
 0x370   : > { %4514 = vmatprep.subr.msk.bf16.mxu1 %vm5113_vm1, %v4512_v56 }
 0x372   : > { %4086 = vmatmul.mubr.msk.f32.gmra.mrb[30].mxu1 %vm883_vm0, %v1310_v13  ;;  %v2026_v24 = vpop.permute.xlu1 %2025 }
 0x373   : > { %4172 = vmatprep.mubr.msk.f32.mxu1 %vm883_vm0, %v2012_v7  ;;  %v2024_v21 = vpop.permute.xlu0 %2023 }
 0x377   : > { %4517 = vmatpush3.bf16.xpose.msk.msra.mxu1 %vm5113_vm1, %v4512_v56 }
 0x378   : > { %4520 = vmatprep.subr.msk.bf16.mxu1 %vm5113_vm1, %v4518_v11 }
 0x37f   : > { %4523 = vmatpush3.bf16.xpose.msk.msra.mxu1 %vm5113_vm1, %v4518_v11 }
 0x386   : > { %4173 = vmatmul.mubr.msk.f32.vlgmr.msra.gmra.mrb[32].mxu1 %vm883_vm0, %v2014_v51 }
 0x387   : > { %4175 = vmatprep.mubr.msk.f32.mxu1 %vm883_vm0, %v2016_v14 }
 0x38a   : > { %4176 = vmatmul.mubr.msk.f32.gmra.mrb[34].mxu1 %vm883_vm0, %v2018_v17 }
 0x38b   : > { %4178 = vmatprep.mubr.msk.f32.mxu1 %vm883_vm0, %v2020_v19 }
 0x38e   : > { %4179 = vmatmul.mubr.msk.f32.gmra.mrb[36].mxu1 %vm883_vm0, %v2022_v52 }
 0x38f   : > { %4181 = vmatprep.mubr.msk.f32.mxu1 %vm883_vm0, %v2024_v21 }
 0x392   : > { %4182 = vmatmul.mubr.msk.f32.gmra.mrb[38].mxu1 %vm883_vm0, %v2026_v24 }
 0x419   : > { %v5463_v6 = vpop.f32.mrb[16].mxu1 }
 0x41a   : > { %v5465_v8 = vpop.f32.mrb[17].mxu1 }
 0x41d   : > { %v5467_v2 = vpop.f32.mrb[18].mxu1 }
 0x41e   : > { %v5469_v59 = vpop.f32.mrb[19].mxu1 }
 0x421   : > { %v5471_v4 = vpop.f32.mrb[20].mxu1 }
 0x422   : > { %v5473_v28 = vpop.f32.mrb[21].mxu1 }
 0x425   : > { %v5475_v31 = vpop.f32.mrb[22].mxu1 }
 0x426   : > { %6077 = vst [vmem:[#allocation2_spill] sm:$0xff] %v5475_v31  ;;  %v5477_v60 = vpop.f32.mrb[23].mxu1 }
 0x427   : > { %6078 = vst [vmem:[#allocation3_spill] sm:$0xff] %v5477_v60 }
 0x439   : > { %v4078_v62 = vpop.f32.mrb[24].mxu1 }
 0x43a   : > { %v1465_v34 = vmul.f32 0.17677669, %v4078_v62  ;;  %v1425_v63 = vpop.f32.mrb[25].mxu1 }
 0x43b   : > { %v1464_v0 = vmul.f32 0.17677669, %v1425_v63 }
 0x43c   : > { %v1473_v1 = vadd.f32 %v1465_v34, %v5246_v20 }
 0x43d   : > { %v4081_v46 = vpop.f32.mrb[26].mxu1  ;;  %v1472_v29 = vadd.f32 %v1464_v0, %v5241_v16 }
 0x43e   : > { %v1467_v49 = vmul.f32 0.17677669, %v4081_v46  ;;  %v1435_v32 = vpop.f32.mrb[27].mxu1  ;;  %v1483_v13 = vsel %vm1053_vm2, %v1473_v1, -inf }
 0x43f   : > { %v1466_v35 = vmul.f32 0.17677669, %v1435_v32  ;;  %1484 = vmax.xlane.f32.xlu1 %v1483_v13  ;;  %v1480_v22 = vsel %vm1053_vm2, %v1472_v29, -inf }
 0x440   : > { %1481 = vmax.xlane.f32.xlu0 %v1480_v22  ;;  %v1475_v45 = vadd.f32 %v1467_v49, %v5259_v30 }
 0x441   : > { %v4084_v54 = vpop.f32.mrb[28].mxu1  ;;  %v1474_v56 = vadd.f32 %v1466_v35, %v5252_v25 }
 0x442   : > { %v1469_v57 = vmul.f32 0.17677669, %v4084_v54  ;;  %v1445_v61 = vpop.f32.mrb[29].mxu1  ;;  %v1489_v3 = vsel %vm1053_vm2, %v1475_v45, -inf }
 0x443   : > { %v1468_v47 = vmul.f32 0.17677669, %v1445_v61  ;;  %v1486_v14 = vsel %vm1053_vm2, %v1474_v56, -inf }
 0x444   : > { %1490 = vmax.xlane.f32.xlu0 %v1489_v3  ;;  %v1477_v50 = vadd.f32 %v1469_v57, %v5273_v48 }
 0x445   : > { %v4087_v7 = vpop.f32.mrb[30].mxu1  ;;  %v1476_v17 = vadd.f32 %v1468_v47, %v5266_v43 }
 0x446   : > { %v1471_v55 = vmul.f32 0.17677669, %v4087_v7  ;;  %v1455_v10 = vpop.f32.mrb[31].mxu1  ;;  %v1495_v11 = vsel %vm1053_vm2, %v1477_v50, -inf }
 0x447   : > { %v1470_v51 = vmul.f32 0.17677669, %v1455_v10  ;;  %1496 = vmax.xlane.f32.xlu1 %v1495_v11  ;;  %v1492_v21 = vsel %vm1053_vm2, %v1476_v17, -inf }
 0x448   : > { %1487 = vmax.xlane.f32.xlu0 %v1486_v14  ;;  %v1479_v19 = vadd.f32 %v1471_v55, %v5287_v58 }
 0x449   : > { %v1478_v24 = vadd.f32 %v1470_v51, %v5280_v53 }
 0x44a   : > { %v1501_v52 = vsel %vm1053_vm2, %v1479_v19, -inf }
 0x44b   : > { %1502 = vmax.xlane.f32.xlu1 %v1501_v52  ;;  %v1498_v62 = vsel %vm1053_vm2, %v1478_v24, -inf }
 0x44c   : > { %1493 = vmax.xlane.f32.xlu0 %v1492_v21 }
 0x450   : > { %1499 = vmax.xlane.f32.xlu0 %v1498_v62 }
 0x459   : > { %v5495_v34 = vpop.f32.mrb[32].mxu1 }
 0x45a   : > { %v5497_v63 = vpop.f32.mrb[33].mxu1 }
 0x45d   : > { %v5499_v0 = vpop.f32.mrb[34].mxu1 }
 0x45e   : > { %v5501_v46 = vpop.f32.mrb[35].mxu1 }
 0x461   : > { %v5503_v49 = vpop.f32.mrb[36].mxu1 }
 0x462   : > { %v5505_v32 = vpop.f32.mrb[37].mxu1 }
 0x465   : > { %v5507_v13 = vpop.f32.mrb[38].mxu1 }
 0x466   : > { %v5509_v35 = vpop.f32.mrb[39].mxu1 }
 0x4cc   : > { %v1485_v22 = vpop.xlane.xlu1 %1484 }
 0x4cd   : > { %v1505_v54 = vsub.f32 %v1473_v1, %v1485_v22  ;;  %v1482_v57 = vpop.xlane.xlu0 %1481 }
 0x4ce   : > { %v1504_v61 = vsub.f32 %v1472_v29, %v1482_v57 }
 0x4cf   : > { %v1514_v3 = vmul.f32 1.442695, %v1505_v54 }
 0x4d0   : > { %v1512_v47 = vmul.f32 1.442695, %v1504_v61 }
 0x4d1   : > { %4783 = vpow2.f32 %v1514_v3  ;;  %v1491_v7 = vpop.xlane.xlu0 %1490 }
 0x4d2   : > { %4785 = vpow2.f32 %v1512_v47  ;;  %v1507_v55 = vsub.f32 %v1475_v45, %v1491_v7 }
 0x4d4   : > { %v1518_v10 = vmul.f32 1.442695, %v1507_v55  ;;  %v1497_v11 = vpop.xlane.xlu1 %1496 }
 0x4d5   : > { %v1509_v51 = vsub.f32 %v1477_v50, %v1497_v11  ;;  %v1488_v14 = vpop.xlane.xlu0 %1487 }
 0x4d6   : > { %4787 = vpow2.f32 %v1518_v10  ;;  %v1506_v52 = vsub.f32 %v1474_v56, %v1488_v14 }
 0x4d7   : > { %v1522_v21 = vmul.f32 1.442695, %v1509_v51 }
 0x4d8   : > { %v1516_v62 = vmul.f32 1.442695, %v1506_v52  ;;  %v1503_v31 = vpop.xlane.xlu1 %1502 }
 0x4d9   : > { %4789 = vpow2.f32 %v1522_v21  ;;  %v1511_v60 = vsub.f32 %v1479_v19, %v1503_v31  ;;  %v1494_v1 = vpop.xlane.xlu0 %1493 }
 0x4da   : > { %4791 = vpow2.f32 %v1516_v62  ;;  %v1508_v29 = vsub.f32 %v1476_v17, %v1494_v1 }
 0x4db   : > { %v5511_v22 = vpop.eup %4783  ;;  %v1526_v54 = vmul.f32 1.442695, %v1511_v60 }
 0x4dc   : > { %v5513_v57 = vpop.eup %4785  ;;  %v1520_v45 = vmul.f32 1.442695, %v1508_v29  ;;  %v1531_v50 = vsel %vm1053_vm2, %v5511_v22, 0.0 }
 0x4dd   : > { %4793 = vpow2.f32 %v1526_v54  ;;  %1532 = vadd.xlane.f32.xlu1 %v1531_v50  ;;  %v1500_v56 = vpop.xlane.xlu0 %1499  ;;  %v1528_v61 = vsel %vm1053_vm2, %v5513_v57, 0.0 }
 0x4de   : > { %4795 = vpow2.f32 %v1520_v45  ;;  %v1510_v31 = vsub.f32 %v1478_v24, %v1500_v56  ;;  %1529 = vadd.xlane.f32.xlu0 %v1528_v61 }
 0x4e0   : > { %v5519_v19 = vpop.eup %4787  ;;  %v1524_v17 = vmul.f32 1.442695, %v1510_v31 }
 0x4e1   : > { %v1537_v60 = vsel %vm1053_vm2, %v5519_v19, 0.0 }
 0x4e2   : > { %4797 = vpow2.f32 %v1524_v17  ;;  %1538 = vadd.xlane.f32.xlu1 %v1537_v60 }
 0x4e3   : > { %v5523_v3 = vpop.eup %4789 }
 0x4e4   : > { %v5525_v47 = vpop.eup %4791  ;;  %v1543_v7 = vsel %vm1053_vm2, %v5523_v3, 0.0 }
 0x4e5   : > { %v1534_v55 = vsel %vm1053_vm2, %v5525_v47, 0.0 }
 0x4e6   : > { %1544 = vadd.xlane.f32.xlu1 %v1543_v7  ;;  %1535 = vadd.xlane.f32.xlu0 %v1534_v55 }
 0x4e7   : > { %v5531_v24 = vpop.eup %4793 }
 0x4e8   : > { %v5533_v10 = vpop.eup %4795  ;;  %v1549_v11 = vsel %vm1053_vm2, %v5531_v24, 0.0 }
 0x4e9   : > { %v1540_v51 = vsel %vm1053_vm2, %v5533_v10, 0.0 }
 0x4ea   : > { %1550 = vadd.xlane.f32.xlu1 %v1549_v11  ;;  %1541 = vadd.xlane.f32.xlu0 %v1540_v51 }
 0x4ec   : > { %v5539_v14 = vpop.eup %4797 }
 0x4ed   : > { %v1546_v52 = vsel %vm1053_vm2, %v5539_v14, 0.0 }
 0x4ee   : > { %1547 = vadd.xlane.f32.xlu0 %v1546_v52 }
 0x4fb   : > { %4677 = vrot.lane.b32.xlu1 %v5341_v23, %s4911_s13 }
 0x4ff   : > { %4682 = vrot.lane.b32.xlu1 %v5345_v27, %s4911_s13 }
 0x503   : > { %4687 = vrot.lane.b32.xlu1 %v5349_v44, %s4911_s13 }
 0x504   : > { %4672 = vrot.lane.b32.xlu0 %v5335_v12, %s4911_s13 }
 0x507   : > { %4697 = vrot.lane.b32.xlu1 %v5128_v18, %s4913_s15  ;;  %v2182_v18 = vmul.f32 0.17677669, %v5501_v46 }
 0x508   : > { %4692 = vrot.lane.b32.xlu0 %v5120_v9, %s4913_s15  ;;  %v2180_v9 = vmul.f32 0.17677669, %v5497_v63  ;;  %v2186_v63 = vmul.f32 0.17677669, %v5509_v35 }
 0x50b   : > { %4707 = vrot.lane.b32.xlu1 %v5140_v33, %s4913_s15  ;;  %v2183_v33 = vmul.f32 0.17677669, %v5499_v0 }
 0x50c   : > { %4702 = vrot.lane.b32.xlu0 %v5134_v26, %s4913_s15  ;;  %v5579_v26 = vadd.f32 %v2180_v9, %v5241_v16  ;;  %v2187_v16 = vmul.f32 0.17677669, %v5507_v13 }
 0x50e   : > { %v5609_v0 = vadd.f32 %v2187_v16, %v5287_v58 }
 0x50f   : > { %2600 = vrot.lane.b32.xlu1 %v5150_v37, %s4913_s15  ;;  %v2185_v37 = vmul.f32 0.17677669, %v5503_v49 }
 0x510   : > { %2598 = vrot.lane.b32.xlu0 %v5126_v15, %s4913_s15  ;;  %v2181_v15 = vmul.f32 0.17677669, %v5495_v34 }
 0x511   : > { %v5601_v34 = vadd.f32 %v2185_v37, %v5273_v48  ;;  %v2217_v48 = vsel %vm1053_vm2, %v5609_v0, -inf }
 0x513   : > { %2604 = vrot.lane.b32.xlu1 %v5152_v38, %s4913_s15  ;;  %v2196_v38 = vsel %vm1053_vm2, %v5579_v26, -inf }
 0x514   : > { %2602 = vrot.lane.b32.xlu0 %v5148_v36, %s4913_s15  ;;  %v5583_v36 = vadd.f32 %v2181_v15, %v5246_v20 }
 0x517   : > { %2608 = vrot.lane.b32.xlu1 %v5160_v40, %s4913_s15  ;;  %v2199_v40 = vsel %vm1053_vm2, %v5583_v36, -inf }
 0x518   : > { %2606 = vrot.lane.b32.xlu0 %v5158_v39, %s4913_s15  ;;  %v5589_v39 = vadd.f32 %v2182_v18, %v5252_v25 }
 0x51a   : > { %v2202_v20 = vsel %vm1053_vm2, %v5589_v39, -inf }
 0x51b   : > { %2612 = vrot.lane.b32.xlu1 %v5168_v42, %s4913_s15  ;;  %v2184_v42 = vmul.f32 0.17677669, %v5505_v32  ;;  %v5619_v32 = vadd.f32 %v2186_v63, %v5280_v53 }
 0x51c   : > { %2610 = vrot.lane.b32.xlu0 %v5166_v41, %s4913_s15  ;;  %v5594_v41 = vadd.f32 %v2183_v33, %v5259_v30  ;;  %v2211_v30 = vsel %vm1053_vm2, %v5601_v34, -inf }
 0x51d   : > { %v5612_v46 = vadd.f32 %v2184_v42, %v5266_v43  ;;  %v2214_v58 = vsel %vm1053_vm2, %v5619_v32, -inf }
 0x51e   : > { %v2205_v25 = vsel %vm1053_vm2, %v5594_v41, -inf }
 0x51f   : > { %v2208_v49 = vsel %vm1053_vm2, %v5612_v46, -inf }
 0x53b   : > { %2197 = vmax.xlane.f32.xlu0 %v2196_v38 }
 0x53f   : > { %2200 = vmax.xlane.f32.xlu1 %v2199_v40  ;;  %2203 = vmax.xlane.f32.xlu0 %v2202_v20 }
 0x543   : > { %2212 = vmax.xlane.f32.xlu1 %v2211_v30  ;;  %2206 = vmax.xlane.f32.xlu0 %v2205_v25 }
 0x547   : > { %2218 = vmax.xlane.f32.xlu1 %v2217_v48  ;;  %2209 = vmax.xlane.f32.xlu0 %v2208_v49 }
 0x54b   : > { %2215 = vmax.xlane.f32.xlu0 %v2214_v58 }
 0x56a   : > { %v1533_v13 = vpop.xlane.xlu1 %1532 }
 0x56b   : > { %v1530_v43 = vpop.xlane.xlu0 %1529 }
 0x56c   : > { %4799 = vrcp.f32 %v1530_v43 }
 0x56d   : > { %4801 = vrcp.f32 %v1533_v13 }
 0x56f   : > { %v1539_v35 = vpop.xlane.xlu1 %1538 }
 0x573   : > { %v5623_v21 = vpop.xlane.xlu1 %1544  ;;  %v1536_v62 = vpop.xlane.xlu0 %1535 }
 0x574   : > { %4803 = vrcp.f32 %v1536_v62 }
 0x575   : > { %4805 = vrcp.f32 %v1539_v35 }
 0x576   : > { %v4800_v1 = vpop.eup %4799 }
 0x577   : > { %v1560_v29 = vmul.f32 %v4800_v1, %v1530_v43  ;;  %v5625_v54 = vpop.xlane.xlu1 %1550  ;;  %v1542_v45 = vpop.xlane.xlu0 %1541 }
 0x578   : > { %4807 = vrcp.f32 %v1542_v45  ;;  %v4802_v18 = vpop.eup %4801 }
 0x579   : > { %v1568_v53 = vsub.f32 2.0, %v1560_v29  ;;  %4809 = vrcp.f32 %v5623_v21  ;;  %v1561_v16 = vmul.f32 %v4802_v18, %v1533_v13 }
 0x57b   : > { %v1576_v50 = vmul.f32 %v4800_v1, %v1568_v53  ;;  %v4678_v56 = vpop.permute.xlu1 %4677  ;;  %v5627_v61 = vpop.xlane.xlu0 %1547  ;;  %v1569_v13 = vsub.f32 2.0, %v1561_v16 }
 0x57c   : > { %v4680_v7 = vunpack.i.h.bf16 %v4678_v56  ;;  %v4679_v55 = vunpack.i.l.bf16 %v4678_v56  ;;  %4811 = vrcp.f32 %v5627_v61 }
 0x57d   : > { %v1584_v31 = vmul.f32 %v5513_v57, %v1576_v50  ;;  %4813 = vrcp.f32 %v5625_v54 }
 0x57e   : > { %v4472_v33 = vpack.c.bf16 %v4680_v7, %v4679_v55  ;;  %v4804_v57 = vpop.eup %4803  ;;  %v871_v7 = vld [vmem:[%s6070_s7 + $0x20] sm:$0xff]  ;;  %v872_v55 = vld [vmem:[%s6070_s7 + $0x28] sm:$0xff] }
 0x57f   : > { %v4683_v17 = vpop.permute.xlu1 %4682  ;;  %4104 = vmatprep.mubr.msk.f32.mxu0 %vm1053_vm2, %v1584_v31  ;;  %v4673_v60 = vpop.permute.xlu0 %4672  ;;  %v1562_v48 = vmul.f32 %v4804_v57, %v1536_v62 }
 0x580   : > { %v4675_v11 = vunpack.i.h.bf16 %v4673_v60  ;;  %v4674_v51 = vunpack.i.l.bf16 %v4673_v60  ;;  %v4685_v37 = vunpack.i.h.bf16 %v4683_v17  ;;  %v4684_v38 = vunpack.i.l.bf16 %v4683_v17  ;;  %v4806_v30 = vpop.eup %4805 }
 0x581   : > { %v1563_v56 = vmul.f32 %v4806_v30, %v1539_v35  ;;  %v1570_v62 = vsub.f32 2.0, %v1562_v48 }
 0x582   : > { %v4468_v52 = vpack.c.bf16 %v4675_v11, %v4674_v51  ;;  %v4808_v43 = vpop.eup %4807  ;;  %v4476_v1 = vpack.c.bf16 %v4685_v37, %v4684_v38 }
 0x583   : > { %v4688_v9 = vpop.permute.xlu1 %4687  ;;  %v4693_v15 = vpop.permute.xlu0 %4692  ;;  %v1564_v60 = vmul.f32 %v4808_v43, %v1542_v45  ;;  %v1571_v45 = vsub.f32 2.0, %v1563_v56  ;;  %v1578_v38 = vmul.f32 %v4804_v57, %v1570_v62 }
 0x584   : > { %v4695_v40 = vunpack.i.h.bf16 %v4693_v15  ;;  %v4694_v42 = vunpack.i.l.bf16 %v4693_v15  ;;  %4469 = vmatprep.subr.bf16.mxu0 %v4468_v52  ;;  %v4690_v29 = vunpack.i.h.bf16 %v4688_v9  ;;  %v4689_v53 = vunpack.i.l.bf16 %v4688_v9  ;;  %v4810_v17 = vpop.eup %4809 }
 0x585   : > { %4471 = vmatpush3.bf16.msra.mxu0 %v4468_v52  ;;  %v1577_v9 = vmul.f32 %v4802_v18, %v1569_v13  ;;  %v1565_v15 = vmul.f32 %v4810_v17, %v5623_v21  ;;  %v1586_v21 = vmul.f32 %v5525_v47, %v1578_v38 }
 0x586   : > { %v4548_v20 = vpack.c.bf16 %v4695_v40, %v4694_v42  ;;  %4473 = vmatprep.subr.bf16.mxu0 %v4472_v33  ;;  %v4812_v11 = vpop.eup %4811  ;;  %v4480_v35 = vpack.c.bf16 %v4690_v29, %v4689_v53  ;;  %v1572_v40 = vsub.f32 2.0, %v1564_v60 }
 0x587   : > { %v4698_v25 = vpop.permute.xlu1 %4697  ;;  %v4703_v63 = vpop.permute.xlu0 %4702  ;;  %v1566_v42 = vmul.f32 %v4812_v11, %v5627_v61  ;;  %v1573_v18 = vsub.f32 2.0, %v1565_v15 }
 0x588   : > { %v4700_v49 = vunpack.i.h.bf16 %v4698_v25  ;;  %v4699_v58 = vunpack.i.l.bf16 %v4698_v25  ;;  %4550 = vmatprep.subr.msk.bf16.mxu1 %vm5113_vm1, %v4548_v20  ;;  %v4705_v51 = vunpack.i.h.bf16 %v4703_v63  ;;  %v4704_v52 = vunpack.i.l.bf16 %v4703_v63  ;;  %v4814_v37 = vpop.eup %4813 }
 0x589   : > { %4475 = vmatpush3.bf16.msra.mxu0 %v4472_v33  ;;  %4553 = vmatpush3.bf16.xpose.msk.msra.mxu1 %vm5113_vm1, %v4548_v20  ;;  %v4484_v33 = vpack.c.bf16 %v872_v55, %v871_v7  ;;  %v1585_v25 = vmul.f32 %v5511_v22, %v1577_v9  ;;  %v1579_v63 = vmul.f32 %v4806_v30, %v1571_v45  ;;  %v1574_v61 = vsub.f32 2.0, %v1566_v42 }
 0x58a   : > { %v4554_v50 = vpack.c.bf16 %v4700_v49, %v4699_v58  ;;  %4477 = vmatprep.subr.bf16.mxu0 %v4476_v1  ;;  %v4560_v16 = vpack.c.bf16 %v4705_v51, %v4704_v52  ;;  %v1567_v48 = vmul.f32 %v4814_v37, %v5625_v54  ;;  %v1580_v57 = vmul.f32 %v4808_v43, %v1572_v40 }
 0x58b   : > { %v2599_v31 = vpop.permute.xlu0 %2598  ;;  %v4708_v20 = vpop.permute.xlu1 %4707  ;;  %v1587_v22 = vmul.f32 %v5519_v19, %v1579_v63  ;;  %v1581_v30 = vmul.f32 %v4810_v17, %v1573_v18  ;;  %v1582_v29 = vmul.f32 %v4812_v11, %v1574_v61  ;;  %v873_v61 = vld [vmem:[%s6070_s7 + $0x30] sm:$0xff] }
 0x58c   : > { %4556 = vmatprep.subr.msk.bf16.mxu1 %vm5113_vm1, %v4554_v50  ;;  %4248 = vmatprep.mubr.msk.f32.mxu1 %vm883_vm0, %v2599_v31  ;;  %v4710_v49 = vunpack.i.h.bf16 %v4708_v20  ;;  %v4709_v58 = vunpack.i.l.bf16 %v4708_v20  ;;  %v1588_v54 = vmul.f32 %v5533_v10, %v1580_v57 }
 0x58d   : > { %4479 = vmatpush3.bf16.msra.mxu0 %v4476_v1  ;;  %v1575_v1 = vsub.f32 2.0, %v1567_v48  ;;  %v1589_v47 = vmul.f32 %v5523_v3, %v1581_v30  ;;  %v1590_v19 = vmul.f32 %v5539_v14, %v1582_v29 }
 0x58e   : > { %4481 = vmatprep.subr.bf16.mxu0 %v4480_v35  ;;  %v4566_v53 = vpack.c.bf16 %v4710_v49, %v4709_v58  ;;  %v874_v49 = vld [vmem:[%s6070_s7 + $0x38] sm:$0xff] }
 0x58f   : > { %v1583_v43 = vmul.f32 %v4814_v37, %v1575_v1  ;;  %v2603_v13 = vpop.permute.xlu0 %2602  ;;  %v4488_v30 = vpack.c.bf16 %v874_v49, %v873_v61  ;;  %v4896_v49 = vld [vmem:[%s6067_s4] sm:$0xff] }
 0x591   : > { %4483 = vmatpush3.bf16.msra.mxu0 %v4480_v35  ;;  %4559 = vmatpush3.bf16.xpose.msk.msra.mxu1 %vm5113_vm1, %v4554_v50  ;;  %v1591_v10 = vmul.f32 %v5531_v24, %v1583_v43  ;;  %v2601_v50 = vpop.permute.xlu1 %2600  ;;  %v868_v43 = vld [vmem:[%s6070_s7 + $0x8] sm:$0xff] }
 0x592   : > { %4562 = vmatprep.subr.msk.bf16.mxu1 %vm5113_vm1, %v4560_v16  ;;  %4485 = vmatprep.subr.bf16.mxu0 %v4484_v33 }
 0x593   : > { %v2607_v56 = vpop.permute.xlu0 %2606 }
 0x594   : > { %4105 = vmatmul.mubr.msk.f32.vlgmr.msra.gmra.mrb[16].mxu0 %vm1053_vm2, %v1585_v25 }
 0x595   : > { %4107 = vmatprep.mubr.msk.f32.mxu0 %vm1053_vm2, %v1586_v21  ;;  %4487 = vmatpush3.bf16.msra.mxu0 %v4484_v33  ;;  %v2605_v3 = vpop.permute.xlu1 %2604 }
 0x596   : > { %4489 = vmatprep.subr.bf16.mxu0 %v4488_v30 }
 0x597   : > { %v2611_v31 = vpop.permute.xlu0 %2610 }
 0x598   : > { %4108 = vmatmul.mubr.msk.f32.gmra.mrb[18].mxu0 %vm1053_vm2, %v1587_v22 }
 0x599   : > { %4110 = vmatprep.mubr.msk.f32.mxu0 %vm1053_vm2, %v1588_v54  ;;  %4565 = vmatpush3.bf16.xpose.msk.msra.mxu1 %vm5113_vm1, %v4560_v16  ;;  %v2609_v14 = vpop.permute.xlu1 %2608 }
 0x59a   : > { %4568 = vmatprep.subr.msk.bf16.mxu1 %vm5113_vm1, %v4566_v53  ;;  %4491 = vmatpush3.bf16.msra.mxu0 %v4488_v30 }
 0x59c   : > { %4111 = vmatmul.mubr.msk.f32.gmra.mrb[20].mxu0 %vm1053_vm2, %v1589_v47  ;;  %v867_v47 = vld [vmem:[%s6070_s7] sm:$0xff] }
 0x59d   : > { %4113 = vmatprep.mubr.msk.f32.mxu0 %vm1053_vm2, %v1590_v19  ;;  %v2613_v24 = vpop.permute.xlu1 %2612  ;;  %v4492_v19 = vpack.c.bf16 %v868_v43, %v867_v47 }
 0x59f   : > { %4493 = vmatprep.subr.bf16.mxu0 %v4492_v19 }
 0x5a0   : > { %4114 = vmatmul.mubr.msk.f32.gmra.mrb[22].mxu0 %vm1053_vm2, %v1591_v10  ;;  %v869_v10 = vld [vmem:[%s6070_s7 + $0x10] sm:$0xff] }
 0x5a1   : > { %4571 = vmatpush3.bf16.xpose.msk.msra.mxu1 %vm5113_vm1, %v4566_v53 }
 0x5a8   : > { %4249 = vmatmul.mubr.msk.f32.vlgmr.msra.gmra.mrb[40].mxu1 %vm883_vm0, %v2601_v50  ;;  %v870_v50 = vld [vmem:[%s6070_s7 + $0x18] sm:$0xff] }
 0x5a9   : > { %4251 = vmatprep.mubr.msk.f32.mxu1 %vm883_vm0, %v2603_v13 }
 0x5ac   : > { %4252 = vmatmul.mubr.msk.f32.gmra.mrb[42].mxu1 %vm883_vm0, %v2605_v3 }
 0x5ad   : > { %4254 = vmatprep.mubr.msk.f32.mxu1 %vm883_vm0, %v2607_v56 }
 0x5b0   : > { %4255 = vmatmul.mubr.msk.f32.gmra.mrb[44].mxu1 %vm883_vm0, %v2609_v14  ;;  %v4496_v14 = vpack.c.bf16 %v870_v50, %v869_v10 }
 0x5b1   : > { %4257 = vmatprep.mubr.msk.f32.mxu1 %vm883_vm0, %v2611_v31 }
 0x5b4   : > { %4258 = vmatmul.mubr.msk.f32.gmra.mrb[46].mxu1 %vm883_vm0, %v2613_v24 }
 0x5c8   : > { %v2198_v5 = vpop.xlane.xlu0 %2197 }
 0x5c9   : > { %v2220_v17 = vsub.f32 %v5579_v26, %v2198_v5 }
 0x5cb   : > { %v2228_v62 = vmul.f32 1.442695, %v2220_v17 }
 0x5cc   : > { %v2201_v60 = vpop.xlane.xlu1 %2200  ;;  %v2204_v7 = vpop.xlane.xlu0 %2203 }
 0x5cd   : > { %4815 = vpow2.f32 %v2228_v62  ;;  %v2221_v55 = vsub.f32 %v5583_v36, %v2201_v60  ;;  %v2222_v11 = vsub.f32 %v5589_v39, %v2204_v7 }
 0x5cf   : > { %v2230_v35 = vmul.f32 1.442695, %v2221_v55  ;;  %v2232_v51 = vmul.f32 1.442695, %v2222_v11 }
 0x5d0   : > { %v2213_v52 = vpop.xlane.xlu1 %2212  ;;  %v2207_v9 = vpop.xlane.xlu0 %2206 }
 0x5d1   : > { %4817 = vpow2.f32 %v2230_v35  ;;  %v2225_v45 = vsub.f32 %v5601_v34, %v2213_v52  ;;  %v2223_v15 = vsub.f32 %v5594_v41, %v2207_v9 }
 0x5d2   : > { %4819 = vpow2.f32 %v2232_v51 }
 0x5d3   : > { %v2234_v33 = vmul.f32 1.442695, %v2223_v15  ;;  %v2238_v26 = vmul.f32 1.442695, %v2225_v45 }
 0x5d4   : > { %v2219_v37 = vpop.xlane.xlu1 %2218  ;;  %v2210_v38 = vpop.xlane.xlu0 %2209 }
 0x5d5   : > { %v2227_v40 = vsub.f32 %v5609_v0, %v2219_v37  ;;  %v2224_v36 = vsub.f32 %v5612_v46, %v2210_v38  ;;  %4821 = vpow2.f32 %v2234_v33 }
 0x5d6   : > { %4823 = vpow2.f32 %v2238_v26 }
 0x5d7   : > { %v5688_v39 = vpop.eup %4815  ;;  %v2236_v42 = vmul.f32 1.442695, %v2224_v36  ;;  %v2242_v16 = vmul.f32 1.442695, %v2227_v40 }
 0x5d8   : > { %v2216_v20 = vpop.xlane.xlu0 %2215  ;;  %v2244_v34 = vsel %vm1053_vm2, %v5688_v39, 0.0 }
 0x5d9   : > { %v2226_v41 = vsub.f32 %v5619_v32, %v2216_v20  ;;  %2245 = vadd.xlane.f32.xlu0 %v2244_v34  ;;  %4825 = vpow2.f32 %v2236_v42 }
 0x5da   : > { %4827 = vpow2.f32 %v2242_v16 }
 0x5db   : > { %v5693_v25 = vpop.eup %4817  ;;  %v2240_v63 = vmul.f32 1.442695, %v2226_v41 }
 0x5dc   : > { %v5695_v0 = vpop.eup %4819  ;;  %v2247_v46 = vsel %vm1053_vm2, %v5693_v25, 0.0 }
 0x5dd   : > { %4829 = vpow2.f32 %v2240_v63  ;;  %2248 = vadd.xlane.f32.xlu1 %v2247_v46  ;;  %v2250_v18 = vsel %vm1053_vm2, %v5695_v0, 0.0 }
 0x5de   : > { %2251 = vadd.xlane.f32.xlu0 %v2250_v18 }
 0x5df   : > { %v5701_v48 = vpop.eup %4821 }
 0x5e0   : > { %v2253_v32 = vsel %vm1053_vm2, %v5701_v48, 0.0  ;;  %v5705_v21 = vpop.eup %4823 }
 0x5e1   : > { %2254 = vadd.xlane.f32.xlu1 %v2253_v32  ;;  %v2259_v58 = vsel %vm1053_vm2, %v5705_v21, 0.0 }
 0x5e3   : > { %v5707_v57 = vpop.eup %4825 }
 0x5e4   : > { %v2256_v22 = vsel %vm1053_vm2, %v5707_v57, 0.0  ;;  %v5719_v1 = vpop.eup %4827 }
 0x5e5   : > { %2260 = vadd.xlane.f32.xlu1 %v2259_v58  ;;  %2257 = vadd.xlane.f32.xlu0 %v2256_v22  ;;  %v2265_v53 = vsel %vm1053_vm2, %v5719_v1, 0.0 }
 0x5e7   : > { %v5721_v54 = vpop.eup %4829 }
 0x5e8   : > { %v2262_v29 = vsel %vm1053_vm2, %v5721_v54, 0.0 }
 0x5e9   : > { %2266 = vadd.xlane.f32.xlu1 %v2265_v53  ;;  %2263 = vadd.xlane.f32.xlu0 %v2262_v29 }
 0x5fa   : > { %4717 = vrot.lane.b32.xlu1 %v5341_v23, %s4912_s14 }
 0x5fe   : > { %4722 = vrot.lane.b32.xlu1 %v5345_v27, %s4912_s14 }
 0x5ff   : > { %4712 = vrot.lane.b32.xlu0 %v5335_v12, %s4912_s14 }
 0x602   : > { %4727 = vrot.lane.b32.xlu1 %v5349_v44, %s4912_s14 }
 0x666   : > { %v2246_v13 = vpop.xlane.xlu0 %2245 }
 0x667   : > { %v4106_v3 = vpop.f32.mrb[16].mxu0  ;;  %4831 = vrcp.f32 %v2246_v13 }
 0x668   : > { %v1714_v56 = vpop.f32.mrb[17].mxu0 }
 0x669   : > { %4124 = vmatprep.mubr.msk.f32.mxu0 %vm883_vm0, %v1714_v56 }
 0x66a   : > { %v5748_v31 = vpop.xlane.xlu1 %2248  ;;  %4125 = vmatmul.mubr.msk.f32.vlgmr.msra.gmra.mrb[24].mxu0 %vm883_vm0, %v4106_v3 }
 0x66b   : > { %v4109_v24 = vpop.f32.mrb[18].mxu0  ;;  %4495 = vmatpush3.bf16.msra.mxu0 %v4492_v19  ;;  %v5752_v17 = vpop.xlane.xlu0 %2251  ;;  %4833 = vrcp.f32 %v5748_v31 }
 0x66c   : > { %v1724_v5 = vpop.f32.mrb[19].mxu0  ;;  %4497 = vmatprep.subr.bf16.mxu0 %v4496_v14  ;;  %4835 = vrcp.f32 %v5752_v17 }
 0x66d   : > { %4127 = vmatprep.mubr.msk.f32.mxu0 %vm883_vm0, %v1724_v5  ;;  %v6079_v5 = vld [vmem:[#allocation3_spill] sm:$0xff] }
 0x66e   : > { %v5754_v62 = vpop.xlane.xlu1 %2254  ;;  %4128 = vmatmul.mubr.msk.f32.gmra.mrb[26].mxu0 %vm883_vm0, %v4109_v24 }
 0x66f   : > { %v4112_v60 = vpop.f32.mrb[20].mxu0  ;;  %4499 = vmatpush3.bf16.msra.mxu0 %v4496_v14  ;;  %4837 = vrcp.f32 %v5754_v62 }
 0x670   : > { %v1734_v7 = vpop.f32.mrb[21].mxu0 }
 0x671   : > { %4130 = vmatprep.mubr.msk.f32.mxu0 %vm883_vm0, %v1734_v7  ;;  %v4832_v51 = vpop.eup %4831 }
 0x672   : > { %v5758_v55 = vpop.xlane.xlu1 %2260  ;;  %v5760_v11 = vpop.xlane.xlu0 %2257  ;;  %4131 = vmatmul.mubr.msk.f32.gmra.mrb[28].mxu0 %vm883_vm0, %v4112_v60  ;;  %v2276_v15 = vmul.f32 %v4832_v51, %v2246_v13 }
 0x673   : > { %v4115_v35 = vpop.f32.mrb[22].mxu0  ;;  %4839 = vrcp.f32 %v5760_v11 }
 0x674   : > { %v1744_v52 = vpop.f32.mrb[23].mxu0  ;;  %v2284_v37 = vsub.f32 2.0, %v2276_v15  ;;  %4841 = vrcp.f32 %v5758_v55 }
 0x675   : > { %4133 = vmatprep.mubr.msk.f32.mxu0 %vm883_vm0, %v1744_v52  ;;  %v5780_v41 = vpop.eup %4833 }
 0x676   : > { %v5766_v9 = vpop.xlane.xlu1 %2266  ;;  %v5768_v45 = vpop.xlane.xlu0 %2263  ;;  %4134 = vmatmul.mubr.msk.f32.gmra.mrb[30].mxu0 %vm883_vm0, %v4115_v35  ;;  %v2277_v47 = vmul.f32 %v5780_v41, %v5748_v31  ;;  %v4897_v35 = vld [vmem:[%s6067_s4 + $0x10] sm:$0xff] }
 0x677   : > { %4144 = vmatprep.mubr.msk.f32.mxu0 %vm883_vm0, %v5465_v8  ;;  %4843 = vrcp.f32 %v5768_v45  ;;  %v5797_v22 = vpop.eup %4835 }
 0x678   : > { %4845 = vrcp.f32 %v5766_v9  ;;  %v2278_v13 = vmul.f32 %v5797_v22, %v5752_v17  ;;  %v2285_v15 = vsub.f32 2.0, %v2277_v47 }
 0x679   : > { %v4838_v19 = vpop.eup %4837 }
 0x67a   : > { %v4718_v33 = vpop.permute.xlu1 %4717  ;;  %v4713_v26 = vpop.permute.xlu0 %4712  ;;  %4145 = vmatmul.mubr.msk.f32.vlgmr.msra.gmra.mrb[24].mxu0 %vm883_vm0, %v5463_v6 }
 0x67b   : > { %v4715_v38 = vunpack.i.h.bf16 %v4713_v26  ;;  %4147 = vmatprep.mubr.msk.f32.mxu0 %vm883_vm0, %v5469_v59  ;;  %v4250_v40 = vpop.f32.mrb[40].mxu1  ;;  %v4720_v36 = vunpack.i.h.bf16 %v4718_v33  ;;  %v4719_v42 = vunpack.i.l.bf16 %v4718_v33  ;;  %v4714_v8 = vunpack.i.l.bf16 %v4713_v26  ;;  %v4895_v59 = vld [vmem:[%s6067_s4 + $0x8] sm:$0xff] }
 0x67c   : > { %v2768_v16 = vmul.f32 0.17677669, %v4250_v40  ;;  %v2728_v20 = vpop.f32.mrb[41].mxu1  ;;  %v4899_v40 = vld [vmem:[%s6067_s4 + $0x18] sm:$0xff] }
 0x67d   : > { %v2767_v34 = vmul.f32 0.17677669, %v2728_v20  ;;  %v4524_v63 = vpack.c.bf16 %v4715_v38, %v4714_v8  ;;  %v4528_v30 = vpack.c.bf16 %v4720_v36, %v4719_v42  ;;  %v4840_v14 = vpop.eup %4839  ;;  %v2286_v36 = vsub.f32 2.0, %v2278_v13  ;;  %v6080_v42 = vld [vmem:[#allocation2_spill] sm:$0xff] }
 0x67e   : > { %v4723_v6 = vpop.permute.xlu1 %4722  ;;  %4148 = vmatmul.mubr.msk.f32.gmra.mrb[26].mxu0 %vm883_vm0, %v5467_v2  ;;  %v5788_v46 = vadd.f32 %v4895_v59, %v2768_v16  ;;  %v2292_v2 = vmul.f32 %v4832_v51, %v2284_v37  ;;  %v4842_v17 = vpop.eup %4841  ;;  %v4898_v37 = vld [vmem:[%s6067_s4 + $0x28] sm:$0xff]  ;;  %v2293_v59 = vmul.f32 %v5780_v41, %v2285_v15  ;;  %v4901_v41 = vld [vmem:[%s6067_s4 + $0x20] sm:$0xff] }
 0x67f   : > { %v4725_v18 = vunpack.i.h.bf16 %v4723_v6  ;;  %v4724_v32 = vunpack.i.l.bf16 %v4723_v6  ;;  %4150 = vmatprep.mubr.msk.f32.mxu0 %vm883_vm0, %v5473_v28  ;;  %v4253_v61 = vpop.f32.mrb[42].mxu1  ;;  %v5795_v58 = vadd.f32 %v4896_v49, %v2767_v34  ;;  %4525 = vmatprep.subr.bf16.mxu0 %v4524_v63 }
 0x680   : > { %v2738_v29 = vpop.f32.mrb[43].mxu1  ;;  %v2786_v53 = vsel %vm1053_vm2, %v5788_v46, -inf  ;;  %4527 = vmatpush3.bf16.msra.mxu0 %v4524_v63  ;;  %v2770_v10 = vmul.f32 0.17677669, %v4253_v61  ;;  %v2300_v52 = vmul.f32 %v5688_v39, %v2292_v2 }
 0x681   : > { %v2769_v28 = vmul.f32 0.17677669, %v2738_v29  ;;  %2787 = vmax.xlane.f32.xlu1 %v2786_v53  ;;  %v2783_v43 = vsel %vm1053_vm2, %v5795_v58, -inf  ;;  %4529 = vmatprep.subr.bf16.mxu0 %v4528_v30  ;;  %v4532_v3 = vpack.c.bf16 %v4725_v18, %v4724_v32  ;;  %v4844_v16 = vpop.eup %4843  ;;  %v2281_v32 = vmul.f32 %v4842_v17, %v5758_v55 }
 0x682   : > { %v4728_v50 = vpop.permute.xlu1 %4727  ;;  %2784 = vmax.xlane.f32.xlu0 %v2783_v43  ;;  %4151 = vmatmul.mubr.msk.f32.gmra.mrb[28].mxu0 %vm883_vm0, %v5471_v4  ;;  %v2279_v4 = vmul.f32 %v4838_v19, %v5754_v62  ;;  %v5829_v39 = vadd.f32 %v4899_v40, %v2770_v10  ;;  %v2280_v62 = vmul.f32 %v4840_v14, %v5760_v11  ;;  %v4900_v11 = vld [vmem:[%s6067_s4 + $0x38] sm:$0xff]  ;;  %v4846_v55 = vpop.eup %4845 }
 0x683   : > { %v4256_v56 = vpop.f32.mrb[44].mxu1  ;;  %v4730_v31 = vunpack.i.h.bf16 %v4728_v50  ;;  %v4729_v24 = vunpack.i.l.bf16 %v4728_v50  ;;  %4153 = vmatprep.mubr.msk.f32.mxu0 %vm883_vm0, %v6079_v5  ;;  %v5815_v51 = vadd.f32 %v4897_v35, %v2769_v28  ;;  %v2294_v29 = vmul.f32 %v5797_v22, %v2286_v36 }
 0x684   : > { %v2772_v60 = vmul.f32 0.17677669, %v4256_v56  ;;  %v2748_v7 = vpop.f32.mrb[45].mxu1  ;;  %4531 = vmatpush3.bf16.msra.mxu0 %v4528_v30  ;;  %v2287_v18 = vsub.f32 2.0, %v2279_v4  ;;  %v2792_v2 = vsel %vm1053_vm2, %v5829_v39, -inf  ;;  %v2288_v53 = vsub.f32 2.0, %v2280_v62 }
 0x685   : > { %v2771_v33 = vmul.f32 0.17677669, %v2748_v7  ;;  %4533 = vmatprep.subr.bf16.mxu0 %v4532_v3  ;;  %v2789_v26 = vsel %vm1053_vm2, %v5815_v51, -inf  ;;  %v4536_v20 = vpack.c.bf16 %v4730_v31, %v4729_v24  ;;  %v2282_v47 = vmul.f32 %v4844_v16, %v5768_v45 }
 0x686   : > { %v5824_v38 = vadd.f32 %v4898_v37, %v2772_v60  ;;  %2790 = vmax.xlane.f32.xlu0 %v2789_v26  ;;  %4154 = vmatmul.mubr.msk.f32.gmra.mrb[30].mxu0 %vm883_vm0, %v6080_v42  ;;  %v2301_v43 = vmul.f32 %v5693_v25, %v2293_v59  ;;  %v2295_v10 = vmul.f32 %v4838_v19, %v2287_v18  ;;  %v2289_v50 = vsub.f32 2.0, %v2281_v32 }
 0x687   : > { %v4259_v8 = vpop.f32.mrb[46].mxu1  ;;  %4200 = vmatprep.mubr.msk.f32.mxu0 %vm1053_vm2, %v2300_v52  ;;  %v5849_v30 = vadd.f32 %v4901_v41, %v2771_v33  ;;  %v2283_v13 = vmul.f32 %v4846_v55, %v5766_v9  ;;  %v2302_v56 = vmul.f32 %v5695_v0, %v2294_v29  ;;  %v2296_v31 = vmul.f32 %v4840_v14, %v2288_v53  ;;  %v878_v52 = vld [vmem:[%s6070_s7 + $0x58] sm:$0xff] }
 0x688   : > { %v2774_v34 = vmul.f32 0.17677669, %v4259_v8  ;;  %v2758_v63 = vpop.f32.mrb[47].mxu1  ;;  %v2798_v6 = vsel %vm1053_vm2, %v5824_v38, -inf  ;;  %4535 = vmatpush3.bf16.msra.mxu0 %v4532_v3  ;;  %v4902_v3 = vld [vmem:[%s6067_s4 + $0x30] sm:$0xff]  ;;  %v2290_v24 = vsub.f32 2.0, %v2282_v47  ;;  %v2303_v25 = vmul.f32 %v5701_v48, %v2295_v10 }
 0x689   : > { %2799 = vmax.xlane.f32.xlu1 %v2798_v6  ;;  %v2773_v49 = vmul.f32 0.17677669, %v2758_v63  ;;  %4537 = vmatprep.subr.bf16.mxu0 %v4536_v20  ;;  %v2795_v45 = vsel %vm1053_vm2, %v5849_v30, -inf  ;;  %v2297_v9 = vmul.f32 %v4842_v17, %v2289_v50  ;;  %v2291_v19 = vsub.f32 2.0, %v2283_v13  ;;  %v876_v17 = vld [vmem:[%s6070_s7 + $0x48] sm:$0xff] }
 0x68a   : > { %v5842_v61 = vadd.f32 %v4900_v11, %v2774_v34  ;;  %2793 = vmax.xlane.f32.xlu0 %v2792_v2  ;;  %v2304_v60 = vmul.f32 %v5707_v57, %v2296_v31  ;;  %v2298_v7 = vmul.f32 %v4844_v16, %v2290_v24  ;;  %v875_v57 = vld [vmem:[%s6070_s7 + $0x40] sm:$0xff] }
 0x68b   : > { %v5860_v22 = vadd.f32 %v4902_v3, %v2773_v49  ;;  %v2305_v0 = vmul.f32 %v5705_v21, %v2297_v9  ;;  %v2299_v14 = vmul.f32 %v4846_v55, %v2291_v19  ;;  %v877_v21 = vld [vmem:[%s6070_s7 + $0x50] sm:$0xff] }
 0x68c   : > { %v2804_v28 = vsel %vm1053_vm2, %v5842_v61, -inf  ;;  %4539 = vmatpush3.bf16.msra.mxu0 %v4536_v20  ;;  %v2306_v35 = vmul.f32 %v5721_v54, %v2298_v7  ;;  %v4540_v54 = vpack.c.bf16 %v876_v17, %v875_v57 }
 0x68d   : > { %2805 = vmax.xlane.f32.xlu1 %v2804_v28  ;;  %v2801_v5 = vsel %vm1053_vm2, %v5860_v22, -inf  ;;  %v2307_v48 = vmul.f32 %v5719_v1, %v2299_v14  ;;  %v4544_v1 = vpack.c.bf16 %v878_v52, %v877_v21 }
 0x68e   : > { %2796 = vmax.xlane.f32.xlu0 %v2795_v45  ;;  %4541 = vmatprep.subr.bf16.mxu0 %v4540_v54 }
 0x68f   : > { %4201 = vmatmul.mubr.msk.f32.vlgmr.msra.gmra.mrb[32].mxu0 %vm1053_vm2, %v2301_v43 }
 0x690   : > { %4203 = vmatprep.mubr.msk.f32.mxu0 %vm1053_vm2, %v2302_v56  ;;  %4543 = vmatpush3.bf16.msra.mxu0 %v4540_v54 }
 0x691   : > { %4545 = vmatprep.subr.bf16.mxu0 %v4544_v1 }
 0x692   : > { %2802 = vmax.xlane.f32.xlu0 %v2801_v5 }
 0x693   : > { %4204 = vmatmul.mubr.msk.f32.gmra.mrb[34].mxu0 %vm1053_vm2, %v2303_v25 }
 0x694   : > { %4206 = vmatprep.mubr.msk.f32.mxu0 %vm1053_vm2, %v2304_v60  ;;  %4547 = vmatpush3.bf16.msra.mxu0 %v4544_v1 }
 0x697   : > { %4207 = vmatmul.mubr.msk.f32.gmra.mrb[36].mxu0 %vm1053_vm2, %v2305_v0 }
 0x698   : > { %4209 = vmatprep.mubr.msk.f32.mxu0 %vm1053_vm2, %v2306_v35 }
 0x69b   : > { %4210 = vmatmul.mubr.msk.f32.gmra.mrb[38].mxu0 %vm1053_vm2, %v2307_v48 }
 0x70e   : > { %v2788_v15 = vpop.xlane.xlu1 %2787 }
 0x70f   : > { %v2808_v4 = vsub.f32 %v5788_v46, %v2788_v15  ;;  %v2785_v33 = vpop.xlane.xlu0 %2784 }
 0x710   : > { %v2807_v26 = vsub.f32 %v5795_v58, %v2785_v33 }
 0x711   : > { %v2817_v37 = vmul.f32 1.442695, %v2808_v4 }
 0x712   : > { %v2815_v40 = vmul.f32 1.442695, %v2807_v26 }
 0x713   : > { %4847 = vpow2.f32 %v2817_v37  ;;  %v2791_v36 = vpop.xlane.xlu0 %2790 }
 0x714   : > { %4849 = vpow2.f32 %v2815_v40  ;;  %v2809_v62 = vsub.f32 %v5815_v51, %v2791_v36 }
 0x716   : > { %v2800_v42 = vpop.xlane.xlu1 %2799  ;;  %v2819_v8 = vmul.f32 1.442695, %v2809_v62 }
 0x717   : > { %v2812_v16 = vsub.f32 %v5824_v38, %v2800_v42  ;;  %v2794_v20 = vpop.xlane.xlu0 %2793 }
 0x718   : > { %4851 = vpow2.f32 %v2819_v8  ;;  %v2810_v34 = vsub.f32 %v5829_v39, %v2794_v20 }
 0x719   : > { %v2825_v46 = vmul.f32 1.442695, %v2812_v16 }
 0x71a   : > { %v2806_v63 = vpop.xlane.xlu1 %2805  ;;  %v2821_v6 = vmul.f32 1.442695, %v2810_v34 }
 0x71b   : > { %v2814_v58 = vsub.f32 %v5842_v61, %v2806_v63  ;;  %v2797_v59 = vpop.xlane.xlu0 %2796 }
 0x71c   : > { %4853 = vpow2.f32 %v2821_v6  ;;  %v2811_v32 = vsub.f32 %v5849_v30, %v2797_v59 }
 0x71d   : > { %v5897_v18 = vpop.eup %4847  ;;  %4855 = vpow2.f32 %v2825_v46  ;;  %v2829_v11 = vmul.f32 1.442695, %v2814_v58 }
 0x71e   : > { %v5900_v51 = vpop.eup %4849  ;;  %v2834_v38 = vsel %vm1053_vm2, %v5897_v18, 0.0  ;;  %v2823_v49 = vmul.f32 1.442695, %v2811_v32 }
 0x71f   : > { %2835 = vadd.xlane.f32.xlu1 %v2834_v38  ;;  %v2831_v39 = vsel %vm1053_vm2, %v5900_v51, 0.0  ;;  %v2803_v2 = vpop.xlane.xlu0 %2802 }
 0x720   : > { %2832 = vadd.xlane.f32.xlu0 %v2831_v39  ;;  %4857 = vpow2.f32 %v2823_v49  ;;  %v2813_v61 = vsub.f32 %v5860_v22, %v2803_v2  ;;  %v879_v39 = vld [vmem:[%s6070_s7 + $0x60] sm:$0xff]  ;;  %v880_v2 = vld [vmem:[%s6070_s7 + $0x68] sm:$0xff] }
 0x721   : > { %4859 = vpow2.f32 %v2829_v11 }
 0x722   : > { %v5907_v41 = vpop.eup %4851  ;;  %v2827_v30 = vmul.f32 1.442695, %v2813_v61 }
 0x723   : > { %v2837_v55 = vsel %vm1053_vm2, %v5907_v41, 0.0 }
 0x724   : > { %4861 = vpow2.f32 %v2827_v30  ;;  %2838 = vadd.xlane.f32.xlu0 %v2837_v55 }
 0x726   : > { %v5911_v29 = vpop.eup %4853 }
 0x727   : > { %v2840_v53 = vsel %vm1053_vm2, %v5911_v29, 0.0  ;;  %v5915_v47 = vpop.eup %4855 }
 0x728   : > { %2841 = vadd.xlane.f32.xlu1 %v2840_v53  ;;  %v2846_v43 = vsel %vm1053_vm2, %v5915_v47, 0.0 }
 0x72a   : > { %v5917_v28 = vpop.eup %4857 }
 0x72b   : > { %v2843_v10 = vsel %vm1053_vm2, %v5917_v28, 0.0  ;;  %v5923_v50 = vpop.eup %4859 }
 0x72c   : > { %2847 = vadd.xlane.f32.xlu1 %v2846_v43  ;;  %2844 = vadd.xlane.f32.xlu0 %v2843_v10  ;;  %v2852_v3 = vsel %vm1053_vm2, %v5923_v50, 0.0  ;;  %v4588_v10 = vpack.c.bf16 %v880_v2, %v879_v39  ;;  %v3204_v39 = vld [vmem:[%s5987_s16 + $0x20] sm:$0xff] }
 0x72e   : > { %v5925_v13 = vpop.eup %4861 }
 0x72f   : > { %v2849_v22 = vsel %vm1053_vm2, %v5925_v13, 0.0 }
 0x730   : > { %2853 = vadd.xlane.f32.xlu1 %v2852_v3  ;;  %2850 = vadd.xlane.f32.xlu0 %v2849_v22  ;;  %v881_v3 = vld [vmem:[%s6070_s7 + $0x70] sm:$0xff]  ;;  %v882_v22 = vld [vmem:[%s6070_s7 + $0x78] sm:$0xff] }
 0x741   : > { %4737 = vrot.lane.b32.xlu1 %v5341_v23, %s4913_s15 }
 0x745   : > { %4742 = vrot.lane.b32.xlu1 %v5345_v27, %s4913_s15 }
 0x746   : > { %4732 = vrot.lane.b32.xlu0 %v5335_v12, %s4913_s15 }
 0x749   : > { %4747 = vrot.lane.b32.xlu1 %v5349_v44, %s4913_s15 }
 0x762   : > { %v4202_v45 = vpop.f32.mrb[32].mxu0 }
 0x763   : > { %v2422_v56 = vpop.f32.mrb[33].mxu0 }
 0x764   : > { %4220 = vmatprep.mubr.msk.f32.mxu0 %vm883_vm0, %v2422_v56 }
 0x765   : > { %4221 = vmatmul.mubr.msk.f32.vlgmr.msra.gmra.mrb[24].mxu0 %vm883_vm0, %v4202_v45 }
 0x766   : > { %v4205_v31 = vpop.f32.mrb[34].mxu0 }
 0x767   : > { %v2432_v24 = vpop.f32.mrb[35].mxu0 }
 0x768   : > { %4223 = vmatprep.mubr.msk.f32.mxu0 %vm883_vm0, %v2432_v24 }
 0x769   : > { %4224 = vmatmul.mubr.msk.f32.gmra.mrb[26].mxu0 %vm883_vm0, %v4205_v31 }
 0x76a   : > { %v4208_v23 = vpop.f32.mrb[36].mxu0 }
 0x76b   : > { %v2442_v27 = vpop.f32.mrb[37].mxu0 }
 0x76c   : > { %4226 = vmatprep.mubr.msk.f32.mxu0 %vm883_vm0, %v2442_v27 }
 0x76d   : > { %4227 = vmatmul.mubr.msk.f32.gmra.mrb[28].mxu0 %vm883_vm0, %v4208_v23  ;;  %v4592_v23 = vpack.c.bf16 %v882_v22, %v881_v3 }
 0x76e   : > { %v4211_v12 = vpop.f32.mrb[38].mxu0 }
 0x76f   : > { %v2452_v44 = vpop.f32.mrb[39].mxu0 }
 0x770   : > { %4229 = vmatprep.mubr.msk.f32.mxu0 %vm883_vm0, %v2452_v44 }
 0x771   : > { %4230 = vmatmul.mubr.msk.f32.gmra.mrb[30].mxu0 %vm883_vm0, %v4211_v12 }
 0x7ac   : > { %v2836_v9 = vpop.xlane.xlu1 %2835 }
 0x7ad   : > { %v2833_v25 = vpop.xlane.xlu0 %2832 }
 0x7ae   : > { %4863 = vrcp.f32 %v2833_v25 }
 0x7af   : > { %4865 = vrcp.f32 %v2836_v9 }
 0x7b1   : > { %v2839_v19 = vpop.xlane.xlu0 %2838 }
 0x7b2   : > { %4867 = vrcp.f32 %v2839_v19 }
 0x7b5   : > { %v2842_v5 = vpop.xlane.xlu1 %2841 }
 0x7b6   : > { %4869 = vrcp.f32 %v2842_v5 }
 0x7b8   : > { %v4864_v60 = vpop.eup %4863 }
 0x7b9   : > { %v2863_v7 = vmul.f32 %v4864_v60, %v2833_v25  ;;  %v2848_v0 = vpop.xlane.xlu1 %2847  ;;  %v2845_v14 = vpop.xlane.xlu0 %2844 }
 0x7ba   : > { %4871 = vrcp.f32 %v2845_v14  ;;  %v4866_v37 = vpop.eup %4865 }
 0x7bb   : > { %v2871_v35 = vsub.f32 2.0, %v2863_v7  ;;  %4873 = vrcp.f32 %v2848_v0  ;;  %v2864_v16 = vmul.f32 %v4866_v37, %v2836_v9 }
 0x7bc   : > { %v4868_v36 = vpop.eup %4867 }
 0x7bd   : > { %v2879_v48 = vmul.f32 %v4864_v60, %v2871_v35  ;;  %v2854_v57 = vpop.xlane.xlu1 %2853  ;;  %v2851_v17 = vpop.xlane.xlu0 %2850  ;;  %v2865_v34 = vmul.f32 %v4868_v36, %v2839_v19  ;;  %v2872_v32 = vsub.f32 2.0, %v2864_v16 }
 0x7be   : > { %4875 = vrcp.f32 %v2851_v17 }
 0x7bf   : > { %v2887_v21 = vmul.f32 %v5900_v51, %v2879_v48  ;;  %4877 = vrcp.f32 %v2854_v57  ;;  %v2873_v11 = vsub.f32 2.0, %v2865_v34  ;;  %v2880_v55 = vmul.f32 %v4866_v37, %v2872_v32 }
 0x7c0   : > { %v4870_v20 = vpop.eup %4869 }
 0x7c1   : > { %4276 = vmatprep.mubr.msk.f32.mxu0 %vm1053_vm2, %v2887_v21  ;;  %v4738_v54 = vpop.permute.xlu1 %4737  ;;  %v4733_v52 = vpop.permute.xlu0 %4732  ;;  %v2866_v51 = vmul.f32 %v4870_v20, %v2842_v5  ;;  %v2881_v56 = vmul.f32 %v4868_v36, %v2873_v11  ;;  %v2888_v27 = vmul.f32 %v5897_v18, %v2880_v55 }
 0x7c2   : > { %v4740_v1 = vunpack.i.h.bf16 %v4738_v54  ;;  %v4739_v15 = vunpack.i.l.bf16 %v4738_v54  ;;  %v4735_v4 = vunpack.i.h.bf16 %v4733_v52  ;;  %v4734_v33 = vunpack.i.l.bf16 %v4733_v52  ;;  %v3614_v52 = vld [vmem:[%s6071_s8] ss:$0 sm:$0xff] }
 0x7c3   : > { %v2874_v53 = vsub.f32 2.0, %v2866_v51  ;;  %v2889_v9 = vmul.f32 %v5907_v41, %v2881_v56 }
 0x7c4   : > { %v4572_v26 = vpack.c.bf16 %v4735_v4, %v4734_v33  ;;  %v4576_v62 = vpack.c.bf16 %v4740_v1, %v4739_v15  ;;  %v4872_v46 = vpop.eup %4871  ;;  %v3201_v15 = vld [vmem:[%s5987_s16 + $0x8] sm:$0xff] }
 0x7c5   : > { %v4743_v40 = vpop.permute.xlu1 %4742  ;;  %v4874_v38 = vpop.eup %4873  ;;  %v2867_v49 = vmul.f32 %v4872_v46, %v2845_v14  ;;  %v2882_v12 = vmul.f32 %v4870_v20, %v2874_v53 }
 0x7c6   : > { %v4745_v42 = vunpack.i.h.bf16 %v4743_v40  ;;  %v4744_v8 = vunpack.i.l.bf16 %v4743_v40  ;;  %4573 = vmatprep.subr.bf16.mxu0 %v4572_v26  ;;  %v2868_v43 = vmul.f32 %v4874_v38, %v2848_v0 }
 0x7c7   : > { %4575 = vmatpush3.bf16.msra.mxu0 %v4572_v26  ;;  %v2875_v31 = vsub.f32 2.0, %v2867_v49  ;;  %v2890_v60 = vmul.f32 %v5911_v29, %v2882_v12  ;;  %v3200_v26 = vld [vmem:[%s5987_s16] sm:$0xff]  ;;  %v3207_v49 = vld [vmem:[%s5987_s16 + $0x38] sm:$0xff] }
 0x7c8   : > { %4577 = vmatprep.subr.bf16.mxu0 %v4576_v62  ;;  %v4580_v6 = vpack.c.bf16 %v4745_v42, %v4744_v8  ;;  %v4876_v61 = vpop.eup %4875  ;;  %v2876_v44 = vsub.f32 2.0, %v2868_v43  ;;  %v3203_v42 = vld [vmem:[%s5987_s16 + $0x18] sm:$0xff]  ;;  %v3206_v43 = vld [vmem:[%s5987_s16 + $0x30] sm:$0xff] }
 0x7c9   : > { %v4748_v63 = vpop.permute.xlu1 %4747  ;;  %v4878_v45 = vpop.eup %4877  ;;  %v2869_v24 = vmul.f32 %v4876_v61, %v2851_v17  ;;  %v2883_v19 = vmul.f32 %v4872_v46, %v2875_v31  ;;  %v3205_v46 = vld [vmem:[%s5987_s16 + $0x28] sm:$0xff] }
 0x7ca   : > { %v4750_v58 = vunpack.i.h.bf16 %v4748_v63  ;;  %v4749_v59 = vunpack.i.l.bf16 %v4748_v63  ;;  %v2870_v25 = vmul.f32 %v4878_v45, %v2854_v57  ;;  %v2884_v7 = vmul.f32 %v4874_v38, %v2876_v44 }
 0x7cb   : > { %4579 = vmatpush3.bf16.msra.mxu0 %v4576_v62  ;;  %v2877_v5 = vsub.f32 2.0, %v2869_v24  ;;  %v2891_v18 = vmul.f32 %v5917_v28, %v2883_v19 }
 0x7cc   : > { %4581 = vmatprep.subr.bf16.mxu0 %v4580_v6  ;;  %v4584_v30 = vpack.c.bf16 %v4750_v58, %v4749_v59  ;;  %v2878_v0 = vsub.f32 2.0, %v2870_v25  ;;  %v2892_v41 = vmul.f32 %v5915_v47, %v2884_v7 }
 0x7cd   : > { %v2885_v14 = vmul.f32 %v4876_v61, %v2877_v5 }
 0x7ce   : > { %v2886_v35 = vmul.f32 %v4878_v45, %v2878_v0 }
 0x7cf   : > { %4583 = vmatpush3.bf16.msra.mxu0 %v4580_v6  ;;  %v2893_v48 = vmul.f32 %v5925_v13, %v2885_v14  ;;  %v3202_v6 = vld [vmem:[%s5987_s16 + $0x10] sm:$0xff] }
 0x7d0   : > { %4585 = vmatprep.subr.bf16.mxu0 %v4584_v30  ;;  %v2894_v29 = vmul.f32 %v5923_v50, %v2886_v35 }
 0x7d3   : > { %4587 = vmatpush3.bf16.msra.mxu0 %v4584_v30 }
 0x7d4   : > { %4589 = vmatprep.subr.bf16.mxu0 %v4588_v10 }
 0x7d6   : > { %4277 = vmatmul.mubr.msk.f32.vlgmr.msra.gmra.mrb[40].mxu0 %vm1053_vm2, %v2888_v27 }
 0x7d7   : > { %4279 = vmatprep.mubr.msk.f32.mxu0 %vm1053_vm2, %v2889_v9  ;;  %4591 = vmatpush3.bf16.msra.mxu0 %v4588_v10 }
 0x7d8   : > { %4593 = vmatprep.subr.bf16.mxu0 %v4592_v23 }
 0x7da   : > { %4280 = vmatmul.mubr.msk.f32.gmra.mrb[42].mxu0 %vm1053_vm2, %v2890_v60 }
 0x7db   : > { %4282 = vmatprep.mubr.msk.f32.mxu0 %vm1053_vm2, %v2891_v18  ;;  %4595 = vmatpush3.bf16.msra.mxu0 %v4592_v23 }
 0x7de   : > { %4283 = vmatmul.mubr.msk.f32.gmra.mrb[44].mxu0 %vm1053_vm2, %v2892_v41 }
 0x7df   : > { %4285 = vmatprep.mubr.msk.f32.mxu0 %vm1053_vm2, %v2893_v48 }
 0x7e2   : > { %4286 = vmatmul.mubr.msk.f32.gmra.mrb[46].mxu0 %vm1053_vm2, %v2894_v29 }
 0x8a9   : > { %v4278_v28 = vpop.f32.mrb[40].mxu0 }
 0x8aa   : > { %v3009_v57 = vpop.f32.mrb[41].mxu0 }
 0x8ab   : > { %4296 = vmatprep.mubr.msk.f32.mxu0 %vm883_vm0, %v3009_v57 }
 0x8ac   : > { %4297 = vmatmul.mubr.msk.f32.vlgmr.msra.gmra.mrb[24].mxu0 %vm883_vm0, %v4278_v28 }
 0x8ad   : > { %v4281_v17 = vpop.f32.mrb[42].mxu0 }
 0x8ae   : > { %v3019_v47 = vpop.f32.mrb[43].mxu0 }
 0x8af   : > { %4299 = vmatprep.mubr.msk.f32.mxu0 %vm883_vm0, %v3019_v47 }
 0x8b0   : > { %4300 = vmatmul.mubr.msk.f32.gmra.mrb[26].mxu0 %vm883_vm0, %v4281_v17 }
 0x8b1   : > { %v4284_v13 = vpop.f32.mrb[44].mxu0 }
 0x8b2   : > { %v3029_v21 = vpop.f32.mrb[45].mxu0 }
 0x8b3   : > { %4302 = vmatprep.mubr.msk.f32.mxu0 %vm883_vm0, %v3029_v21 }
 0x8b4   : > { %4303 = vmatmul.mubr.msk.f32.gmra.mrb[28].mxu0 %vm883_vm0, %v4284_v13 }
 0x8b5   : > { %v4287_v50 = vpop.f32.mrb[46].mxu0 }
 0x8b6   : > { %v3039_v54 = vpop.f32.mrb[47].mxu0 }
 0x8b7   : > { %4305 = vmatprep.mubr.msk.f32.mxu0 %vm883_vm0, %v3039_v54 }
 0x8b8   : > { %4306 = vmatmul.mubr.msk.f32.gmra.mrb[30].mxu0 %vm883_vm0, %v4287_v50 }
 0x97f   : > { %v4298_v1 = vpop.f32.mrb[24].mxu0 }
 0x980   : > { %v3193_v4 = vadd.f32 %v4298_v1, %v3614_v52  ;;  %v3138_v33 = vpop.f32.mrb[25].mxu0 }
 0x981   : > { %v3192_v37 = vadd.f32 %v3614_v52, %v3138_v33 }
 0x982   : > { %v3209_v40 = vadd.f32 %v3201_v15, %v3193_v4 }
 0x983   : > { %v3208_v36 = vadd.f32 %v3200_v26, %v3192_v37  ;;  %v4301_v62 = vpop.f32.mrb[26].mxu0 }
 0x984   : > { %v3195_v8 = vadd.f32 %v4301_v62, %v3614_v52  ;;  %3218 = vadd.xlane.f32.xlu1 %v3209_v40  ;;  %v3148_v16 = vpop.f32.mrb[27].mxu0 }
 0x985   : > { %3216 = vadd.xlane.f32.xlu0 %v3208_v36  ;;  %v3194_v34 = vadd.f32 %v3614_v52, %v3148_v16 }
 0x986   : > { %v3211_v20 = vadd.f32 %v3203_v42, %v3195_v8 }
 0x987   : > { %v4304_v63 = vpop.f32.mrb[28].mxu0  ;;  %v3210_v51 = vadd.f32 %v3202_v6, %v3194_v34 }
 0x988   : > { %v3197_v58 = vadd.f32 %v4304_v63, %v3614_v52  ;;  %v3158_v59 = vpop.f32.mrb[29].mxu0 }
 0x989   : > { %3222 = vadd.xlane.f32.xlu0 %v3211_v20  ;;  %v3196_v38 = vadd.f32 %v3614_v52, %v3158_v59 }
 0x98a   : > { %v3213_v32 = vadd.f32 %v3205_v46, %v3197_v58 }
 0x98b   : > { %v4307_v11 = vpop.f32.mrb[30].mxu0  ;;  %v3212_v55 = vadd.f32 %v3204_v39, %v3196_v38 }
 0x98c   : > { %v3199_v2 = vadd.f32 %v4307_v11, %v3614_v52  ;;  %3226 = vadd.xlane.f32.xlu1 %v3213_v32  ;;  %v3168_v61 = vpop.f32.mrb[31].mxu0 }
 0x98d   : > { %3220 = vadd.xlane.f32.xlu0 %v3210_v51  ;;  %v3198_v53 = vadd.f32 %v3614_v52, %v3168_v61 }
 0x98e   : > { %v3215_v30 = vadd.f32 %v3207_v49, %v3199_v2  ;;  %v3616_v2 = vld [vmem:[%s6073_s10] ss:$0 sm:$0xff] }
 0x98f   : > { %v3214_v10 = vadd.f32 %v3206_v43, %v3198_v53 }
 0x990   : > { %3230 = vadd.xlane.f32.xlu1 %v3215_v30 }
 0x991   : > { %3224 = vadd.xlane.f32.xlu0 %v3212_v55 }
 0x995   : > { %3228 = vadd.xlane.f32.xlu0 %v3214_v10 }
 0xa11   : > { %v3219_v3 = vpop.xlane.xlu1 %3218 }
 0xa12   : > { %v3234_v22 = vmul.f32 0.0078125, %v3219_v3  ;;  %v3217_v45 = vpop.xlane.xlu0 %3216 }
 0xa13   : > { %v3233_v56 = vmul.f32 0.0078125, %v3217_v45 }
 0xa14   : > { %v6000_v31 = vsub.f32 %v3209_v40, %v3234_v22 }
 0xa15   : > { %v6002_v24 = vsub.f32 %v3208_v36, %v3233_v56 }
 0xa16   : > { %v3223_v23 = vpop.xlane.xlu0 %3222  ;;  %v3250_v27 = vmul.f32 %v6000_v31, %v6000_v31 }
 0xa17   : > { %v3236_v12 = vmul.f32 0.0078125, %v3223_v23  ;;  %v3249_v44 = vmul.f32 %v6002_v24, %v6002_v24 }
 0xa18   : > { %3259 = vadd.xlane.f32.xlu1 %v3250_v27 }
 0xa19   : > { %v6008_v25 = vsub.f32 %v3211_v20, %v3236_v12  ;;  %v3227_v9 = vpop.xlane.xlu1 %3226  ;;  %3257 = vadd.xlane.f32.xlu0 %v3249_v44 }
 0xa1a   : > { %v3238_v19 = vmul.f32 0.0078125, %v3227_v9  ;;  %v3221_v5 = vpop.xlane.xlu0 %3220 }
 0xa1b   : > { %v3235_v60 = vmul.f32 0.0078125, %v3221_v5  ;;  %v3252_v7 = vmul.f32 %v6008_v25, %v6008_v25 }
 0xa1c   : > { %v6012_v0 = vsub.f32 %v3213_v32, %v3238_v19 }
 0xa1d   : > { %v6014_v18 = vsub.f32 %v3210_v51, %v3235_v60  ;;  %3263 = vadd.xlane.f32.xlu1 %v3252_v7  ;;  %v3231_v14 = vpop.xlane.xlu1 %3230  ;;  %v3615_v51 = vld [vmem:[%s6072_s9] ss:$0 sm:$0xff] }
 0xa1e   : > { %v3240_v41 = vmul.f32 0.0078125, %v3231_v14  ;;  %v3225_v35 = vpop.xlane.xlu0 %3224  ;;  %v3254_v48 = vmul.f32 %v6012_v0, %v6012_v0 }
 0xa1f   : > { %v3237_v29 = vmul.f32 0.0078125, %v3225_v35  ;;  %v3251_v28 = vmul.f32 %v6014_v18, %v6014_v18 }
 0xa20   : > { %v6020_v57 = vsub.f32 %v3215_v30, %v3240_v41 }
 0xa21   : > { %v6022_v17 = vsub.f32 %v3212_v55, %v3237_v29  ;;  %3267 = vadd.xlane.f32.xlu1 %v3254_v48  ;;  %3261 = vadd.xlane.f32.xlu0 %v3251_v28 }
 0xa22   : > { %v3229_v47 = vpop.xlane.xlu0 %3228  ;;  %v3256_v13 = vmul.f32 %v6020_v57, %v6020_v57 }
 0xa23   : > { %v3239_v21 = vmul.f32 0.0078125, %v3229_v47  ;;  %v3253_v50 = vmul.f32 %v6022_v17, %v6022_v17 }
 0xa25   : > { %v6028_v54 = vsub.f32 %v3214_v10, %v3239_v21  ;;  %3271 = vadd.xlane.f32.xlu1 %v3256_v13  ;;  %3265 = vadd.xlane.f32.xlu0 %v3253_v50 }
 0xa27   : > { %v3255_v52 = vmul.f32 %v6028_v54, %v6028_v54 }
 0xa29   : > { %3269 = vadd.xlane.f32.xlu0 %v3255_v52 }
 0xaa5   : > { %v3260_v1 = vpop.xlane.xlu1 %3259 }
 0xaa6   : > { %v3274_v15 = vmul.f32 0.0078125, %v3260_v1  ;;  %v3258_v4 = vpop.xlane.xlu0 %3257 }
 0xaa7   : > { %v3273_v33 = vmul.f32 0.0078125, %v3258_v4 }
 0xaa8   : > { %v3282_v26 = vadd.f32 1e-05, %v3274_v15 }
 0xaa9   : > { %v3281_v37 = vadd.f32 1e-05, %v3273_v33 }
 0xaaa   : > { %4879 = vrsqrt.f32 %v3282_v26  ;;  %v3264_v40 = vpop.xlane.xlu1 %3263 }
 0xaab   : > { %4881 = vrsqrt.f32 %v3281_v37  ;;  %v3276_v36 = vmul.f32 0.0078125, %v3264_v40 }
 0xaad   : > { %v3284_v62 = vadd.f32 1e-05, %v3276_v36 }
 0xaae   : > { %v3268_v42 = vpop.xlane.xlu1 %3267  ;;  %v3262_v8 = vpop.xlane.xlu0 %3261 }
 0xaaf   : > { %4883 = vrsqrt.f32 %v3284_v62  ;;  %v3278_v16 = vmul.f32 0.0078125, %v3268_v42  ;;  %v3275_v20 = vmul.f32 0.0078125, %v3262_v8 }
 0xab1   : > { %v3286_v34 = vadd.f32 1e-05, %v3278_v16  ;;  %v3283_v63 = vadd.f32 1e-05, %v3275_v20 }
 0xab2   : > { %v3272_v46 = vpop.xlane.xlu1 %3271  ;;  %v3266_v6 = vpop.xlane.xlu0 %3265 }
 0xab3   : > { %4885 = vrsqrt.f32 %v3286_v34  ;;  %v3280_v58 = vmul.f32 0.0078125, %v3272_v46  ;;  %v3277_v59 = vmul.f32 0.0078125, %v3266_v6 }
 0xab4   : > { %v4880_v32 = vpop.eup %4879  ;;  %4887 = vrsqrt.f32 %v3283_v63 }
 0xab5   : > { %v4882_v38 = vpop.eup %4881  ;;  %v3298_v11 = vmul.f32 %v4880_v32, %v6000_v31  ;;  %v3288_v49 = vadd.f32 1e-05, %v3280_v58  ;;  %v3285_v39 = vadd.f32 1e-05, %v3277_v59 }
 0xab6   : > { %v3297_v61 = vmul.f32 %v4882_v38, %v6002_v24  ;;  %v3270_v30 = vpop.xlane.xlu0 %3269 }
 0xab7   : > { %v3313_v55 = vmul.f32 %v3615_v51, %v3298_v11  ;;  %4889 = vrsqrt.f32 %v3288_v49  ;;  %v3279_v53 = vmul.f32 0.0078125, %v3270_v30 }
 0xab8   : > { %v3312_v43 = vmul.f32 %v3615_v51, %v3297_v61  ;;  %4891 = vrsqrt.f32 %v3285_v39 }
 0xab9   : > { %v4884_v10 = vpop.eup %4883  ;;  %v3328_v3 = vadd.f32 %v3616_v2, %v3313_v55  ;;  %v3287_v22 = vadd.f32 1e-05, %v3279_v53 }
 0xaba   : > { %v3327_v45 = vadd.f32 %v3616_v2, %v3312_v43  ;;  %v3300_v56 = vmul.f32 %v4884_v10, %v6008_v25 }
 0xabb   : > { %3336 = vst [vmem:[%s6044_s19 + $0x8] sm:$0xff] %v3328_v3  ;;  %4893 = vrsqrt.f32 %v3287_v22 }
 0xabc   : > { %3335 = vst [vmem:[%s6044_s19] sm:$0xff] %v3327_v45  ;;  %v3315_v31 = vmul.f32 %v3615_v51, %v3300_v56 }
 0xabd   : > { %v4886_v24 = vpop.eup %4885 }
 0xabe   : > { %v4888_v23 = vpop.eup %4887  ;;  %v3330_v27 = vadd.f32 %v3616_v2, %v3315_v31  ;;  %v3302_v12 = vmul.f32 %v4886_v24, %v6012_v0 }
 0xabf   : > { %v3299_v44 = vmul.f32 %v4888_v23, %v6014_v18 }
 0xac0   : > { %3338 = vst [vmem:[%s6044_s19 + $0x18] sm:$0xff] %v3330_v27  ;;  %v3317_v9 = vmul.f32 %v3615_v51, %v3302_v12 }
 0xac1   : > { %v4890_v19 = vpop.eup %4889  ;;  %v3314_v5 = vmul.f32 %v3615_v51, %v3299_v44 }
 0xac2   : > { %v4892_v25 = vpop.eup %4891  ;;  %v3332_v60 = vadd.f32 %v3616_v2, %v3317_v9  ;;  %v3304_v7 = vmul.f32 %v4890_v19, %v6020_v57 }
 0xac3   : > { %v3329_v14 = vadd.f32 %v3616_v2, %v3314_v5  ;;  %v3301_v41 = vmul.f32 %v4892_v25, %v6022_v17 }
 0xac4   : > { %3340 = vst [vmem:[%s6044_s19 + $0x28] sm:$0xff] %v3332_v60  ;;  %v3319_v35 = vmul.f32 %v3615_v51, %v3304_v7 }
 0xac5   : > { %v4894_v48 = vpop.eup %4893  ;;  %3337 = vst [vmem:[%s6044_s19 + $0x10] sm:$0xff] %v3329_v14  ;;  %v3316_v0 = vmul.f32 %v3615_v51, %v3301_v41 }
 0xac6   : > { %v3334_v18 = vadd.f32 %v3616_v2, %v3319_v35  ;;  %v3303_v29 = vmul.f32 %v4894_v48, %v6028_v54 }
 0xac7   : > { %v3331_v28 = vadd.f32 %v3616_v2, %v3316_v0 }
 0xac8   : > { %3342 = vst [vmem:[%s6044_s19 + $0x38] sm:$0xff] %v3334_v18  ;;  %v3318_v47 = vmul.f32 %v3615_v51, %v3303_v29 }
 0xac9   : > { %3339 = vst [vmem:[%s6044_s19 + $0x20] sm:$0xff] %v3331_v28 }
 0xaca   : > { %v3333_v13 = vadd.f32 %v3616_v2, %v3318_v47 }
 0xacc   : > { %3341 = vst [vmem:[%s6044_s19 + $0x30] sm:$0xff] %v3333_v13 }
 0xacd PF: > { %s21_s17 = sadd.s32 1, %s4909_s17  }
 0xace   : > { %p18_p4 = scmp.ge.s32.totalorder %s21_s17, 4  }
 0xad0   :  { %20 = sbr.rel (!%p18_p4) target bundleno = 1 (0x1), region = 107 }

</bundles_post_ra>
